<compile_context>
chip_gen: v7x
topology: tpu7x:2x2x1
jax: 0.10.0
libtpu: 0.0.40
codegen_flags: <defaults>
</compile_context>

<pallas_src>
import functools

import jax
import jax.numpy as jnp
from jax import lax
from jax.experimental import pallas as pl
from jax.experimental.pallas import tpu as pltpu

# architectural sizes exactly as in the PyTorch module
HID = 768            # ViT hidden size (feature_extractor.config.hidden_size)
CONV1_OUT = 128
CONV2_OUT = 64
EMBED = 64           # MultiheadAttention embed_dim (== conv2 out channels)
NUM_HEADS = 8
OUTPUT_SIZE = 10

PATCH = 8            # patch size of the ViT stand-in
FC_PAD = 128         # classifier output padded to a full lane tile


# ----------------------------------------------------------------------------
# Fused kernel: one grid step = one (batch element, frame)
# ----------------------------------------------------------------------------
def _fused_kernel(patches_ref, pe_w_ref, pe_b_ref, cls_pos0_ref, pos_rest_ref,
                  c1_w_ref, c1_b_ref, c2_w_ref, c2_b_ref,
                  in_w_ref, in_b_ref, out_w_ref, out_b_ref,
                  fc_w_ref, fc_b_ref,
                  o_ref,
                  pad1_ref, pad2_ref, pooled_ref,
                  *, num_frames, num_heads, seq_len):
    L = seq_len
    f = pl.program_id(1)

    # init the frame-mean accumulator at the first frame of this batch element
    @pl.when(f == 0)
    def _():
        pooled_ref[...] = jnp.zeros_like(pooled_ref)

    # ---- ViT stand-in: patch embedding + CLS + position embeddings ----------
    patches = patches_ref[0, 0].astype(jnp.bfloat16)          # (nP, patch_dim)
    emb = jnp.dot(patches, pe_w_ref[...],
                  preferred_element_type=jnp.float32)
    emb = emb + pe_b_ref[...] + pos_rest_ref[...]              # (nP, HID) f32

    # hidden-state slab with zero halo rows -> in-kernel im2col for k=3 conv
    pad1_ref[0:1, :] = jnp.zeros((1, HID), jnp.float32)
    pad1_ref[L + 1:L + 2, :] = jnp.zeros((1, HID), jnp.float32)
    pad1_ref[1:2, :] = cls_pos0_ref[...]                       # CLS + pos[0]
    pad1_ref[2:L + 1, :] = emb                                 # patches + pos[1:]

    def conv3_relu(pad_ref, w_ref, b_ref):
        # Conv1d(kernel=3, padding=1) == sum of 3 shifted matmuls on the slab.
        t0 = pad_ref[0:L, :].astype(jnp.bfloat16)
        t1 = pad_ref[1:L + 1, :].astype(jnp.bfloat16)
        t2 = pad_ref[2:L + 2, :].astype(jnp.bfloat16)
        y = (jnp.dot(t0, w_ref[0], preferred_element_type=jnp.float32)
             + jnp.dot(t1, w_ref[1], preferred_element_type=jnp.float32)
             + jnp.dot(t2, w_ref[2], preferred_element_type=jnp.float32)
             + b_ref[...])
        return jnp.maximum(y, 0.0)

    y1 = conv3_relu(pad1_ref, c1_w_ref, c1_b_ref)              # (L, 128)

    pad2_ref[0:1, :] = jnp.zeros((1, CONV1_OUT), jnp.float32)
    pad2_ref[L + 1:L + 2, :] = jnp.zeros((1, CONV1_OUT), jnp.float32)
    pad2_ref[1:L + 1, :] = y1
    y2 = conv3_relu(pad2_ref, c2_w_ref, c2_b_ref)              # (L, 64)

    # ---- MultiheadAttention(embed_dim=64, num_heads=8), self-attention ------
    z = jnp.dot(y2.astype(jnp.bfloat16), in_w_ref[...],
                preferred_element_type=jnp.float32) + in_b_ref[...]  # (L, 192)
    dh = EMBED // num_heads
    scale = 1.0 / (dh ** 0.5)

    attn = jnp.zeros((L, EMBED), jnp.float32)
    for h in range(num_heads):                    # static unroll; out-proj folded in
        qh = z[:, h * dh:(h + 1) * dh].astype(jnp.bfloat16)
        kh = z[:, EMBED + h * dh:EMBED + (h + 1) * dh].astype(jnp.bfloat16)
        vh = z[:, 2 * EMBED + h * dh:2 * EMBED + (h + 1) * dh].astype(jnp.bfloat16)
        s = lax.dot_general(qh, kh,
                            dimension_numbers=(((1,), (1,)), ((), ())),
                            preferred_element_type=jnp.float32) * scale   # (L, L)
        s = s - jnp.max(s, axis=-1, keepdims=True)
        p = jnp.exp(s)
        p = p / jnp.sum(p, axis=-1, keepdims=True)
        ctx = jnp.dot(p.astype(jnp.bfloat16), vh,
                      preferred_element_type=jnp.float32)                 # (L, dh)
        attn = attn + jnp.dot(ctx.astype(jnp.bfloat16),
                              out_w_ref[h * dh:(h + 1) * dh, :],
                              preferred_element_type=jnp.float32)
    attn = attn + out_b_ref[...]                                          # (L, 64)

    # ---- mean over the sequence, accumulate the per-frame mean --------------
    pooled_ref[...] += jnp.mean(attn, axis=0, keepdims=True)              # (1, 64)

    # ---- last frame: mean over frames + final linear (lane-padded to 128) ---
    @pl.when(f == num_frames - 1)
    def _():
        pooled = (pooled_ref[...] * (1.0 / num_frames)).astype(jnp.bfloat16)
        logits = jnp.dot(pooled, fc_w_ref[...],
                         preferred_element_type=jnp.float32) + fc_b_ref[...]
        o_ref[0] = logits


# ----------------------------------------------------------------------------
# Parameters (deterministic synthetic init)
# ----------------------------------------------------------------------------
def init_params(key, output_size, img_hw=(16, 16), channels=3):
    ks = iter(jax.random.split(key, 16))

    def nrm(shape, s=0.02, dtype=jnp.float32):
        return (jax.random.normal(next(ks), shape, jnp.float32) * s).astype(dtype)

    H, W = img_hw
    patch_dim = channels * PATCH * PATCH
    n_patch = (H // PATCH) * (W // PATCH)          # seq_len derived, not hard-coded

    pos = nrm((n_patch + 1, HID))
    cls = nrm((1, HID))

    # final classifier padded to 128 output lanes; wrapper slices to output_size
    fc_w = jnp.zeros((EMBED, FC_PAD), jnp.float32)
    fc_w = fc_w.at[:, :output_size].set(nrm((EMBED, output_size)))

    return {
        # ViT stand-in patch embedding
        "pe_w": nrm((patch_dim, HID), dtype=jnp.bfloat16),
        "pe_b": jnp.zeros((1, HID), jnp.float32),
        "cls_pos0": cls + pos[0:1],                # CLS token + pos[0], (1, HID)
        "pos_rest": pos[1:],                       # (n_patch, HID)
        # Conv1d weights, (k, Cin, Cout) layout
        "c1_w": nrm((3, HID, CONV1_OUT), dtype=jnp.bfloat16),
        "c1_b": jnp.zeros((1, CONV1_OUT), jnp.float32),
        "c2_w": nrm((3, CONV1_OUT, CONV2_OUT), dtype=jnp.bfloat16),
        "c2_b": jnp.zeros((1, CONV2_OUT), jnp.float32),
        # MultiheadAttention in/out projections (stored (in, out) = torch W^T)
        "in_w": nrm((EMBED, 3 * EMBED), dtype=jnp.bfloat16),
        "in_b": jnp.zeros((1, 3 * EMBED), jnp.float32),
        "out_w": nrm((EMBED, EMBED), dtype=jnp.bfloat16),
        "out_b": jnp.zeros((1, EMBED), jnp.float32),
        # final classifier (lane-padded)
        "fc_w": fc_w.astype(jnp.bfloat16),
        "fc_b": jnp.zeros((1, FC_PAD), jnp.float32),
    }


# ----------------------------------------------------------------------------
# Forward pass
# ----------------------------------------------------------------------------
def cnn_attention_forward(params, x):
    # x: (batch, num_frames, C, H, W)
    B, F, C, H, W = x.shape
    P = PATCH
    nP = (H // P) * (W // P)
    L = nP + 1
    patch_dim = C * P * P

    # cheap XLA-side layout plumbing: pixels -> per-frame flattened patches
    patches = x.reshape(B, F, C, H // P, P, W // P, P)
    patches = patches.transpose(0, 1, 3, 5, 2, 4, 6).reshape(B, F, nP, patch_dim)

    def full(shape):
        zeros = (0,) * len(shape)
        return pl.BlockSpec(shape, lambda b, f: zeros)

    kernel = functools.partial(_fused_kernel, num_frames=F,
                               num_heads=NUM_HEADS, seq_len=L)

    out = pl.pallas_call(
        kernel,
        out_shape=jax.ShapeDtypeStruct((B, 1, FC_PAD), jnp.float32),
        grid=(B, F),
        in_specs=[
            pl.BlockSpec((1, 1, nP, patch_dim), lambda b, f: (b, f, 0, 0)),
            full((patch_dim, HID)), full((1, HID)),
            full((1, HID)), full((nP, HID)),
            full((3, HID, CONV1_OUT)), full((1, CONV1_OUT)),
            full((3, CONV1_OUT, CONV2_OUT)), full((1, CONV2_OUT)),
            full((EMBED, 3 * EMBED)), full((1, 3 * EMBED)),
            full((EMBED, EMBED)), full((1, EMBED)),
            full((EMBED, FC_PAD)), full((1, FC_PAD)),
        ],
        out_specs=pl.BlockSpec((1, 1, FC_PAD), lambda b, f: (b, 0, 0)),
        scratch_shapes=[
            pltpu.VMEM((L + 2, HID), jnp.float32),        # conv1 zero-halo slab
            pltpu.VMEM((L + 2, CONV1_OUT), jnp.float32),  # conv2 zero-halo slab
            pltpu.VMEM((1, EMBED), jnp.float32),          # frame-mean accumulator
        ],
        compiler_params=pltpu.CompilerParams(
            dimension_semantics=("parallel", "arbitrary"),
            vmem_limit_bytes=32 * 1024 * 1024),
    )(patches, params["pe_w"], params["pe_b"], params["cls_pos0"],
      params["pos_rest"], params["c1_w"], params["c1_b"],
      params["c2_w"], params["c2_b"], params["in_w"], params["in_b"],
      params["out_w"], params["out_b"], params["fc_w"], params["fc_b"])

    # strip the lane padding of the classifier
    return out.reshape(B, FC_PAD)[:, :OUTPUT_SIZE]     # (batch, output_size)


if __name__ == "__main__":
    key = jax.random.PRNGKey(0)
    pkey, xkey = jax.random.split(key)
    B, F, C, IMG = 2, 2, 3, 16
    params = init_params(pkey, OUTPUT_SIZE, img_hw=(IMG, IMG), channels=C)
    x = jax.random.normal(xkey, (B, F, C, IMG, IMG), jnp.float32)

    out = jax.jit(cnn_attention_forward)(params, x)
    out = jax.block_until_ready(out)
    assert out.shape == (B, OUTPUT_SIZE), out.shape
    assert bool(jnp.all(jnp.isfinite(out)))
    print("KERNEL_OK")
</pallas_src>

<mosaic_0001>
module attributes {stable_mosaic.version = 11 : i64} {
  func.func @_fused_kernel(%arg0: i32, %arg1: i32, %arg2: memref<1x1x4x192xf32, #tpu.memory_space<vmem>>, %arg3: memref<192x768xbf16, #tpu.memory_space<vmem>>, %arg4: memref<1x768xf32, #tpu.memory_space<vmem>>, %arg5: memref<1x768xf32, #tpu.memory_space<vmem>>, %arg6: memref<4x768xf32, #tpu.memory_space<vmem>>, %arg7: memref<3x768x128xbf16, #tpu.memory_space<vmem>>, %arg8: memref<1x128xf32, #tpu.memory_space<vmem>>, %arg9: memref<3x128x64xbf16, #tpu.memory_space<vmem>>, %arg10: memref<1x64xf32, #tpu.memory_space<vmem>>, %arg11: memref<64x192xbf16, #tpu.memory_space<vmem>>, %arg12: memref<1x192xf32, #tpu.memory_space<vmem>>, %arg13: memref<64x64xbf16, #tpu.memory_space<vmem>>, %arg14: memref<1x64xf32, #tpu.memory_space<vmem>>, %arg15: memref<64x128xbf16, #tpu.memory_space<vmem>>, %arg16: memref<1x128xf32, #tpu.memory_space<vmem>>, %arg17: memref<1x1x128xf32, #tpu.memory_space<vmem>>, %arg18: memref<7x768xf32, #tpu.memory_space<vmem>>, %arg19: memref<7x128xf32, #tpu.memory_space<vmem>>, %arg20: memref<1x64xf32, #tpu.memory_space<vmem>>) attributes {dimension_semantics = [#tpu.dimension_semantics<parallel>, #tpu.dimension_semantics<arbitrary>], iteration_bounds = array<i64: 2, 2>, scalar_prefetch = 0 : i64, scratch_operands = 3 : i64, tpu.core_type = #tpu.core_type<tc>, window_params = [{transform_indices = @transform_0, window_bounds = array<i64: 1, 1, 4, 192>}, {pipeline_mode = #tpu.pipeline_mode<synchronous>, transform_indices = @transform_1, window_bounds = array<i64: 192, 768>}, {pipeline_mode = #tpu.pipeline_mode<synchronous>, transform_indices = @transform_2, window_bounds = array<i64: 1, 768>}, {pipeline_mode = #tpu.pipeline_mode<synchronous>, transform_indices = @transform_3, window_bounds = array<i64: 1, 768>}, {pipeline_mode = #tpu.pipeline_mode<synchronous>, transform_indices = @transform_4, window_bounds = array<i64: 4, 768>}, {pipeline_mode = #tpu.pipeline_mode<synchronous>, transform_indices = @transform_5, window_bounds = array<i64: 3, 768, 128>}, {pipeline_mode = #tpu.pipeline_mode<synchronous>, transform_indices = @transform_6, window_bounds = array<i64: 1, 128>}, {pipeline_mode = #tpu.pipeline_mode<synchronous>, transform_indices = @transform_7, window_bounds = array<i64: 3, 128, 64>}, {pipeline_mode = #tpu.pipeline_mode<synchronous>, transform_indices = @transform_8, window_bounds = array<i64: 1, 64>}, {pipeline_mode = #tpu.pipeline_mode<synchronous>, transform_indices = @transform_9, window_bounds = array<i64: 64, 192>}, {pipeline_mode = #tpu.pipeline_mode<synchronous>, transform_indices = @transform_10, window_bounds = array<i64: 1, 192>}, {pipeline_mode = #tpu.pipeline_mode<synchronous>, transform_indices = @transform_11, window_bounds = array<i64: 64, 64>}, {pipeline_mode = #tpu.pipeline_mode<synchronous>, transform_indices = @transform_12, window_bounds = array<i64: 1, 64>}, {pipeline_mode = #tpu.pipeline_mode<synchronous>, transform_indices = @transform_13, window_bounds = array<i64: 64, 128>}, {pipeline_mode = #tpu.pipeline_mode<synchronous>, transform_indices = @transform_14, window_bounds = array<i64: 1, 128>}, {transform_indices = @transform_15, window_bounds = array<i64: 1, 1, 128>}]} {
    %c0_i32 = arith.constant 0 : i32
    %0 = arith.cmpi eq, %arg1, %c0_i32 : i32
    %1 = arith.extui %0 : i1 to i32
    %c0_i32_0 = arith.constant 0 : i32
    %2 = arith.cmpi ne, %1, %c0_i32_0 : i32
    scf.if %2 {
      %cst_141 = arith.constant 0.000000e+00 : f32
      %281 = vector.broadcast %cst_141 : f32 to vector<1x64xf32>
      %c0_142 = arith.constant 0 : index
      %c0_143 = arith.constant 0 : index
      %282 = vector.load %arg20[%c0_142, %c0_143] : memref<1x64xf32, #tpu.memory_space<vmem>>, vector<1x64xf32>
      tpu.vector_store %arg20[%c0_142, %c0_143], %281 {strides = array<i32>} : memref<1x64xf32, #tpu.memory_space<vmem>>, vector<1x64xf32>,
    } else {
    }
    %c0 = arith.constant 0 : index
    %c0_1 = arith.constant 0 : index
    %c0_2 = arith.constant 0 : index
    %c0_3 = arith.constant 0 : index
    %3 = vector.load %arg2[%c0, %c0_1, %c0_2, %c0_3] : memref<1x1x4x192xf32, #tpu.memory_space<vmem>>, vector<1x1x4x192xf32>
    %4 = vector.shape_cast %3 : vector<1x1x4x192xf32> to vector<4x192xf32>
    %5 = arith.truncf %4 : vector<4x192xf32> to vector<4x192xbf16>
    %c0_4 = arith.constant 0 : index
    %c0_5 = arith.constant 0 : index
    %6 = vector.load %arg3[%c0_4, %c0_5] : memref<192x768xbf16, #tpu.memory_space<vmem>>, vector<192x768xbf16>
    %cst = arith.constant dense<0.000000e+00> : vector<4x768xf32>
    %7 = tpu.matmul %5, %6, %cst {dimension_numbers = #tpu.dot_dimension_numbers<[1], [0], [0], [1], [0, 0, 1, 1], [], []>} : vector<4x192xbf16>, vector<192x768xbf16>, vector<4x768xf32> -> vector<4x768xf32>
    %c0_6 = arith.constant 0 : index
    %c0_7 = arith.constant 0 : index
    %8 = vector.load %arg4[%c0_6, %c0_7] : memref<1x768xf32, #tpu.memory_space<vmem>>, vector<1x768xf32>
    %9 = vector.broadcast %8 : vector<1x768xf32> to vector<4x768xf32>
    %10 = arith.addf %7, %9 : vector<4x768xf32>
    %c0_8 = arith.constant 0 : index
    %c0_9 = arith.constant 0 : index
    %11 = vector.load %arg6[%c0_8, %c0_9] : memref<4x768xf32, #tpu.memory_space<vmem>>, vector<4x768xf32>
    %12 = arith.addf %10, %11 : vector<4x768xf32>
    %cst_10 = arith.constant 0.000000e+00 : f32
    %13 = vector.broadcast %cst_10 : f32 to vector<1x768xf32>
    %c0_11 = arith.constant 0 : index
    %c0_12 = arith.constant 0 : index
    %14 = vector.load %arg18[%c0_11, %c0_12] : memref<7x768xf32, #tpu.memory_space<vmem>>, vector<1x768xf32>
    tpu.vector_store %arg18[%c0_11, %c0_12], %13 {strides = array<i32>} : memref<7x768xf32, #tpu.memory_space<vmem>>, vector<1x768xf32>,
    %cst_13 = arith.constant 0.000000e+00 : f32
    %15 = vector.broadcast %cst_13 : f32 to vector<1x768xf32>
    %c6 = arith.constant 6 : index
    %c0_14 = arith.constant 0 : index
    %16 = vector.load %arg18[%c6, %c0_14] : memref<7x768xf32, #tpu.memory_space<vmem>>, vector<1x768xf32>
    tpu.vector_store %arg18[%c6, %c0_14], %15 {strides = array<i32>} : memref<7x768xf32, #tpu.memory_space<vmem>>, vector<1x768xf32>,
    %c0_15 = arith.constant 0 : index
    %c0_16 = arith.constant 0 : index
    %17 = vector.load %arg5[%c0_15, %c0_16] : memref<1x768xf32, #tpu.memory_space<vmem>>, vector<1x768xf32>
    %c1 = arith.constant 1 : index
    %c0_17 = arith.constant 0 : index
    %18 = vector.load %arg18[%c1, %c0_17] : memref<7x768xf32, #tpu.memory_space<vmem>>, vector<1x768xf32>
    tpu.vector_store %arg18[%c1, %c0_17], %17 {strides = array<i32>} : memref<7x768xf32, #tpu.memory_space<vmem>>, vector<1x768xf32>,
    %c2 = arith.constant 2 : index
    %c0_18 = arith.constant 0 : index
    %19 = vector.load %arg18[%c2, %c0_18] : memref<7x768xf32, #tpu.memory_space<vmem>>, vector<4x768xf32>
    tpu.vector_store %arg18[%c2, %c0_18], %12 {strides = array<i32>} : memref<7x768xf32, #tpu.memory_space<vmem>>, vector<4x768xf32>,
    %c0_19 = arith.constant 0 : index
    %c0_20 = arith.constant 0 : index
    %20 = vector.load %arg18[%c0_19, %c0_20] : memref<7x768xf32, #tpu.memory_space<vmem>>, vector<5x768xf32>
    %21 = arith.truncf %20 : vector<5x768xf32> to vector<5x768xbf16>
    %c1_21 = arith.constant 1 : index
    %c0_22 = arith.constant 0 : index
    %22 = vector.load %arg18[%c1_21, %c0_22] : memref<7x768xf32, #tpu.memory_space<vmem>>, vector<5x768xf32>
    %23 = arith.truncf %22 : vector<5x768xf32> to vector<5x768xbf16>
    %c2_23 = arith.constant 2 : index
    %c0_24 = arith.constant 0 : index
    %24 = vector.load %arg18[%c2_23, %c0_24] : memref<7x768xf32, #tpu.memory_space<vmem>>, vector<5x768xf32>
    %25 = arith.truncf %24 : vector<5x768xf32> to vector<5x768xbf16>
    %c0_25 = arith.constant 0 : index
    %c0_26 = arith.constant 0 : index
    %c0_27 = arith.constant 0 : index
    %26 = vector.load %arg7[%c0_25, %c0_26, %c0_27] : memref<3x768x128xbf16, #tpu.memory_space<vmem>>, vector<1x768x128xbf16>
    %27 = vector.shape_cast %26 : vector<1x768x128xbf16> to vector<768x128xbf16>
    %cst_28 = arith.constant dense<0.000000e+00> : vector<5x128xf32>
    %28 = tpu.matmul %21, %27, %cst_28 {dimension_numbers = #tpu.dot_dimension_numbers<[1], [0], [0], [1], [0, 0, 1, 1], [], []>} : vector<5x768xbf16>, vector<768x128xbf16>, vector<5x128xf32> -> vector<5x128xf32>
    %c1_29 = arith.constant 1 : index
    %c0_30 = arith.constant 0 : index
    %c0_31 = arith.constant 0 : index
    %29 = vector.load %arg7[%c1_29, %c0_30, %c0_31] : memref<3x768x128xbf16, #tpu.memory_space<vmem>>, vector<1x768x128xbf16>
    %30 = vector.shape_cast %29 : vector<1x768x128xbf16> to vector<768x128xbf16>
    %cst_32 = arith.constant dense<0.000000e+00> : vector<5x128xf32>
    %31 = tpu.matmul %23, %30, %cst_32 {dimension_numbers = #tpu.dot_dimension_numbers<[1], [0], [0], [1], [0, 0, 1, 1], [], []>} : vector<5x768xbf16>, vector<768x128xbf16>, vector<5x128xf32> -> vector<5x128xf32>
    %32 = arith.addf %28, %31 : vector<5x128xf32>
    %c2_33 = arith.constant 2 : index
    %c0_34 = arith.constant 0 : index
    %c0_35 = arith.constant 0 : index
    %33 = vector.load %arg7[%c2_33, %c0_34, %c0_35] : memref<3x768x128xbf16, #tpu.memory_space<vmem>>, vector<1x768x128xbf16>
    %34 = vector.shape_cast %33 : vector<1x768x128xbf16> to vector<768x128xbf16>
    %cst_36 = arith.constant dense<0.000000e+00> : vector<5x128xf32>
    %35 = tpu.matmul %25, %34, %cst_36 {dimension_numbers = #tpu.dot_dimension_numbers<[1], [0], [0], [1], [0, 0, 1, 1], [], []>} : vector<5x768xbf16>, vector<768x128xbf16>, vector<5x128xf32> -> vector<5x128xf32>
    %36 = arith.addf %32, %35 : vector<5x128xf32>
    %c0_37 = arith.constant 0 : index
    %c0_38 = arith.constant 0 : index
    %37 = vector.load %arg8[%c0_37, %c0_38] : memref<1x128xf32, #tpu.memory_space<vmem>>, vector<1x128xf32>
    %38 = vector.broadcast %37 : vector<1x128xf32> to vector<5x128xf32>
    %39 = arith.addf %36, %38 : vector<5x128xf32>
    %cst_39 = arith.constant 0.000000e+00 : f32
    %40 = vector.broadcast %cst_39 : f32 to vector<5x128xf32>
    %41 = arith.maximumf %39, %40 : vector<5x128xf32>
    %cst_40 = arith.constant 0.000000e+00 : f32
    %42 = vector.broadcast %cst_40 : f32 to vector<1x128xf32>
    %c0_41 = arith.constant 0 : index
    %c0_42 = arith.constant 0 : index
    %43 = vector.load %arg19[%c0_41, %c0_42] : memref<7x128xf32, #tpu.memory_space<vmem>>, vector<1x128xf32>
    tpu.vector_store %arg19[%c0_41, %c0_42], %42 {strides = array<i32>} : memref<7x128xf32, #tpu.memory_space<vmem>>, vector<1x128xf32>,
    %cst_43 = arith.constant 0.000000e+00 : f32
    %44 = vector.broadcast %cst_43 : f32 to vector<1x128xf32>
    %c6_44 = arith.constant 6 : index
    %c0_45 = arith.constant 0 : index
    %45 = vector.load %arg19[%c6_44, %c0_45] : memref<7x128xf32, #tpu.memory_space<vmem>>, vector<1x128xf32>
    tpu.vector_store %arg19[%c6_44, %c0_45], %44 {strides = array<i32>} : memref<7x128xf32, #tpu.memory_space<vmem>>, vector<1x128xf32>,
    %c1_46 = arith.constant 1 : index
    %c0_47 = arith.constant 0 : index
    %46 = vector.load %arg19[%c1_46, %c0_47] : memref<7x128xf32, #tpu.memory_space<vmem>>, vector<5x128xf32>
    tpu.vector_store %arg19[%c1_46, %c0_47], %41 {strides = array<i32>} : memref<7x128xf32, #tpu.memory_space<vmem>>, vector<5x128xf32>,
    %c0_48 = arith.constant 0 : index
    %c0_49 = arith.constant 0 : index
    %47 = vector.load %arg19[%c0_48, %c0_49] : memref<7x128xf32, #tpu.memory_space<vmem>>, vector<5x128xf32>
    %48 = arith.truncf %47 : vector<5x128xf32> to vector<5x128xbf16>
    %c1_50 = arith.constant 1 : index
    %c0_51 = arith.constant 0 : index
    %49 = vector.load %arg19[%c1_50, %c0_51] : memref<7x128xf32, #tpu.memory_space<vmem>>, vector<5x128xf32>
    %50 = arith.truncf %49 : vector<5x128xf32> to vector<5x128xbf16>
    %c2_52 = arith.constant 2 : index
    %c0_53 = arith.constant 0 : index
    %51 = vector.load %arg19[%c2_52, %c0_53] : memref<7x128xf32, #tpu.memory_space<vmem>>, vector<5x128xf32>
    %52 = arith.truncf %51 : vector<5x128xf32> to vector<5x128xbf16>
    %c0_54 = arith.constant 0 : index
    %c0_55 = arith.constant 0 : index
    %c0_56 = arith.constant 0 : index
    %53 = vector.load %arg9[%c0_54, %c0_55, %c0_56] : memref<3x128x64xbf16, #tpu.memory_space<vmem>>, vector<1x128x64xbf16>
    %54 = vector.shape_cast %53 : vector<1x128x64xbf16> to vector<128x64xbf16>
    %cst_57 = arith.constant dense<0.000000e+00> : vector<5x64xf32>
    %55 = tpu.matmul %48, %54, %cst_57 {dimension_numbers = #tpu.dot_dimension_numbers<[1], [0], [0], [1], [0, 0, 1, 1], [], []>} : vector<5x128xbf16>, vector<128x64xbf16>, vector<5x64xf32> -> vector<5x64xf32>
    %c1_58 = arith.constant 1 : index
    %c0_59 = arith.constant 0 : index
    %c0_60 = arith.constant 0 : index
    %56 = vector.load %arg9[%c1_58, %c0_59, %c0_60] : memref<3x128x64xbf16, #tpu.memory_space<vmem>>, vector<1x128x64xbf16>
    %57 = vector.shape_cast %56 : vector<1x128x64xbf16> to vector<128x64xbf16>
    %cst_61 = arith.constant dense<0.000000e+00> : vector<5x64xf32>
    %58 = tpu.matmul %50, %57, %cst_61 {dimension_numbers = #tpu.dot_dimension_numbers<[1], [0], [0], [1], [0, 0, 1, 1], [], []>} : vector<5x128xbf16>, vector<128x64xbf16>, vector<5x64xf32> -> vector<5x64xf32>
    %59 = arith.addf %55, %58 : vector<5x64xf32>
    %c2_62 = arith.constant 2 : index
    %c0_63 = arith.constant 0 : index
    %c0_64 = arith.constant 0 : index
    %60 = vector.load %arg9[%c2_62, %c0_63, %c0_64] : memref<3x128x64xbf16, #tpu.memory_space<vmem>>, vector<1x128x64xbf16>
    %61 = vector.shape_cast %60 : vector<1x128x64xbf16> to vector<128x64xbf16>
    %cst_65 = arith.constant dense<0.000000e+00> : vector<5x64xf32>
    %62 = tpu.matmul %52, %61, %cst_65 {dimension_numbers = #tpu.dot_dimension_numbers<[1], [0], [0], [1], [0, 0, 1, 1], [], []>} : vector<5x128xbf16>, vector<128x64xbf16>, vector<5x64xf32> -> vector<5x64xf32>
    %63 = arith.addf %59, %62 : vector<5x64xf32>
    %c0_66 = arith.constant 0 : index
    %c0_67 = arith.constant 0 : index
    %64 = vector.load %arg10[%c0_66, %c0_67] : memref<1x64xf32, #tpu.memory_space<vmem>>, vector<1x64xf32>
    %65 = vector.broadcast %64 : vector<1x64xf32> to vector<5x64xf32>
    %66 = arith.addf %63, %65 : vector<5x64xf32>
    %cst_68 = arith.constant 0.000000e+00 : f32
    %67 = vector.broadcast %cst_68 : f32 to vector<5x64xf32>
    %68 = arith.maximumf %66, %67 : vector<5x64xf32>
    %69 = arith.truncf %68 : vector<5x64xf32> to vector<5x64xbf16>
    %c0_69 = arith.constant 0 : index
    %c0_70 = arith.constant 0 : index
    %70 = vector.load %arg11[%c0_69, %c0_70] : memref<64x192xbf16, #tpu.memory_space<vmem>>, vector<64x192xbf16>
    %cst_71 = arith.constant dense<0.000000e+00> : vector<5x192xf32>
    %71 = tpu.matmul %69, %70, %cst_71 {dimension_numbers = #tpu.dot_dimension_numbers<[1], [0], [0], [1], [0, 0, 1, 1], [], []>} : vector<5x64xbf16>, vector<64x192xbf16>, vector<5x192xf32> -> vector<5x192xf32>
    %c0_72 = arith.constant 0 : index
    %c0_73 = arith.constant 0 : index
    %72 = vector.load %arg12[%c0_72, %c0_73] : memref<1x192xf32, #tpu.memory_space<vmem>>, vector<1x192xf32>
    %73 = vector.broadcast %72 : vector<1x192xf32> to vector<5x192xf32>
    %74 = arith.addf %71, %73 : vector<5x192xf32>
    %cst_74 = arith.constant 0.000000e+00 : f32
    %75 = vector.broadcast %cst_74 : f32 to vector<5x64xf32>
    %76 = vector.extract_strided_slice %74 {offsets = [0, 0], sizes = [5, 8], strides = [1, 1]} : vector<5x192xf32> to vector<5x8xf32>
    %77 = arith.truncf %76 : vector<5x8xf32> to vector<5x8xbf16>
    %78 = vector.extract_strided_slice %74 {offsets = [0, 64], sizes = [5, 8], strides = [1, 1]} : vector<5x192xf32> to vector<5x8xf32>
    %79 = arith.truncf %78 : vector<5x8xf32> to vector<5x8xbf16>
    %80 = vector.extract_strided_slice %74 {offsets = [0, 128], sizes = [5, 8], strides = [1, 1]} : vector<5x192xf32> to vector<5x8xf32>
    %81 = arith.truncf %80 : vector<5x8xf32> to vector<5x8xbf16>
    %cst_75 = arith.constant dense<0.000000e+00> : vector<5x5xf32>
    %82 = tpu.matmul %77, %79, %cst_75 {dimension_numbers = #tpu.dot_dimension_numbers<[1], [1], [0], [0], [0, 0, 1, 0], [], []>} : vector<5x8xbf16>, vector<5x8xbf16>, vector<5x5xf32> -> vector<5x5xf32>
    %cst_76 = arith.constant 0.353553385 : f32
    %83 = vector.broadcast %cst_76 : f32 to vector<5x5xf32>
    %84 = arith.mulf %82, %83 : vector<5x5xf32>
    %cst_77 = arith.constant dense<0xFF800000> : vector<5xf32>
    %85 = vector.multi_reduction <maximumf>, %84, %cst_77 [1] : vector<5x5xf32> to vector<5xf32>
    %86 = vector.shape_cast %85 : vector<5xf32> to vector<5x1xf32>
    %87 = vector.broadcast %86 : vector<5x1xf32> to vector<5x5xf32>
    %88 = arith.subf %84, %87 : vector<5x5xf32>
    %89 = math.exp %88 : vector<5x5xf32>
    %cst_78 = arith.constant dense<0.000000e+00> : vector<5xf32>
    %90 = vector.multi_reduction <add>, %89, %cst_78 [1] : vector<5x5xf32> to vector<5xf32>
    %91 = vector.shape_cast %90 : vector<5xf32> to vector<5x1xf32>
    %92 = vector.broadcast %91 : vector<5x1xf32> to vector<5x5xf32>
    %93 = arith.divf %89, %92 : vector<5x5xf32>
    %94 = arith.truncf %93 : vector<5x5xf32> to vector<5x5xbf16>
    %cst_79 = arith.constant dense<0.000000e+00> : vector<5x8xf32>
    %95 = tpu.matmul %94, %81, %cst_79 {dimension_numbers = #tpu.dot_dimension_numbers<[1], [0], [0], [1], [0, 0, 1, 1], [], []>} : vector<5x5xbf16>, vector<5x8xbf16>, vector<5x8xf32> -> vector<5x8xf32>
    %96 = arith.truncf %95 : vector<5x8xf32> to vector<5x8xbf16>
    %c0_80 = arith.constant 0 : index
    %c0_81 = arith.constant 0 : index
    %97 = vector.load %arg13[%c0_80, %c0_81] : memref<64x64xbf16, #tpu.memory_space<vmem>>, vector<8x64xbf16>
    %cst_82 = arith.constant dense<0.000000e+00> : vector<5x64xf32>
    %98 = tpu.matmul %96, %97, %cst_82 {dimension_numbers = #tpu.dot_dimension_numbers<[1], [0], [0], [1], [0, 0, 1, 1], [], []>} : vector<5x8xbf16>, vector<8x64xbf16>, vector<5x64xf32> -> vector<5x64xf32>
    %99 = arith.addf %75, %98 : vector<5x64xf32>
    %100 = vector.extract_strided_slice %74 {offsets = [0, 8], sizes = [5, 8], strides = [1, 1]} : vector<5x192xf32> to vector<5x8xf32>
    %101 = arith.truncf %100 : vector<5x8xf32> to vector<5x8xbf16>
    %102 = vector.extract_strided_slice %74 {offsets = [0, 72], sizes = [5, 8], strides = [1, 1]} : vector<5x192xf32> to vector<5x8xf32>
    %103 = arith.truncf %102 : vector<5x8xf32> to vector<5x8xbf16>
    %104 = vector.extract_strided_slice %74 {offsets = [0, 136], sizes = [5, 8], strides = [1, 1]} : vector<5x192xf32> to vector<5x8xf32>
    %105 = arith.truncf %104 : vector<5x8xf32> to vector<5x8xbf16>
    %cst_83 = arith.constant dense<0.000000e+00> : vector<5x5xf32>
    %106 = tpu.matmul %101, %103, %cst_83 {dimension_numbers = #tpu.dot_dimension_numbers<[1], [1], [0], [0], [0, 0, 1, 0], [], []>} : vector<5x8xbf16>, vector<5x8xbf16>, vector<5x5xf32> -> vector<5x5xf32>
    %cst_84 = arith.constant 0.353553385 : f32
    %107 = vector.broadcast %cst_84 : f32 to vector<5x5xf32>
    %108 = arith.mulf %106, %107 : vector<5x5xf32>
    %cst_85 = arith.constant dense<0xFF800000> : vector<5xf32>
    %109 = vector.multi_reduction <maximumf>, %108, %cst_85 [1] : vector<5x5xf32> to vector<5xf32>
    %110 = vector.shape_cast %109 : vector<5xf32> to vector<5x1xf32>
    %111 = vector.broadcast %110 : vector<5x1xf32> to vector<5x5xf32>
    %112 = arith.subf %108, %111 : vector<5x5xf32>
    %113 = math.exp %112 : vector<5x5xf32>
    %cst_86 = arith.constant dense<0.000000e+00> : vector<5xf32>
    %114 = vector.multi_reduction <add>, %113, %cst_86 [1] : vector<5x5xf32> to vector<5xf32>
    %115 = vector.shape_cast %114 : vector<5xf32> to vector<5x1xf32>
    %116 = vector.broadcast %115 : vector<5x1xf32> to vector<5x5xf32>
    %117 = arith.divf %113, %116 : vector<5x5xf32>
    %118 = arith.truncf %117 : vector<5x5xf32> to vector<5x5xbf16>
    %cst_87 = arith.constant dense<0.000000e+00> : vector<5x8xf32>
    %119 = tpu.matmul %118, %105, %cst_87 {dimension_numbers = #tpu.dot_dimension_numbers<[1], [0], [0], [1], [0, 0, 1, 1], [], []>} : vector<5x5xbf16>, vector<5x8xbf16>, vector<5x8xf32> -> vector<5x8xf32>
    %120 = arith.truncf %119 : vector<5x8xf32> to vector<5x8xbf16>
    %c8 = arith.constant 8 : index
    %c0_88 = arith.constant 0 : index
    %121 = vector.load %arg13[%c8, %c0_88] : memref<64x64xbf16, #tpu.memory_space<vmem>>, vector<8x64xbf16>
    %cst_89 = arith.constant dense<0.000000e+00> : vector<5x64xf32>
    %122 = tpu.matmul %120, %121, %cst_89 {dimension_numbers = #tpu.dot_dimension_numbers<[1], [0], [0], [1], [0, 0, 1, 1], [], []>} : vector<5x8xbf16>, vector<8x64xbf16>, vector<5x64xf32> -> vector<5x64xf32>
    %123 = arith.addf %99, %122 : vector<5x64xf32>
    %124 = vector.extract_strided_slice %74 {offsets = [0, 16], sizes = [5, 8], strides = [1, 1]} : vector<5x192xf32> to vector<5x8xf32>
    %125 = arith.truncf %124 : vector<5x8xf32> to vector<5x8xbf16>
    %126 = vector.extract_strided_slice %74 {offsets = [0, 80], sizes = [5, 8], strides = [1, 1]} : vector<5x192xf32> to vector<5x8xf32>
    %127 = arith.truncf %126 : vector<5x8xf32> to vector<5x8xbf16>
    %128 = vector.extract_strided_slice %74 {offsets = [0, 144], sizes = [5, 8], strides = [1, 1]} : vector<5x192xf32> to vector<5x8xf32>
    %129 = arith.truncf %128 : vector<5x8xf32> to vector<5x8xbf16>
    %cst_90 = arith.constant dense<0.000000e+00> : vector<5x5xf32>
    %130 = tpu.matmul %125, %127, %cst_90 {dimension_numbers = #tpu.dot_dimension_numbers<[1], [1], [0], [0], [0, 0, 1, 0], [], []>} : vector<5x8xbf16>, vector<5x8xbf16>, vector<5x5xf32> -> vector<5x5xf32>
    %cst_91 = arith.constant 0.353553385 : f32
    %131 = vector.broadcast %cst_91 : f32 to vector<5x5xf32>
    %132 = arith.mulf %130, %131 : vector<5x5xf32>
    %cst_92 = arith.constant dense<0xFF800000> : vector<5xf32>
    %133 = vector.multi_reduction <maximumf>, %132, %cst_92 [1] : vector<5x5xf32> to vector<5xf32>
    %134 = vector.shape_cast %133 : vector<5xf32> to vector<5x1xf32>
    %135 = vector.broadcast %134 : vector<5x1xf32> to vector<5x5xf32>
    %136 = arith.subf %132, %135 : vector<5x5xf32>
    %137 = math.exp %136 : vector<5x5xf32>
    %cst_93 = arith.constant dense<0.000000e+00> : vector<5xf32>
    %138 = vector.multi_reduction <add>, %137, %cst_93 [1] : vector<5x5xf32> to vector<5xf32>
    %139 = vector.shape_cast %138 : vector<5xf32> to vector<5x1xf32>
    %140 = vector.broadcast %139 : vector<5x1xf32> to vector<5x5xf32>
    %141 = arith.divf %137, %140 : vector<5x5xf32>
    %142 = arith.truncf %141 : vector<5x5xf32> to vector<5x5xbf16>
    %cst_94 = arith.constant dense<0.000000e+00> : vector<5x8xf32>
    %143 = tpu.matmul %142, %129, %cst_94 {dimension_numbers = #tpu.dot_dimension_numbers<[1], [0], [0], [1], [0, 0, 1, 1], [], []>} : vector<5x5xbf16>, vector<5x8xbf16>, vector<5x8xf32> -> vector<5x8xf32>
    %144 = arith.truncf %143 : vector<5x8xf32> to vector<5x8xbf16>
    %c16 = arith.constant 16 : index
    %c0_95 = arith.constant 0 : index
    %145 = vector.load %arg13[%c16, %c0_95] : memref<64x64xbf16, #tpu.memory_space<vmem>>, vector<8x64xbf16>
    %cst_96 = arith.constant dense<0.000000e+00> : vector<5x64xf32>
    %146 = tpu.matmul %144, %145, %cst_96 {dimension_numbers = #tpu.dot_dimension_numbers<[1], [0], [0], [1], [0, 0, 1, 1], [], []>} : vector<5x8xbf16>, vector<8x64xbf16>, vector<5x64xf32> -> vector<5x64xf32>
    %147 = arith.addf %123, %146 : vector<5x64xf32>
    %148 = vector.extract_strided_slice %74 {offsets = [0, 24], sizes = [5, 8], strides = [1, 1]} : vector<5x192xf32> to vector<5x8xf32>
    %149 = arith.truncf %148 : vector<5x8xf32> to vector<5x8xbf16>
    %150 = vector.extract_strided_slice %74 {offsets = [0, 88], sizes = [5, 8], strides = [1, 1]} : vector<5x192xf32> to vector<5x8xf32>
    %151 = arith.truncf %150 : vector<5x8xf32> to vector<5x8xbf16>
    %152 = vector.extract_strided_slice %74 {offsets = [0, 152], sizes = [5, 8], strides = [1, 1]} : vector<5x192xf32> to vector<5x8xf32>
    %153 = arith.truncf %152 : vector<5x8xf32> to vector<5x8xbf16>
    %cst_97 = arith.constant dense<0.000000e+00> : vector<5x5xf32>
    %154 = tpu.matmul %149, %151, %cst_97 {dimension_numbers = #tpu.dot_dimension_numbers<[1], [1], [0], [0], [0, 0, 1, 0], [], []>} : vector<5x8xbf16>, vector<5x8xbf16>, vector<5x5xf32> -> vector<5x5xf32>
    %cst_98 = arith.constant 0.353553385 : f32
    %155 = vector.broadcast %cst_98 : f32 to vector<5x5xf32>
    %156 = arith.mulf %154, %155 : vector<5x5xf32>
    %cst_99 = arith.constant dense<0xFF800000> : vector<5xf32>
    %157 = vector.multi_reduction <maximumf>, %156, %cst_99 [1] : vector<5x5xf32> to vector<5xf32>
    %158 = vector.shape_cast %157 : vector<5xf32> to vector<5x1xf32>
    %159 = vector.broadcast %158 : vector<5x1xf32> to vector<5x5xf32>
    %160 = arith.subf %156, %159 : vector<5x5xf32>
    %161 = math.exp %160 : vector<5x5xf32>
    %cst_100 = arith.constant dense<0.000000e+00> : vector<5xf32>
    %162 = vector.multi_reduction <add>, %161, %cst_100 [1] : vector<5x5xf32> to vector<5xf32>
    %163 = vector.shape_cast %162 : vector<5xf32> to vector<5x1xf32>
    %164 = vector.broadcast %163 : vector<5x1xf32> to vector<5x5xf32>
    %165 = arith.divf %161, %164 : vector<5x5xf32>
    %166 = arith.truncf %165 : vector<5x5xf32> to vector<5x5xbf16>
    %cst_101 = arith.constant dense<0.000000e+00> : vector<5x8xf32>
    %167 = tpu.matmul %166, %153, %cst_101 {dimension_numbers = #tpu.dot_dimension_numbers<[1], [0], [0], [1], [0, 0, 1, 1], [], []>} : vector<5x5xbf16>, vector<5x8xbf16>, vector<5x8xf32> -> vector<5x8xf32>
    %168 = arith.truncf %167 : vector<5x8xf32> to vector<5x8xbf16>
    %c24 = arith.constant 24 : index
    %c0_102 = arith.constant 0 : index
    %169 = vector.load %arg13[%c24, %c0_102] : memref<64x64xbf16, #tpu.memory_space<vmem>>, vector<8x64xbf16>
    %cst_103 = arith.constant dense<0.000000e+00> : vector<5x64xf32>
    %170 = tpu.matmul %168, %169, %cst_103 {dimension_numbers = #tpu.dot_dimension_numbers<[1], [0], [0], [1], [0, 0, 1, 1], [], []>} : vector<5x8xbf16>, vector<8x64xbf16>, vector<5x64xf32> -> vector<5x64xf32>
    %171 = arith.addf %147, %170 : vector<5x64xf32>
    %172 = vector.extract_strided_slice %74 {offsets = [0, 32], sizes = [5, 8], strides = [1, 1]} : vector<5x192xf32> to vector<5x8xf32>
    %173 = arith.truncf %172 : vector<5x8xf32> to vector<5x8xbf16>
    %174 = vector.extract_strided_slice %74 {offsets = [0, 96], sizes = [5, 8], strides = [1, 1]} : vector<5x192xf32> to vector<5x8xf32>
    %175 = arith.truncf %174 : vector<5x8xf32> to vector<5x8xbf16>
    %176 = vector.extract_strided_slice %74 {offsets = [0, 160], sizes = [5, 8], strides = [1, 1]} : vector<5x192xf32> to vector<5x8xf32>
    %177 = arith.truncf %176 : vector<5x8xf32> to vector<5x8xbf16>
    %cst_104 = arith.constant dense<0.000000e+00> : vector<5x5xf32>
    %178 = tpu.matmul %173, %175, %cst_104 {dimension_numbers = #tpu.dot_dimension_numbers<[1], [1], [0], [0], [0, 0, 1, 0], [], []>} : vector<5x8xbf16>, vector<5x8xbf16>, vector<5x5xf32> -> vector<5x5xf32>
    %cst_105 = arith.constant 0.353553385 : f32
    %179 = vector.broadcast %cst_105 : f32 to vector<5x5xf32>
    %180 = arith.mulf %178, %179 : vector<5x5xf32>
    %cst_106 = arith.constant dense<0xFF800000> : vector<5xf32>
    %181 = vector.multi_reduction <maximumf>, %180, %cst_106 [1] : vector<5x5xf32> to vector<5xf32>
    %182 = vector.shape_cast %181 : vector<5xf32> to vector<5x1xf32>
    %183 = vector.broadcast %182 : vector<5x1xf32> to vector<5x5xf32>
    %184 = arith.subf %180, %183 : vector<5x5xf32>
    %185 = math.exp %184 : vector<5x5xf32>
    %cst_107 = arith.constant dense<0.000000e+00> : vector<5xf32>
    %186 = vector.multi_reduction <add>, %185, %cst_107 [1] : vector<5x5xf32> to vector<5xf32>
    %187 = vector.shape_cast %186 : vector<5xf32> to vector<5x1xf32>
    %188 = vector.broadcast %187 : vector<5x1xf32> to vector<5x5xf32>
    %189 = arith.divf %185, %188 : vector<5x5xf32>
    %190 = arith.truncf %189 : vector<5x5xf32> to vector<5x5xbf16>
    %cst_108 = arith.constant dense<0.000000e+00> : vector<5x8xf32>
    %191 = tpu.matmul %190, %177, %cst_108 {dimension_numbers = #tpu.dot_dimension_numbers<[1], [0], [0], [1], [0, 0, 1, 1], [], []>} : vector<5x5xbf16>, vector<5x8xbf16>, vector<5x8xf32> -> vector<5x8xf32>
    %192 = arith.truncf %191 : vector<5x8xf32> to vector<5x8xbf16>
    %c32 = arith.constant 32 : index
    %c0_109 = arith.constant 0 : index
    %193 = vector.load %arg13[%c32, %c0_109] : memref<64x64xbf16, #tpu.memory_space<vmem>>, vector<8x64xbf16>
    %cst_110 = arith.constant dense<0.000000e+00> : vector<5x64xf32>
    %194 = tpu.matmul %192, %193, %cst_110 {dimension_numbers = #tpu.dot_dimension_numbers<[1], [0], [0], [1], [0, 0, 1, 1], [], []>} : vector<5x8xbf16>, vector<8x64xbf16>, vector<5x64xf32> -> vector<5x64xf32>
    %195 = arith.addf %171, %194 : vector<5x64xf32>
    %196 = vector.extract_strided_slice %74 {offsets = [0, 40], sizes = [5, 8], strides = [1, 1]} : vector<5x192xf32> to vector<5x8xf32>
    %197 = arith.truncf %196 : vector<5x8xf32> to vector<5x8xbf16>
    %198 = vector.extract_strided_slice %74 {offsets = [0, 104], sizes = [5, 8], strides = [1, 1]} : vector<5x192xf32> to vector<5x8xf32>
    %199 = arith.truncf %198 : vector<5x8xf32> to vector<5x8xbf16>
    %200 = vector.extract_strided_slice %74 {offsets = [0, 168], sizes = [5, 8], strides = [1, 1]} : vector<5x192xf32> to vector<5x8xf32>
    %201 = arith.truncf %200 : vector<5x8xf32> to vector<5x8xbf16>
    %cst_111 = arith.constant dense<0.000000e+00> : vector<5x5xf32>
    %202 = tpu.matmul %197, %199, %cst_111 {dimension_numbers = #tpu.dot_dimension_numbers<[1], [1], [0], [0], [0, 0, 1, 0], [], []>} : vector<5x8xbf16>, vector<5x8xbf16>, vector<5x5xf32> -> vector<5x5xf32>
    %cst_112 = arith.constant 0.353553385 : f32
    %203 = vector.broadcast %cst_112 : f32 to vector<5x5xf32>
    %204 = arith.mulf %202, %203 : vector<5x5xf32>
    %cst_113 = arith.constant dense<0xFF800000> : vector<5xf32>
    %205 = vector.multi_reduction <maximumf>, %204, %cst_113 [1] : vector<5x5xf32> to vector<5xf32>
    %206 = vector.shape_cast %205 : vector<5xf32> to vector<5x1xf32>
    %207 = vector.broadcast %206 : vector<5x1xf32> to vector<5x5xf32>
    %208 = arith.subf %204, %207 : vector<5x5xf32>
    %209 = math.exp %208 : vector<5x5xf32>
    %cst_114 = arith.constant dense<0.000000e+00> : vector<5xf32>
    %210 = vector.multi_reduction <add>, %209, %cst_114 [1] : vector<5x5xf32> to vector<5xf32>
    %211 = vector.shape_cast %210 : vector<5xf32> to vector<5x1xf32>
    %212 = vector.broadcast %211 : vector<5x1xf32> to vector<5x5xf32>
    %213 = arith.divf %209, %212 : vector<5x5xf32>
    %214 = arith.truncf %213 : vector<5x5xf32> to vector<5x5xbf16>
    %cst_115 = arith.constant dense<0.000000e+00> : vector<5x8xf32>
    %215 = tpu.matmul %214, %201, %cst_115 {dimension_numbers = #tpu.dot_dimension_numbers<[1], [0], [0], [1], [0, 0, 1, 1], [], []>} : vector<5x5xbf16>, vector<5x8xbf16>, vector<5x8xf32> -> vector<5x8xf32>
    %216 = arith.truncf %215 : vector<5x8xf32> to vector<5x8xbf16>
    %c40 = arith.constant 40 : index
    %c0_116 = arith.constant 0 : index
    %217 = vector.load %arg13[%c40, %c0_116] : memref<64x64xbf16, #tpu.memory_space<vmem>>, vector<8x64xbf16>
    %cst_117 = arith.constant dense<0.000000e+00> : vector<5x64xf32>
    %218 = tpu.matmul %216, %217, %cst_117 {dimension_numbers = #tpu.dot_dimension_numbers<[1], [0], [0], [1], [0, 0, 1, 1], [], []>} : vector<5x8xbf16>, vector<8x64xbf16>, vector<5x64xf32> -> vector<5x64xf32>
    %219 = arith.addf %195, %218 : vector<5x64xf32>
    %220 = vector.extract_strided_slice %74 {offsets = [0, 48], sizes = [5, 8], strides = [1, 1]} : vector<5x192xf32> to vector<5x8xf32>
    %221 = arith.truncf %220 : vector<5x8xf32> to vector<5x8xbf16>
    %222 = vector.extract_strided_slice %74 {offsets = [0, 112], sizes = [5, 8], strides = [1, 1]} : vector<5x192xf32> to vector<5x8xf32>
    %223 = arith.truncf %222 : vector<5x8xf32> to vector<5x8xbf16>
    %224 = vector.extract_strided_slice %74 {offsets = [0, 176], sizes = [5, 8], strides = [1, 1]} : vector<5x192xf32> to vector<5x8xf32>
    %225 = arith.truncf %224 : vector<5x8xf32> to vector<5x8xbf16>
    %cst_118 = arith.constant dense<0.000000e+00> : vector<5x5xf32>
    %226 = tpu.matmul %221, %223, %cst_118 {dimension_numbers = #tpu.dot_dimension_numbers<[1], [1], [0], [0], [0, 0, 1, 0], [], []>} : vector<5x8xbf16>, vector<5x8xbf16>, vector<5x5xf32> -> vector<5x5xf32>
    %cst_119 = arith.constant 0.353553385 : f32
    %227 = vector.broadcast %cst_119 : f32 to vector<5x5xf32>
    %228 = arith.mulf %226, %227 : vector<5x5xf32>
    %cst_120 = arith.constant dense<0xFF800000> : vector<5xf32>
    %229 = vector.multi_reduction <maximumf>, %228, %cst_120 [1] : vector<5x5xf32> to vector<5xf32>
    %230 = vector.shape_cast %229 : vector<5xf32> to vector<5x1xf32>
    %231 = vector.broadcast %230 : vector<5x1xf32> to vector<5x5xf32>
    %232 = arith.subf %228, %231 : vector<5x5xf32>
    %233 = math.exp %232 : vector<5x5xf32>
    %cst_121 = arith.constant dense<0.000000e+00> : vector<5xf32>
    %234 = vector.multi_reduction <add>, %233, %cst_121 [1] : vector<5x5xf32> to vector<5xf32>
    %235 = vector.shape_cast %234 : vector<5xf32> to vector<5x1xf32>
    %236 = vector.broadcast %235 : vector<5x1xf32> to vector<5x5xf32>
    %237 = arith.divf %233, %236 : vector<5x5xf32>
    %238 = arith.truncf %237 : vector<5x5xf32> to vector<5x5xbf16>
    %cst_122 = arith.constant dense<0.000000e+00> : vector<5x8xf32>
    %239 = tpu.matmul %238, %225, %cst_122 {dimension_numbers = #tpu.dot_dimension_numbers<[1], [0], [0], [1], [0, 0, 1, 1], [], []>} : vector<5x5xbf16>, vector<5x8xbf16>, vector<5x8xf32> -> vector<5x8xf32>
    %240 = arith.truncf %239 : vector<5x8xf32> to vector<5x8xbf16>
    %c48 = arith.constant 48 : index
    %c0_123 = arith.constant 0 : index
    %241 = vector.load %arg13[%c48, %c0_123] : memref<64x64xbf16, #tpu.memory_space<vmem>>, vector<8x64xbf16>
    %cst_124 = arith.constant dense<0.000000e+00> : vector<5x64xf32>
    %242 = tpu.matmul %240, %241, %cst_124 {dimension_numbers = #tpu.dot_dimension_numbers<[1], [0], [0], [1], [0, 0, 1, 1], [], []>} : vector<5x8xbf16>, vector<8x64xbf16>, vector<5x64xf32> -> vector<5x64xf32>
    %243 = arith.addf %219, %242 : vector<5x64xf32>
    %244 = vector.extract_strided_slice %74 {offsets = [0, 56], sizes = [5, 8], strides = [1, 1]} : vector<5x192xf32> to vector<5x8xf32>
    %245 = arith.truncf %244 : vector<5x8xf32> to vector<5x8xbf16>
    %246 = vector.extract_strided_slice %74 {offsets = [0, 120], sizes = [5, 8], strides = [1, 1]} : vector<5x192xf32> to vector<5x8xf32>
    %247 = arith.truncf %246 : vector<5x8xf32> to vector<5x8xbf16>
    %248 = vector.extract_strided_slice %74 {offsets = [0, 184], sizes = [5, 8], strides = [1, 1]} : vector<5x192xf32> to vector<5x8xf32>
    %249 = arith.truncf %248 : vector<5x8xf32> to vector<5x8xbf16>
    %cst_125 = arith.constant dense<0.000000e+00> : vector<5x5xf32>
    %250 = tpu.matmul %245, %247, %cst_125 {dimension_numbers = #tpu.dot_dimension_numbers<[1], [1], [0], [0], [0, 0, 1, 0], [], []>} : vector<5x8xbf16>, vector<5x8xbf16>, vector<5x5xf32> -> vector<5x5xf32>
    %cst_126 = arith.constant 0.353553385 : f32
    %251 = vector.broadcast %cst_126 : f32 to vector<5x5xf32>
    %252 = arith.mulf %250, %251 : vector<5x5xf32>
    %cst_127 = arith.constant dense<0xFF800000> : vector<5xf32>
    %253 = vector.multi_reduction <maximumf>, %252, %cst_127 [1] : vector<5x5xf32> to vector<5xf32>
    %254 = vector.shape_cast %253 : vector<5xf32> to vector<5x1xf32>
    %255 = vector.broadcast %254 : vector<5x1xf32> to vector<5x5xf32>
    %256 = arith.subf %252, %255 : vector<5x5xf32>
    %257 = math.exp %256 : vector<5x5xf32>
    %cst_128 = arith.constant dense<0.000000e+00> : vector<5xf32>
    %258 = vector.multi_reduction <add>, %257, %cst_128 [1] : vector<5x5xf32> to vector<5xf32>
    %259 = vector.shape_cast %258 : vector<5xf32> to vector<5x1xf32>
    %260 = vector.broadcast %259 : vector<5x1xf32> to vector<5x5xf32>
    %261 = arith.divf %257, %260 : vector<5x5xf32>
    %262 = arith.truncf %261 : vector<5x5xf32> to vector<5x5xbf16>
    %cst_129 = arith.constant dense<0.000000e+00> : vector<5x8xf32>
    %263 = tpu.matmul %262, %249, %cst_129 {dimension_numbers = #tpu.dot_dimension_numbers<[1], [0], [0], [1], [0, 0, 1, 1], [], []>} : vector<5x5xbf16>, vector<5x8xbf16>, vector<5x8xf32> -> vector<5x8xf32>
    %264 = arith.truncf %263 : vector<5x8xf32> to vector<5x8xbf16>
    %c56 = arith.constant 56 : index
    %c0_130 = arith.constant 0 : index
    %265 = vector.load %arg13[%c56, %c0_130] : memref<64x64xbf16, #tpu.memory_space<vmem>>, vector<8x64xbf16>
    %cst_131 = arith.constant dense<0.000000e+00> : vector<5x64xf32>
    %266 = tpu.matmul %264, %265, %cst_131 {dimension_numbers = #tpu.dot_dimension_numbers<[1], [0], [0], [1], [0, 0, 1, 1], [], []>} : vector<5x8xbf16>, vector<8x64xbf16>, vector<5x64xf32> -> vector<5x64xf32>
    %267 = arith.addf %243, %266 : vector<5x64xf32>
    %c0_132 = arith.constant 0 : index
    %c0_133 = arith.constant 0 : index
    %268 = vector.load %arg14[%c0_132, %c0_133] : memref<1x64xf32, #tpu.memory_space<vmem>>, vector<1x64xf32>
    %269 = vector.broadcast %268 : vector<1x64xf32> to vector<5x64xf32>
    %270 = arith.addf %267, %269 : vector<5x64xf32>
    %c0_134 = arith.constant 0 : index
    %c0_135 = arith.constant 0 : index
    %271 = vector.load %arg20[%c0_134, %c0_135] : memref<1x64xf32, #tpu.memory_space<vmem>>, vector<1x64xf32>
    %cst_136 = arith.constant dense<0.000000e+00> : vector<64xf32>
    %272 = vector.multi_reduction <add>, %270, %cst_136 [0] : vector<5x64xf32> to vector<64xf32>
    %273 = vector.shape_cast %272 : vector<64xf32> to vector<1x64xf32>
    %cst_137 = arith.constant 5.000000e+00 : f32
    %274 = vector.broadcast %cst_137 : f32 to vector<1x64xf32>
    %275 = arith.divf %273, %274 : vector<1x64xf32>
    %276 = arith.addf %271, %275 : vector<1x64xf32>
    %c0_138 = arith.constant 0 : index
    %c0_139 = arith.constant 0 : index
    %277 = vector.load %arg20[%c0_138, %c0_139] : memref<1x64xf32, #tpu.memory_space<vmem>>, vector<1x64xf32>
    tpu.vector_store %arg20[%c0_138, %c0_139], %276 {strides = array<i32>} : memref<1x64xf32, #tpu.memory_space<vmem>>, vector<1x64xf32>,
    %c1_i32 = arith.constant 1 : i32
    %278 = arith.cmpi eq, %arg1, %c1_i32 : i32
    %279 = arith.extui %278 : i1 to i32
    %c0_i32_140 = arith.constant 0 : i32
    %280 = arith.cmpi ne, %279, %c0_i32_140 : i32
    scf.if %280 {
      %c0_141 = arith.constant 0 : index
      %c0_142 = arith.constant 0 : index
      %281 = vector.load %arg20[%c0_141, %c0_142] : memref<1x64xf32, #tpu.memory_space<vmem>>, vector<1x64xf32>
      %cst_143 = arith.constant 5.000000e-01 : f32
      %282 = vector.broadcast %cst_143 : f32 to vector<1x64xf32>
      %283 = arith.mulf %281, %282 : vector<1x64xf32>
      %284 = arith.truncf %283 : vector<1x64xf32> to vector<1x64xbf16>
      %c0_144 = arith.constant 0 : index
      %c0_145 = arith.constant 0 : index
      %285 = vector.load %arg15[%c0_144, %c0_145] : memref<64x128xbf16, #tpu.memory_space<vmem>>, vector<64x128xbf16>
      %cst_146 = arith.constant dense<0.000000e+00> : vector<1x128xf32>
      %286 = tpu.matmul %284, %285, %cst_146 {dimension_numbers = #tpu.dot_dimension_numbers<[1], [0], [0], [1], [0, 0, 1, 1], [], []>} : vector<1x64xbf16>, vector<64x128xbf16>, vector<1x128xf32> -> vector<1x128xf32>
      %c0_147 = arith.constant 0 : index
      %c0_148 = arith.constant 0 : index
      %287 = vector.load %arg16[%c0_147, %c0_148] : memref<1x128xf32, #tpu.memory_space<vmem>>, vector<1x128xf32>
      %288 = arith.addf %286, %287 : vector<1x128xf32>
      %c0_149 = arith.constant 0 : index
      %c0_150 = arith.constant 0 : index
      %c0_151 = arith.constant 0 : index
      %289 = vector.load %arg17[%c0_149, %c0_150, %c0_151] : memref<1x1x128xf32, #tpu.memory_space<vmem>>, vector<1x1x128xf32>
      %290 = vector.shape_cast %289 : vector<1x1x128xf32> to vector<1x128xf32>
      %291 = vector.shape_cast %288 : vector<1x128xf32> to vector<1x1x128xf32>
      tpu.vector_store %arg17[%c0_149, %c0_150, %c0_151], %291 {strides = array<i32>} : memref<1x1x128xf32, #tpu.memory_space<vmem>>, vector<1x1x128xf32>,
    } else {
    }
    return
  }
  func.func @transform_0(%arg0: i32, %arg1: i32) -> (i32, i32, i32, i32) {
    %c0_i32 = arith.constant 0 : i32
    %c0_i32_0 = arith.constant 0 : i32
    %c0_i32_1 = arith.constant 0 : i32
    return %arg0, %arg1, %c0_i32, %c0_i32_0 : i32, i32, i32, i32
  }
  func.func @transform_1(%arg0: i32, %arg1: i32) -> (i32, i32) {
    %c0_i32 = arith.constant 0 : i32
    %c0_i32_0 = arith.constant 0 : i32
    %c0_i32_1 = arith.constant 0 : i32
    return %c0_i32, %c0_i32_0 : i32, i32
  }
  func.func @transform_2(%arg0: i32, %arg1: i32) -> (i32, i32) {
    %c0_i32 = arith.constant 0 : i32
    %c0_i32_0 = arith.constant 0 : i32
    %c0_i32_1 = arith.constant 0 : i32
    return %c0_i32, %c0_i32_0 : i32, i32
  }
  func.func @transform_3(%arg0: i32, %arg1: i32) -> (i32, i32) {
    %c0_i32 = arith.constant 0 : i32
    %c0_i32_0 = arith.constant 0 : i32
    %c0_i32_1 = arith.constant 0 : i32
    return %c0_i32, %c0_i32_0 : i32, i32
  }
  func.func @transform_4(%arg0: i32, %arg1: i32) -> (i32, i32) {
    %c0_i32 = arith.constant 0 : i32
    %c0_i32_0 = arith.constant 0 : i32
    %c0_i32_1 = arith.constant 0 : i32
    return %c0_i32, %c0_i32_0 : i32, i32
  }
  func.func @transform_5(%arg0: i32, %arg1: i32) -> (i32, i32, i32) {
    %c0_i32 = arith.constant 0 : i32
    %c0_i32_0 = arith.constant 0 : i32
    %c0_i32_1 = arith.constant 0 : i32
    %c0_i32_2 = arith.constant 0 : i32
    return %c0_i32, %c0_i32_0, %c0_i32_1 : i32, i32, i32
  }
  func.func @transform_6(%arg0: i32, %arg1: i32) -> (i32, i32) {
    %c0_i32 = arith.constant 0 : i32
    %c0_i32_0 = arith.constant 0 : i32
    %c0_i32_1 = arith.constant 0 : i32
    return %c0_i32, %c0_i32_0 : i32, i32
  }
  func.func @transform_7(%arg0: i32, %arg1: i32) -> (i32, i32, i32) {
    %c0_i32 = arith.constant 0 : i32
    %c0_i32_0 = arith.constant 0 : i32
    %c0_i32_1 = arith.constant 0 : i32
    %c0_i32_2 = arith.constant 0 : i32
    return %c0_i32, %c0_i32_0, %c0_i32_1 : i32, i32, i32
  }
  func.func @transform_8(%arg0: i32, %arg1: i32) -> (i32, i32) {
    %c0_i32 = arith.constant 0 : i32
    %c0_i32_0 = arith.constant 0 : i32
    %c0_i32_1 = arith.constant 0 : i32
    return %c0_i32, %c0_i32_0 : i32, i32
  }
  func.func @transform_9(%arg0: i32, %arg1: i32) -> (i32, i32) {
    %c0_i32 = arith.constant 0 : i32
    %c0_i32_0 = arith.constant 0 : i32
    %c0_i32_1 = arith.constant 0 : i32
    return %c0_i32, %c0_i32_0 : i32, i32
  }
  func.func @transform_10(%arg0: i32, %arg1: i32) -> (i32, i32) {
    %c0_i32 = arith.constant 0 : i32
    %c0_i32_0 = arith.constant 0 : i32
    %c0_i32_1 = arith.constant 0 : i32
    return %c0_i32, %c0_i32_0 : i32, i32
  }
  func.func @transform_11(%arg0: i32, %arg1: i32) -> (i32, i32) {
    %c0_i32 = arith.constant 0 : i32
    %c0_i32_0 = arith.constant 0 : i32
    %c0_i32_1 = arith.constant 0 : i32
    return %c0_i32, %c0_i32_0 : i32, i32
  }
  func.func @transform_12(%arg0: i32, %arg1: i32) -> (i32, i32) {
    %c0_i32 = arith.constant 0 : i32
    %c0_i32_0 = arith.constant 0 : i32
    %c0_i32_1 = arith.constant 0 : i32
    return %c0_i32, %c0_i32_0 : i32, i32
  }
  func.func @transform_13(%arg0: i32, %arg1: i32) -> (i32, i32) {
    %c0_i32 = arith.constant 0 : i32
    %c0_i32_0 = arith.constant 0 : i32
    %c0_i32_1 = arith.constant 0 : i32
    return %c0_i32, %c0_i32_0 : i32, i32
  }
  func.func @transform_14(%arg0: i32, %arg1: i32) -> (i32, i32) {
    %c0_i32 = arith.constant 0 : i32
    %c0_i32_0 = arith.constant 0 : i32
    %c0_i32_1 = arith.constant 0 : i32
    return %c0_i32, %c0_i32_0 : i32, i32
  }
  func.func @transform_15(%arg0: i32, %arg1: i32) -> (i32, i32, i32) {
    %c0_i32 = arith.constant 0 : i32
    %c0_i32_0 = arith.constant 0 : i32
    %c0_i32_1 = arith.constant 0 : i32
    return %arg0, %c0_i32, %c0_i32_0 : i32, i32, i32
  }
}

</mosaic_0001>

<bundles_post_ra>
// kernel: cnn_attention_forward.1
= control target key start
LH: loop header
LB: loop body
LE: loop exit
PB: predicated region body
PF: predicated region fallthrough
CT: control target
= control target key end

     0   :  { %s7561_s0 = inlined_call_operand.vmem [shape: f32[2,2,4,192], index: 0, kind: input, shape index: {}]   ;;  %s7562_s1 = inlined_call_operand.vmem [shape: bf16[192,768], index: 1, kind: input, shape index: {}]   ;;  %s7563_s2 = inlined_call_operand.vmem [shape: f32[1,768], index: 2, kind: input, shape index: {}]   ;;  %s7564_s3 = inlined_call_operand.vmem [shape: f32[1,768], index: 3, kind: input, shape index: {}]   ;;  %s7565_s4 = inlined_call_operand.vmem [shape: f32[4,768], index: 4, kind: input, shape index: {}]   ;;  %s7566_s5 = inlined_call_operand.vmem [shape: bf16[3,768,128], index: 5, kind: input, shape index: {}]   ;;  %s7567_s6 = inlined_call_operand.vmem [shape: f32[1,128], index: 6, kind: input, shape index: {}]   ;;  %s7568_s7 = inlined_call_operand.vmem [shape: bf16[3,128,64], index: 7, kind: input, shape index: {}]   ;;  %s7569_s8 = inlined_call_operand.vmem [shape: f32[1,64], index: 8, kind: input, shape index: {}]   ;;  %s7570_s9 = inlined_call_operand.vmem [shape: bf16[64,192], index: 9, kind: input, shape index: {}]   ;;  %s7571_s10 = inlined_call_operand.vmem [shape: f32[1,192], index: 10, kind: input, shape index: {}]   ;;  %s7572_s11 = inlined_call_operand.vmem [shape: bf16[64,64], index: 11, kind: input, shape index: {}]   ;;  %s7573_s12 = inlined_call_operand.vmem [shape: f32[1,64], index: 12, kind: input, shape index: {}]   ;;  %s7574_s13 = inlined_call_operand.vmem [shape: bf16[64,128], index: 13, kind: input, shape index: {}]   ;;  %s7575_s14 = inlined_call_operand.vmem [shape: f32[1,128], index: 14, kind: input, shape index: {}]   ;;  %s7576_s15 = inlined_call_operand.hbm [shape: f32[2,1,128], index: 15, kind: output, shape index: {}]  }
   0x1   :  { %7587 = sst [smem:[#allocation17_spill]] %s7561_s0 }
   0x2   :  { %7588 = sst [smem:[#allocation18_spill]] %s7576_s15 }
   0x3   :  { %20 = vsyncpa [#allocation6], 0 }
   0x4   :  { %22 = vsyncpa [#allocation6 + $0x1], 0  ;;  %s6355_s18 = smov 0   ;;  %s6357_s19 = smov 0  }
   0x5   :  { %s6359_s20 = smov 0   ;;  %s6361_s21 = smov 0  }
   0x6   :  { %s6363_s22 = smov 0   ;;  %s6365_s23 = smov 0  }
   0x7   :  { %s6367_s24 = smov 0   ;;  %s6369_s25 = smov 0  }
   0x8 LB: > { %7589 = sst [smem:[#allocation8_spill]] %s6222_s18  ;;  %s4721_s26 = sadd.s32 4294967295, %s6250_s25   ;;  %s6250_s25 = sphi %s6369_s25, %s28_s25   ;;  %s6246_s24 = sphi %s6367_s24, %s7612_s24   ;;  %s6242_s23 = sphi %s6365_s23, %s7611_s23   ;;  %s6238_s22 = sphi %s6363_s22, %s7615_s22   ;;  %s6234_s21 = sphi %s6361_s21, %s7609_s21   ;;  %s6230_s20 = sphi %s6359_s20, %s7608_s20   ;;  %s6226_s19 = sphi %s6357_s19, %s7614_s19   ;;  %s6222_s18 = sphi %s6355_s18, %s7613_s18  }
   0x9   : > { %7590 = sst [smem:[#allocation9_spill]] %s6230_s20  ;;  %s4722_s27 = sadd.s32 4294967294, %s6250_s25  }
   0xa   : > { %7591 = sst [smem:[#allocation10_spill]] %s6242_s23  ;;  %s37_s28 = sadd.s32 1, %s6242_s23 }
   0xb   : > { %7592 = sst [smem:[#allocation11_spill]] %s6246_s24  ;;  %p38_p0 = scmp.ge.s32.totalorder %s37_s28, 2 }
   0xc   : > { %7593 = sst [smem:[#allocation12_spill]] %s6250_s25  ;;  %s40_s29 = sadd.s32 1, %s6246_s24 }
   0xd   : > { %p379_p1 = scmp.ne.s32.totalorder %s6230_s20, %s6226_s19  ;;  %p380_p2 = scmp.eq.s32.totalorder %s4721_s26, 3 }
   0xe   : > { %s7617_s28 = smov (%p38_p0, %s37_s28), 0  ;;  %s7619_s29 = smov (!%p38_p0, %s40_s29), %s6246_s24 }
   0xf   : > { %7594 = sst [smem:[#allocation13_spill]] %s7617_s28  ;;  %p6404_p3 = por %p380_p2, %p379_p1 }
  0x10   : > { %p385_p4 = scmp.ne.s32.totalorder %s6226_s19, %s6222_s18  ;;  %p42_p5 = scmp.ge.s32.totalorder %s7619_s29, 2 }
  0x11   : > { %p386_p6 = scmp.eq.s32.totalorder %s4722_s27, 3  ;;  %p4725_p7 = scmp.ge.s32.totalorder %s6250_s25, 1 }
  0x12   : > { %p458_p8 = scmp.lt.s32.totalorder %s6250_s25, 5  ;;  %s7621_s29 = smov (%p42_p5, %s7619_s29), 0 }
  0x13   : > { %7596 = sst [smem:[#allocation14_spill]] %s7621_s29  ;;  %p6414_p9 = por %p386_p6, %p385_p4 }
  0x14   : > { %p459_p10 = pnand %p4725_p7, %p458_p8  ;;  %s366_s17 = ssub.s32 %s6246_s24, %s7621_s29 }
  0x15   : > { %s7597_s16 = scalar_select %p6414_p9, 1, 0 }
  0x16   : > { %s369_s26 = sadd.s32 1, %s6230_s20  ;;  %p367_p11 = scmp.eq.s32.totalorder %s366_s17, 0 }
  0x17   : > { %7598 = sst [smem:[#allocation15_spill]] %s7597_s16  ;;  %462 = sbr.rel (%p459_p10) target bundleno = 5973 (0x1755), region = 80 }
  0x18   : > { %s6422_s28 = scalar_select %p367_p11, %s6230_s20, %s369_s26  }
  0x19   : > { %s7586_s27 = sand.u32 (!%p459_p10), 1, %s6226_s19   ;;  %p509_p12 = scmp.lt.s32.totalorder (!%p459_p10), %s6238_s22, 1 }
  0x1a   : > { %7599 = sst [smem:[#allocation16_spill]] %s6422_s28  ;;  %p511_p13 = scmp.lt.s32.totalorder (!%p459_p10), %s6234_s21, 1 }
  0x1b   : > { %s7600_s0 = sld [smem:[#allocation17_spill]] (!%p459_p10)  ;;  %s6436_s28 = scalar_lea.vmem (!%p459_p10), [#allocation5], %s7586_s27 }
  0x1c   : > { %p4729_p0 = scmp.ne.s32.totalorder (!%p459_p10), %s6234_s21, 0 }
  0x1e   : > { %s510_s23 = scalar_select %p509_p12, %s6238_s22, 1 }
  0x1f   : > { %s512_s18 = scalar_select %p511_p13, %s6234_s21, 1 }
  0x20   : > { %s4727_s25 = sshll.u32 %s510_s23, 2  ;;  %522 = sbr.rel (%p4729_p0) target bundleno = 39 (0x27), region = 84  ;;  %vm523_vm0 = vcmask (!%p4729_p0), 516096   ;;  %v6252_v0 = vmov (!%p4729_p0), 0.0  }
  0x21   : > { %s4726_s16 = sshll.u32 %s512_s18, 1  ;;  %524 = vst.msk [vmem:[#allocation4] sm:$0x1] (!%p4729_p0), %vm523_vm0, %v6252_v0 }
  0x22   : > { %s515_s15 = sadd.s32 %s4727_s25, %s4726_s16 }
  0x23   : > { %s4728_s29 = sshll.u32 %s515_s15, 2 }
  0x24   : > { %s6432_s26 = scalar_lea.vmem %s7600_s0, %s4728_s29 }
  0x27 PF: > { %v5829_v1 = vld [vmem:[%s7562_s1 + $0x4] ss:$24 sps:$4 sm:$0xff]   ;;  %v5831_v2 = vld [vmem:[%s7562_s1] ss:$24 sps:$4 sm:$0xff]   ;;  %v5832_v3 = vld [vmem:[%s7562_s1 + $0x34] ss:$24 sps:$4 sm:$0xff]  }
  0x28   : > { %999 = vmatprep.subr.bf16.mxu0 %v5829_v1  ;;  %v5834_v4 = vld [vmem:[%s7562_s1 + $0x30] ss:$24 sps:$4 sm:$0xff]   ;;  %v5835_v5 = vld [vmem:[%s7562_s1 + $0x64] ss:$24 sps:$4 sm:$0xff]   ;;  %v5837_v6 = vld [vmem:[%s7562_s1 + $0x60] ss:$24 sps:$4 sm:$0xff]  }
  0x29   : > { %1000 = vmatpush1.bf16.msra.mxu0 %v5831_v2  ;;  %v5838_v7 = vld [vmem:[%s7562_s1 + $0x94] ss:$24 sps:$4 sm:$0xff]   ;;  %v5840_v8 = vld [vmem:[%s7562_s1 + $0x90] ss:$24 sps:$4 sm:$0xff]   ;;  %v5841_v10 = vld [vmem:[%s7562_s1 + $0xc4] ss:$24 sps:$4 sm:$0xff]  }
  0x2a   : > { %1001 = vmatprep.subr.bf16.mxu0 %v5832_v3  ;;  %v5853_v9 = vld [vmem:[%s7562_s1 + $0xc] ss:$24 sps:$4 sm:$0xff]   ;;  %v5857_v11 = vld [vmem:[%s7562_s1 + $0x8] ss:$24 sps:$4 sm:$0xff]   ;;  %v5859_v12 = vld [vmem:[%s7562_s1 + $0x3c] ss:$24 sps:$4 sm:$0xff]  }
  0x2b   : > { %1040 = vmatprep.subr.bf16.mxu1 %v5853_v9  ;;  %v5843_v13 = vld [vmem:[%s7562_s1 + $0xc0] ss:$24 sps:$4 sm:$0xff]   ;;  %v5844_v14 = vld [vmem:[%s7562_s1 + $0xf4] ss:$24 sps:$4 sm:$0xff]   ;;  %v5846_v17 = vld [vmem:[%s7562_s1 + $0xf0] ss:$24 sps:$4 sm:$0xff]  }
  0x2c   : > { %1041 = vmatpush1.bf16.msra.mxu1 %v5857_v11  ;;  %v5863_v15 = vld [vmem:[%s7562_s1 + $0x38] ss:$24 sps:$4 sm:$0xff]   ;;  %v5865_v16 = vld [vmem:[%s7562_s1 + $0x6c] ss:$24 sps:$4 sm:$0xff]   ;;  %v5869_v18 = vld [vmem:[%s7562_s1 + $0x68] ss:$24 sps:$4 sm:$0xff]  }
  0x2d   : > { %1002 = vmatpush1.bf16.msra.mxu0 %v5834_v4  ;;  %1042 = vmatprep.subr.bf16.mxu1 %v5859_v12  ;;  %v5871_v19 = vld [vmem:[%s7562_s1 + $0x9c] ss:$24 sps:$4 sm:$0xff]   ;;  %v525_v21 = vld [vmem:[%s6432_s26] sm:$0xff]  ;;  %v5875_v23 = vld [vmem:[%s7562_s1 + $0x98] ss:$24 sps:$4 sm:$0xff]   ;;  %vm995_vm1 = vcmask 523264  }
  0x2e   : > { %1003 = vmatprep.subr.bf16.mxu0 %v5835_v5  ;;  %v5847_v20 = vld [vmem:[%s7562_s1 + $0x124] ss:$24 sps:$4 sm:$0xff]   ;;  %v5849_v22 = vld [vmem:[%s7562_s1 + $0x120] ss:$24 sps:$4 sm:$0xff]   ;;  %v527_v24 = vcombine.high %v525_v21, %v525_v21  ;;  %v5850_v26 = vld [vmem:[%s7562_s1 + $0x154] ss:$24 sps:$4 sm:$0xff]   ;;  %v6574_v48 = vpack.c.bf16 %v525_v21, %v525_v21 }
  0x2f   : > { %v5878_v25 = vld [vmem:[%s7562_s1 + $0xcc] ss:$24 sps:$4 sm:$0xff]   ;;  %v5852_v28 = vld [vmem:[%s7562_s1 + $0x150] ss:$24 sps:$4 sm:$0xff]   ;;  %v5884_v30 = vld [vmem:[%s7562_s1 + $0xfc] ss:$24 sps:$4 sm:$0xff]  }
  0x30   : > { %1043 = vmatpush1.bf16.msra.mxu1 %v5863_v15  ;;  %v530_v27 = vpack.c.bf16 %v527_v24, %v527_v24  ;;  %v5880_v29 = vld [vmem:[%s7562_s1 + $0xc8] ss:$24 sps:$4 sm:$0xff]   ;;  %v5855_v31 = vld [vmem:[%s7562_s1 + $0x184] ss:$24 sps:$4 sm:$0xff]   ;;  %v5886_v33 = vld [vmem:[%s7562_s1 + $0xf8] ss:$24 sps:$4 sm:$0xff]  }
  0x31   : > { %1004 = vmatpush1.bf16.msra.mxu0 %v5837_v6  ;;  %1044 = vmatprep.subr.bf16.mxu1 %v5865_v16  ;;  %v5858_v32 = vld [vmem:[%s7562_s1 + $0x180] ss:$24 sps:$4 sm:$0xff]   ;;  %v5890_v34 = vld [vmem:[%s7562_s1 + $0x12c] ss:$24 sps:$4 sm:$0xff]   ;;  %v5864_v36 = vld [vmem:[%s7562_s1 + $0x1b0] ss:$24 sps:$4 sm:$0xff]  }
  0x32   : > { %1005 = vmatprep.subr.bf16.mxu0 %v5838_v7  ;;  %4802 = vmatprep.mubr.msk.bf16.mxu0 %vm995_vm1, %v530_v27  ;;  %v5861_v35 = vld [vmem:[%s7562_s1 + $0x1b4] ss:$24 sps:$4 sm:$0xff]   ;;  %v5892_v37 = vld [vmem:[%s7562_s1 + $0x128] ss:$24 sps:$4 sm:$0xff]   ;;  %v5867_v39 = vld [vmem:[%s7562_s1 + $0x1e4] ss:$24 sps:$4 sm:$0xff]  }
  0x33   : > { %4803 = vmatprep.mubr.msk.bf16.mxu1 %vm995_vm1, %v530_v27  ;;  %v5896_v38 = vld [vmem:[%s7562_s1 + $0x15c] ss:$24 sps:$4 sm:$0xff]   ;;  %v5870_v40 = vld [vmem:[%s7562_s1 + $0x1e0] ss:$24 sps:$4 sm:$0xff]   ;;  %v5902_v42 = vld [vmem:[%s7562_s1 + $0x18c] ss:$24 sps:$4 sm:$0xff]  }
  0x34   : > { %1045 = vmatpush1.bf16.msra.mxu1 %v5869_v18  ;;  %v5898_v41 = vld [vmem:[%s7562_s1 + $0x158] ss:$24 sps:$4 sm:$0xff]   ;;  %v5873_v43 = vld [vmem:[%s7562_s1 + $0x214] ss:$24 sps:$4 sm:$0xff]   ;;  %v5904_v45 = vld [vmem:[%s7562_s1 + $0x188] ss:$24 sps:$4 sm:$0xff]  }
  0x35   : > { %1006 = vmatpush1.bf16.msra.mxu0 %v5840_v8  ;;  %1046 = vmatprep.subr.bf16.mxu1 %v5871_v19  ;;  %v5876_v44 = vld [vmem:[%s7562_s1 + $0x210] ss:$24 sps:$4 sm:$0xff]   ;;  %v5908_v46 = vld [vmem:[%s7562_s1 + $0x1bc] ss:$24 sps:$4 sm:$0xff]   ;;  %v5914_v51 = vld [vmem:[%s7562_s1 + $0x1ec] ss:$24 sps:$4 sm:$0xff]   ;;  %v605_v19 = vlaneseq }
  0x36   : > { %1007 = vmatprep.subr.bf16.mxu0 %v5841_v10  ;;  %v5883_v47 = vld [vmem:[%s7562_s1 + $0x14] ss:$24 sps:$4 sm:$0xff]   ;;  %v5881_v49 = vld [vmem:[%s7562_s1 + $0x10] ss:$24 sps:$4 sm:$0xff]   ;;  %v5889_v52 = vld [vmem:[%s7562_s1 + $0x44] ss:$24 sps:$4 sm:$0xff]  }
  0x37   : > { %v5910_v50 = vld [vmem:[%s7562_s1 + $0x1b8] ss:$24 sps:$4 sm:$0xff]   ;;  %v5916_v54 = vld [vmem:[%s7562_s1 + $0x1e8] ss:$24 sps:$4 sm:$0xff]   ;;  %v5920_v55 = vld [vmem:[%s7562_s1 + $0x21c] ss:$24 sps:$4 sm:$0xff]  }
  0x38   : > { %1047 = vmatpush1.bf16.msra.mxu1 %v5875_v23  ;;  %v5887_v53 = vld [vmem:[%s7562_s1 + $0x40] ss:$24 sps:$4 sm:$0xff]   ;;  %v5895_v56 = vld [vmem:[%s7562_s1 + $0x74] ss:$24 sps:$4 sm:$0xff]   ;;  %v5893_v58 = vld [vmem:[%s7562_s1 + $0x70] ss:$24 sps:$4 sm:$0xff]  }
  0x39   : > { %1008 = vmatpush1.bf16.msra.mxu0 %v5843_v13  ;;  %1048 = vmatprep.subr.bf16.mxu1 %v5878_v25  ;;  %v5922_v57 = vld [vmem:[%s7562_s1 + $0x218] ss:$24 sps:$4 sm:$0xff]   ;;  %v5938_v59 = vld [vmem:[%s7566_s5 + $0x1c0] sm:$0xff]   ;;  %v5940_v63 = vld [vmem:[%s7566_s5 + $0x1c8] sm:$0xff]   ;;  %vm1142_vm2 = vcmp.lt.s32.totalorder %v605_v19, 768  ;;  %v6253_v23 = vmov 0.0  }
  0x3a   : > { %1009 = vmatprep.subr.bf16.mxu0 %v5844_v14  ;;  %v5901_v60 = vld [vmem:[%s7562_s1 + $0xa4] ss:$24 sps:$4 sm:$0xff]   ;;  %v5899_v62 = vld [vmem:[%s7562_s1 + $0xa0] ss:$24 sps:$4 sm:$0xff]   ;;  %v5907_v0 = vld [vmem:[%s7562_s1 + $0xd4] ss:$24 sps:$4 sm:$0xff]  }
  0x3b   : > { %v5939_v61 = vld [vmem:[%s7566_s5 + $0x180] sm:$0xff]   ;;  %v5941_v1 = vld [vmem:[%s7566_s5 + $0x188] sm:$0xff]   ;;  %v5943_v18 = vld [vmem:[%s7566_s5 + $0x190] sm:$0xff]   ;;  %1144 = vst.msk [vmem:[#allocation2] ss:$8 sm:$0xf] %vm1142_vm2, %v6253_v23 }
  0x3c   : > { %1049 = vmatpush1.bf16.msra.mxu1 %v5880_v29  ;;  %v5905_v2 = vld [vmem:[%s7562_s1 + $0xd0] ss:$24 sps:$4 sm:$0xff]   ;;  %v5913_v3 = vld [vmem:[%s7562_s1 + $0x104] ss:$24 sps:$4 sm:$0xff]   ;;  %v5911_v4 = vld [vmem:[%s7562_s1 + $0x100] ss:$24 sps:$4 sm:$0xff]  }
  0x3d   : > { %1010 = vmatpush1.bf16.msra.mxu0 %v5846_v17  ;;  %1050 = vmatprep.subr.bf16.mxu1 %v5884_v30  ;;  %v5919_v5 = vld [vmem:[%s7562_s1 + $0x134] ss:$24 sps:$4 sm:$0xff]   ;;  %v5917_v6 = vld [vmem:[%s7562_s1 + $0x130] ss:$24 sps:$4 sm:$0xff]   ;;  %v5925_v7 = vld [vmem:[%s7562_s1 + $0x164] ss:$24 sps:$4 sm:$0xff]  }
  0x3e   : > { %1011 = vmatprep.subr.bf16.mxu0 %v5847_v20  ;;  %v5923_v8 = vld [vmem:[%s7562_s1 + $0x160] ss:$24 sps:$4 sm:$0xff]   ;;  %v5928_v9 = vld [vmem:[%s7562_s1 + $0x194] ss:$24 sps:$4 sm:$0xff]   ;;  %v5926_v10 = vld [vmem:[%s7562_s1 + $0x190] ss:$24 sps:$4 sm:$0xff]  }
  0x3f   : > { %v5931_v11 = vld [vmem:[%s7562_s1 + $0x1c4] ss:$24 sps:$4 sm:$0xff]   ;;  %v5929_v12 = vld [vmem:[%s7562_s1 + $0x1c0] ss:$24 sps:$4 sm:$0xff]   ;;  %v5934_v13 = vld [vmem:[%s7562_s1 + $0x1f4] ss:$24 sps:$4 sm:$0xff]  }
  0x40   : > { %1051 = vmatpush1.bf16.msra.mxu1 %v5886_v33  ;;  %v5932_v14 = vld [vmem:[%s7562_s1 + $0x1f0] ss:$24 sps:$4 sm:$0xff]   ;;  %v5937_v15 = vld [vmem:[%s7562_s1 + $0x224] ss:$24 sps:$4 sm:$0xff]   ;;  %v5935_v16 = vld [vmem:[%s7562_s1 + $0x220] ss:$24 sps:$4 sm:$0xff]  }
  0x41   : > { %1012 = vmatpush1.bf16.msra.mxu0 %v5849_v22  ;;  %1052 = vmatprep.subr.bf16.mxu1 %v5890_v34  ;;  %v5942_v17 = vld [vmem:[%s7566_s5 + $0x1d0] sm:$0xff]   ;;  %v5944_v20 = vld [vmem:[%s7566_s5 + $0x1d8] sm:$0xff]   ;;  %v1149_v21 = vld [vmem:[%s7564_s3] sm:$0x3f]  ;;  %2803 = vst [vmem:[#allocation3] sm:$0x1] %v6253_v23 }
  0x42   : > { %1013 = vmatprep.subr.bf16.mxu0 %v5850_v26  ;;  %v5945_v22 = vld [vmem:[%s7566_s5 + $0x198] sm:$0xff]   ;;  %1145 = vst.msk [vmem:[#allocation2] ss:$8 sm:$0x30] %vm1142_vm2, %v6253_v23  ;;  %2804 = vst [vmem:[#allocation3 + $0x6] sm:$0x1] %v6253_v23 }
  0x43   : > { %1147 = vst.msk [vmem:[#allocation2 + $0x6] ss:$8 sm:$0xf] %vm1142_vm2, %v6253_v23  ;;  %1148 = vst.msk [vmem:[#allocation2 + $0x6] ss:$8 sm:$0x30] %vm1142_vm2, %v6253_v23 }
  0x44   : > { %1053 = vmatpush1.bf16.msra.mxu1 %v5892_v37  ;;  %1151 = vst.msk [vmem:[#allocation2 + $0x1] ss:$8 sm:$0xf] %vm1142_vm2, %v1149_v21  ;;  %1152 = vst.msk [vmem:[#allocation2 + $0x1] ss:$8 sm:$0x30] %vm1142_vm2, %v1149_v21 }
  0x45   : > { %1014 = vmatpush1.bf16.msra.mxu0 %v5852_v28  ;;  %1054 = vmatprep.subr.bf16.mxu1 %v5896_v38  ;;  %v5946_v24 = vld [vmem:[%s7566_s5 + $0x1e0] sm:$0xff]   ;;  %v5948_v26 = vld [vmem:[%s7566_s5 + $0x1e8] sm:$0xff]   ;;  %v5950_v28 = vld [vmem:[%s7566_s5 + $0x1f0] sm:$0xff]   ;;  %vm6254_vm3 = vmmov 0   ;;  %vm3311_vm4 = vcmask 1041408   ;;  %vm3312_vm5 = vcmask 1042432  }
  0x46   : > { %1015 = vmatprep.subr.bf16.mxu0 %v5855_v31  ;;  %v5947_v25 = vld [vmem:[%s7566_s5 + $0x1a0] sm:$0xff]   ;;  %v5951_v29 = vld [vmem:[%s7566_s5 + $0x1b0] sm:$0xff]   ;;  %v5952_v30 = vld [vmem:[%s7566_s5 + $0x1f8] sm:$0xff]   ;;  %s6257_s17 = smov 120   ;;  %s6258_s20 = smov 64   ;;  %vm3246_vm6 = vcmask 64512  }
  0x47   : > { %v5953_v31 = vld [vmem:[%s7566_s5 + $0x1b8] sm:$0xff]   ;;  %v5964_v33 = vld [vmem:[%s7566_s5 + $0x2c0] sm:$0xff]   ;;  %v5972_v37 = vld [vmem:[%s7566_s5 + $0x2d0] sm:$0xff]   ;;  %s6259_s23 = smov 56   ;;  %vm3294_vm7 = vcmask 36864   ;;  %s6260_s15 = smov 48  }
  0x48   : > { %1055 = vmatpush1.bf16.msra.mxu1 %v5898_v41  ;;  %v5966_v34 = vld [vmem:[%s7566_s5 + $0x280] sm:$0xff]   ;;  %v5975_v38 = vld [vmem:[%s7566_s5 + $0x290] sm:$0xff]   ;;  %s6261_s18 = smov 112   ;;  %vm3307_vm8 = vcmask 39936   ;;  %vm3477_vm9 = vcmask 1043456   ;;  %s6262_s16 = smov 104  }
  0x49   : > { %1016 = vmatpush1.bf16.msra.mxu0 %v5858_v32  ;;  %1056 = vmatprep.subr.bf16.mxu1 %v5902_v42  ;;  %v5954_v32 = vld [vmem:[%s7566_s5 + $0x240] sm:$0xff]   ;;  %s6263_s27 = smov 40   ;;  %s6266_s25 = smov 88   ;;  %vm4536_vm10 = vcmask 520192   ;;  %vm4547_vm11 = vcmask 516096  }
  0x4a   : > { %1017 = vmatprep.subr.bf16.mxu0 %v5861_v35  ;;  %v5968_v35 = vld [vmem:[%s7566_s5 + $0x2c8] sm:$0xff]   ;;  %v5980_v41 = vld [vmem:[%s7566_s5 + $0x2e0] sm:$0xff]   ;;  %s6267_s29 = smov 24   ;;  %p5233_p1 = scmp.ne.s32.totalorder %s6234_s21, 1 }
  0x4b   : > { %v5982_v42 = vld [vmem:[%s7566_s5 + $0x2a0] sm:$0xff]   ;;  %vm6273_vm12 = vmmov (!%p5233_p1), 0  }
  0x4c   : > { %1057 = vmatpush1.bf16.msra.mxu1 %v5904_v45  ;;  %v5988_v45 = vld [vmem:[%s7566_s5 + $0x2f0] sm:$0xff]  }
  0x4d   : > { %1018 = vmatpush1.bf16.msra.mxu0 %v5864_v36  ;;  %1058 = vmatprep.subr.bf16.mxu1 %v5908_v46  ;;  %v5970_v36 = vld [vmem:[%s7566_s5 + $0x288] sm:$0xff]   ;;  %v5990_v46 = vld [vmem:[%s7566_s5 + $0x2b0] sm:$0xff]  }
  0x4e   : > { %1019 = vmatprep.subr.bf16.mxu0 %v5867_v39  ;;  %v5977_v39 = vld [vmem:[%s7566_s5 + $0x2d8] sm:$0xff]  }
  0x50   : > { %1059 = vmatpush1.bf16.msra.mxu1 %v5910_v50  ;;  %v6777_v50 = vshrl.u32 %v605_v19, 7 }
  0x51   : > { %1020 = vmatpush1.bf16.msra.mxu0 %v5870_v40  ;;  %1060 = vmatprep.subr.bf16.mxu1 %v5914_v51  ;;  %v5979_v40 = vld [vmem:[%s7566_s5 + $0x298] sm:$0xff]  }
  0x52   : > { %1021 = vmatprep.subr.bf16.mxu0 %v5873_v43  ;;  %v5984_v43 = vld [vmem:[%s7566_s5 + $0x2e8] sm:$0xff]   ;;  %v607_v51 = vsub.s32 0, %v6777_v50 }
  0x54   : > { %1061 = vmatpush1.bf16.msra.mxu1 %v5916_v54 }
  0x55   : > { %1022 = vmatpush1.bf16.msra.mxu0 %v5876_v44  ;;  %1062 = vmatprep.subr.bf16.mxu1 %v5920_v55  ;;  %v5986_v44 = vld [vmem:[%s7566_s5 + $0x2a8] sm:$0xff]   ;;  %v1122_v55 = vld [vmem:[%s7565_s4] sm:$0xff] }
  0x56   : > { %1081 = vmatprep.subr.bf16.mxu0 %v5883_v47  ;;  %v5992_v47 = vld [vmem:[%s7566_s5 + $0x2f8] sm:$0xff]  }
  0x58   : > { %1032 = vmatmul.mubr.bf16.vlgmr.msra.gmra.mrb[0].mxu0 %v6574_v48  ;;  %1063 = vmatpush1.bf16.msra.mxu1 %v5922_v57 }
  0x59   : > { %1082 = vmatpush1.bf16.msra.mxu0 %v5881_v49  ;;  %4804 = vmatprep.mubr.msk.bf16.mxu0 %vm995_vm1, %v530_v27  ;;  %v5949_v27 = vld [vmem:[%s7566_s5 + $0x1a8] sm:$0xff]   ;;  %v5997_v49 = vld [vmem:[%s7566_s5 + $0xc0] sm:$0xff]  }
  0x5a   : > { %1083 = vmatprep.subr.bf16.mxu0 %v5889_v52  ;;  %5242 = vmatprep.subr.bf16.mxu1 %v5938_v59  ;;  %v6783_v52 = vld [vmem:[%s7563_s2] sm:$0x3f] }
  0x5b   : > { %1073 = vmatmul.mubr.bf16.vlgmr.msra.gmra.mrb[0].mxu1 %v6574_v48  ;;  %v608_v54 = vrot.slane %v6783_v52, %v607_v51 }
  0x5c   : > { %5243 = vmatpush3.bf16.msra.mxu1 %v5939_v61 }
  0x5d   : > { %1084 = vmatpush1.bf16.msra.mxu0 %v5887_v53  ;;  %5244 = vmatprep.subr.bf16.mxu1 %v5940_v63  ;;  %v611_v53 = vsub.s32 1, %v6777_v50 }
  0x5e   : > { %1085 = vmatprep.subr.bf16.mxu0 %v5895_v56 }
  0x5f   : > { %v612_v56 = vrot.slane %v6783_v52, %v611_v53 }
  0x60   : > { %5245 = vmatpush3.bf16.msra.mxu1 %v5941_v1 }
  0x61   : > { %1086 = vmatpush1.bf16.msra.mxu0 %v5893_v58  ;;  %5246 = vmatprep.subr.bf16.mxu1 %v5942_v17  ;;  %v1128_v58 = vcombine.high %v1122_v55, %v1122_v55 }
  0x62   : > { %1087 = vmatprep.subr.bf16.mxu0 %v5901_v60 }
  0x64   : > { %5247 = vmatpush3.bf16.msra.mxu1 %v5943_v18 }
  0x65   : > { %1088 = vmatpush1.bf16.msra.mxu0 %v5899_v62  ;;  %5248 = vmatprep.subr.bf16.mxu1 %v5944_v20 }
  0x66   : > { %1089 = vmatprep.subr.bf16.mxu0 %v5907_v0 }
  0x68   : > { %5249 = vmatpush3.bf16.msra.mxu1 %v5945_v22 }
  0x69   : > { %1090 = vmatpush1.bf16.msra.mxu0 %v5905_v2  ;;  %5250 = vmatprep.subr.bf16.mxu1 %v5946_v24  ;;  %v615_v2 = vsub.s32 2, %v6777_v50 }
  0x6a   : > { %1091 = vmatprep.subr.bf16.mxu0 %v5913_v3 }
  0x6c   : > { %5251 = vmatpush3.bf16.msra.mxu1 %v5947_v25 }
  0x6d   : > { %1092 = vmatpush1.bf16.msra.mxu0 %v5911_v4  ;;  %5252 = vmatprep.subr.bf16.mxu1 %v5948_v26  ;;  %v619_v4 = vsub.s32 3, %v6777_v50 }
  0x6e   : > { %1093 = vmatprep.subr.bf16.mxu0 %v5919_v5 }
  0x70   : > { %5253 = vmatpush3.bf16.msra.mxu1 %v5949_v27 }
  0x71   : > { %1094 = vmatpush1.bf16.msra.mxu0 %v5917_v6  ;;  %5254 = vmatprep.subr.bf16.mxu1 %v5950_v28  ;;  %v616_v6 = vrot.slane %v6783_v52, %v615_v2 }
  0x72   : > { %1095 = vmatprep.subr.bf16.mxu0 %v5925_v7  ;;  %v1123_v7 = vld [vmem:[%s7565_s4 + $0x8] sm:$0xff] }
  0x74   : > { %5255 = vmatpush3.bf16.msra.mxu1 %v5951_v29 }
  0x75   : > { %1096 = vmatpush1.bf16.msra.mxu0 %v5923_v8  ;;  %5256 = vmatprep.subr.bf16.mxu1 %v5952_v30  ;;  %v620_v8 = vrot.slane %v6783_v52, %v619_v4 }
  0x76   : > { %1097 = vmatprep.subr.bf16.mxu0 %v5928_v9 }
  0x78   : > { %5257 = vmatpush3.bf16.msra.mxu1 %v5953_v31 }
  0x79   : > { %1098 = vmatpush1.bf16.msra.mxu0 %v5926_v10  ;;  %5264 = vmatprep.subr.bf16.mxu1 %v5954_v32  ;;  %v1129_v10 = vcombine.high %v1123_v7, %v1123_v7  ;;  %v5955_v32 = vld [vmem:[%s7566_s5 + $0x200] sm:$0xff]  }
  0x7a   : > { %1099 = vmatprep.subr.bf16.mxu0 %v5931_v11 }
  0x7d   : > { %1100 = vmatpush1.bf16.msra.mxu0 %v5929_v12 }
  0x7e   : > { %1101 = vmatprep.subr.bf16.mxu0 %v5934_v13 }
  0x81   : > { %1102 = vmatpush1.bf16.msra.mxu0 %v5932_v14 }
  0x82   : > { %1103 = vmatprep.subr.bf16.mxu0 %v5937_v15 }
  0x85   : > { %1104 = vmatpush1.bf16.msra.mxu0 %v5935_v16 }
  0x86   : > { %5286 = vmatprep.subr.bf16.mxu0 %v5964_v33 }
  0x88   : > { %1114 = vmatmul.mubr.bf16.vlgmr.msra.gmra.mrb[4].mxu0 %v6574_v48  ;;  %v5994_v48 = vld [vmem:[%s7566_s5 + $0x2b8] sm:$0xff]  }
  0x89   : > { %5287 = vmatpush3.bf16.msra.mxu0 %v5966_v34  ;;  %v5956_v34 = vld [vmem:[%s7566_s5 + $0x248] sm:$0xff]  }
  0x8a   : > { %5288 = vmatprep.subr.bf16.mxu0 %v5968_v35  ;;  %v5957_v35 = vld [vmem:[%s7566_s5 + $0x208] sm:$0xff]  }
  0x8d   : > { %5289 = vmatpush3.bf16.msra.mxu0 %v5970_v36 }
  0x8e   : > { %5290 = vmatprep.subr.bf16.mxu0 %v5972_v37  ;;  %v5959_v37 = vld [vmem:[%s7566_s5 + $0x250] sm:$0xff]  }
  0x91   : > { %5291 = vmatpush3.bf16.msra.mxu0 %v5975_v38 }
  0x92   : > { %5292 = vmatprep.subr.bf16.mxu0 %v5977_v39 }
  0x95   : > { %5293 = vmatpush3.bf16.msra.mxu0 %v5979_v40 }
  0x96   : > { %5294 = vmatprep.subr.bf16.mxu0 %v5980_v41  ;;  %v5960_v41 = vld [vmem:[%s7566_s5 + $0x210] sm:$0xff]  }
  0x99   : > { %5295 = vmatpush3.bf16.msra.mxu0 %v5982_v42  ;;  %v5961_v42 = vld [vmem:[%s7566_s5 + $0x258] sm:$0xff]  }
  0x9a   : > { %5296 = vmatprep.subr.bf16.mxu0 %v5984_v43 }
  0x9d   : > { %5297 = vmatpush3.bf16.msra.mxu0 %v5986_v44 }
  0x9e   : > { %5298 = vmatprep.subr.bf16.mxu0 %v5988_v45  ;;  %v5962_v45 = vld [vmem:[%s7566_s5 + $0x218] sm:$0xff]  }
  0xa1   : > { %5299 = vmatpush3.bf16.msra.mxu0 %v5990_v46  ;;  %v5963_v46 = vld [vmem:[%s7566_s5 + $0x260] sm:$0xff]  }
  0xa2   : > { %5300 = vmatprep.subr.bf16.mxu0 %v5992_v47  ;;  %v5965_v47 = vld [vmem:[%s7566_s5 + $0x220] sm:$0xff]  }
  0xa5   : > { %5301 = vmatpush3.bf16.msra.mxu0 %v5994_v48 }
  0xa6   : > { %5330 = vmatprep.subr.bf16.mxu0 %v5997_v49  ;;  %v5967_v49 = vld [vmem:[%s7566_s5 + $0x268] sm:$0xff]  }
 0x12b   : > { %v1033_v57 = vpop.f32.mrb[0].mxu0 }
 0x12c   : > { %v1034_v59 = vadd.f32 %v1033_v57, %v608_v54  ;;  %v1035_v60 = vpop.f32.mrb[1].mxu0  ;;  %v623_v54 = vsub.s32 4, %v6777_v50  ;;  %v627_v57 = vsub.s32 5, %v6777_v50 }
 0x12d   : > { %v1036_v61 = vadd.f32 %v1035_v60, %v612_v56  ;;  %v1037_v62 = vpop.f32.mrb[2].mxu0  ;;  %v5969_v56 = vld [vmem:[%s7566_s5 + $0x228] sm:$0xff]   ;;  %v1124_v60 = vld [vmem:[%s7565_s4 + $0x10] sm:$0xff] }
 0x12e   : > { %v1134_v63 = vadd.f32 %v1122_v55, %v1034_v59  ;;  %v1038_v0 = vpop.f32.mrb[3].mxu0  ;;  %v1074_v9 = vpop.f32.mrb[0].mxu1  ;;  %v624_v59 = vrot.slane %v6783_v52, %v623_v54  ;;  %v628_v62 = vrot.slane %v6783_v52, %v627_v57  ;;  %v1130_v2 = vcombine.high %v1124_v60, %v1124_v60  ;;  %v5978_v52 = vld [vmem:[%s7566_s5 + $0x238] sm:$0xff]   ;;  %v6007_v54 = vld [vmem:[%s7566_s5 + $0x90] sm:$0xff]  }
 0x12f   : > { %v1135_v1 = vadd.f32 %v1128_v58, %v1036_v61  ;;  %v1075_v11 = vadd.f32 %v1074_v9, %v616_v6  ;;  %v1076_v12 = vpop.f32.mrb[1].mxu1  ;;  %v5971_v58 = vld [vmem:[%s7566_s5 + $0x270] sm:$0xff]   ;;  %v5976_v0 = vld [vmem:[%s7566_s5 + $0x278] sm:$0xff]  }
 0x130   : > { %v1159_v3 = vrot.slane %v1134_v63, 6  ;;  %v1077_v13 = vadd.f32 %v1076_v12, %v620_v8  ;;  %v1078_v14 = vpop.f32.mrb[2].mxu1  ;;  %v5974_v63 = vld [vmem:[%s7566_s5 + $0x230] sm:$0xff]   ;;  %v6010_v57 = vld [vmem:[%s7566_s5 + $0x38] sm:$0xff]  }
 0x131   : > { %v1160_v5 = vrot.slane %v1135_v1, 6  ;;  %v1136_v16 = vadd.f32 %v1123_v7, %v1075_v11  ;;  %v1079_v17 = vpop.f32.mrb[3].mxu1  ;;  %v5981_v11 = vld [vmem:[%s7566_s5 + $0x40] sm:$0xff]  }
 0x132   : > { %1171 = vst [vmem:[#allocation2] sm:$0x3c] %v1159_v3  ;;  %v1137_v20 = vadd.f32 %v1129_v10, %v1077_v13  ;;  %v5983_v17 = vld [vmem:[%s7566_s5] sm:$0xff]  }
 0x133   : > { %1172 = vst [vmem:[#allocation2 + $0x8] sm:$0x3c] %v1160_v5  ;;  %v1161_v22 = vrot.slane %v1136_v16, 6 }
 0x134   : > { %v1162_v25 = vrot.slane %v1137_v20, 6  ;;  %v5987_v20 = vld [vmem:[%s7566_s5 + $0x8] sm:$0xff]  }
 0x135   : > { %1173 = vst [vmem:[#allocation2 + $0x10] sm:$0x3c] %v1161_v22  ;;  %v5991_v22 = vld [vmem:[%s7566_s5 + $0x10] sm:$0xff]  }
 0x136   : > { %1174 = vst [vmem:[#allocation2 + $0x18] sm:$0x3c] %v1162_v25  ;;  %v5993_v25 = vld [vmem:[%s7566_s5 + $0x58] sm:$0xff]  }
 0x139   : > { %v1189_v15 = vld [vmem:[#allocation2] sm:$0x3e] }
 0x13a   : > { %v1190_v18 = vld [vmem:[#allocation2 + $0x8] sm:$0x3e]  ;;  %v1195_v19 = vpack.c.bf16 %v1189_v15, %v1189_v15 }
 0x13b   : > { %v1196_v21 = vpack.c.bf16 %v1190_v18, %v1190_v18  ;;  %v1178_v15 = vld [vmem:[#allocation2 + $0x8] sm:$0x1f] }
 0x13c   : > { %v1409_v24 = vshll.u32 %v1195_v19, 16  ;;  %v1407_v27 = vshrl.u32 %v1195_v19, 16  ;;  %v1191_v48 = vld [vmem:[#allocation2 + $0x10] sm:$0x3e]  ;;  %v5985_v18 = vld [vmem:[%s7566_s5 + $0x48] sm:$0xff]   ;;  %v1184_v19 = vpack.c.bf16 %v1178_v15, %v1178_v15  ;;  %v6028_v15 = vld [vmem:[%s7566_s5 + $0x160] sm:$0xff]  }
 0x13d   : > { %v1416_v26 = vshll.u32 %v1196_v21, 16  ;;  %v1414_v29 = vshrl.u32 %v1196_v21, 16  ;;  %v1192_v36 = vld [vmem:[#allocation2 + $0x18] sm:$0x3e]  ;;  %v1197_v55 = vpack.c.bf16 %v1191_v48, %v1191_v48  ;;  %v5989_v21 = vld [vmem:[%s7566_s5 + $0x50] sm:$0xff]  }
 0x13e   : > { %v1411_v28 = vrot.slane %v1409_v24, 1  ;;  %v1198_v38 = vpack.c.bf16 %v1192_v36, %v1192_v36  ;;  %v6005_v48 = vld [vmem:[%s7566_s5 + $0xd0] sm:$0xff]  }
 0x13f   : > { %v1418_v30 = vrot.slane %v1416_v26, 1  ;;  %v1423_v61 = vshll.u32 %v1197_v55, 16  ;;  %v1421_v5 = vshrl.u32 %v1197_v55, 16  ;;  %v6008_v55 = vld [vmem:[%s7566_s5 + $0x78] sm:$0xff]  }
 0x140   : > { %v1412_v33 = vor.u32 %v1411_v28, %v1407_v27  ;;  %v1428_v39 = vshrl.u32 %v1198_v38, 16  ;;  %v1430_v40 = vshll.u32 %v1198_v38, 16  ;;  %v5998_v38 = vld [vmem:[%s7566_s5 + $0x20] sm:$0xff]  }
 0x141   : > { %v1419_v31 = vor.u32 %v1418_v30, %v1414_v29  ;;  %v1425_v6 = vrot.slane %v1423_v61, 1  ;;  %v5995_v30 = vld [vmem:[%s7566_s5 + $0x18] sm:$0xff]   ;;  %v1177_v61 = vld [vmem:[#allocation2] sm:$0x1f] }
 0x142   : > { %v1432_v43 = vrot.slane %v1430_v40, 1  ;;  %v1180_v40 = vld [vmem:[#allocation2 + $0x18] sm:$0x1f] }
 0x143   : > { %1774 = vmatprep.mubr.bf16.mxu1 %v1419_v31  ;;  %v1426_v14 = vor.u32 %v1425_v6, %v1421_v5  ;;  %v6018_v5 = vld [vmem:[%s7566_s5 + $0xa8] sm:$0xff]  }
 0x144   : > { %1775 = vmatmul.mubr.bf16.vlgmr.msra.gmra.mrb[4].mxu1 %v1412_v33  ;;  %v1433_v44 = vor.u32 %v1432_v43, %v1428_v39  ;;  %v5999_v39 = vld [vmem:[%s7566_s5 + $0x80] sm:$0xff]   ;;  %v6001_v43 = vld [vmem:[%s7566_s5 + $0xc8] sm:$0xff]  }
 0x145   : > { %5265 = vmatpush3.bf16.msra.mxu1 %v5955_v32  ;;  %v5996_v32 = vld [vmem:[%s7566_s5 + $0x60] sm:$0xff]   ;;  %v6019_v6 = vld [vmem:[%s7566_s5 + $0x108] sm:$0xff]  }
 0x146   : > { %5266 = vmatprep.subr.bf16.mxu1 %v5956_v34  ;;  %1814 = vmatprep.mubr.bf16.mxu1 %v1433_v44  ;;  %v1186_v44 = vpack.c.bf16 %v1180_v40, %v1180_v40 }
 0x149   : > { %5267 = vmatpush3.bf16.msra.mxu1 %v5957_v35 }
 0x14a   : > { %5268 = vmatprep.subr.bf16.mxu1 %v5959_v37 }
 0x14d   : > { %5269 = vmatpush3.bf16.msra.mxu1 %v5960_v41 }
 0x14e   : > { %5270 = vmatprep.subr.bf16.mxu1 %v5961_v42  ;;  %v6000_v42 = vld [vmem:[%s7566_s5 + $0x68] sm:$0xff]  }
 0x151   : > { %5271 = vmatpush3.bf16.msra.mxu1 %v5962_v45  ;;  %v6002_v45 = vld [vmem:[%s7566_s5 + $0x28] sm:$0xff]  }
 0x152   : > { %5272 = vmatprep.subr.bf16.mxu1 %v5963_v46  ;;  %v6003_v46 = vld [vmem:[%s7566_s5 + $0x88] sm:$0xff]  }
 0x155   : > { %5273 = vmatpush3.bf16.msra.mxu1 %v5965_v47  ;;  %v6004_v47 = vld [vmem:[%s7566_s5 + $0x70] sm:$0xff]  }
 0x156   : > { %5274 = vmatprep.subr.bf16.mxu1 %v5967_v49  ;;  %v6006_v49 = vld [vmem:[%s7566_s5 + $0x30] sm:$0xff]  }
 0x159   : > { %5275 = vmatpush3.bf16.msra.mxu1 %v5969_v56  ;;  %v6009_v56 = vld [vmem:[%s7566_s5 + $0xd8] sm:$0xff]  }
 0x15a   : > { %5276 = vmatprep.subr.bf16.mxu1 %v5971_v58  ;;  %v6011_v58 = vld [vmem:[%s7566_s5 + $0x98] sm:$0xff]  }
 0x15b   : > { %v1115_v1 = vpop.f32.mrb[4].mxu0 }
 0x15c   : > { %v1116_v3 = vadd.f32 %v1115_v1, %v624_v59  ;;  %v1117_v4 = vpop.f32.mrb[5].mxu0  ;;  %v6012_v59 = vld [vmem:[%s7566_s5 + $0xe0] sm:$0xff]   ;;  %v1183_v1 = vpack.c.bf16 %v1177_v61, %v1177_v61  ;;  %v6059_v61 = vld [vmem:[%s7566_s5 + $0x398] sm:$0xff]  }
 0x15d   : > { %v1118_v7 = vadd.f32 %v1117_v4, %v628_v62  ;;  %5277 = vmatpush3.bf16.msra.mxu1 %v5974_v63  ;;  %v1119_v8 = vpop.f32.mrb[6].mxu0  ;;  %v6014_v62 = vld [vmem:[%s7566_s5 + $0xa0] sm:$0xff]  }
 0x15e   : > { %v1138_v9 = vadd.f32 %v1124_v60, %v1116_v3  ;;  %v1120_v10 = vpop.f32.mrb[7].mxu0  ;;  %5278 = vmatprep.subr.bf16.mxu1 %v5976_v0  ;;  %v6013_v60 = vld [vmem:[%s7566_s5 + $0x140] sm:$0xff]   ;;  %v6017_v3 = vld [vmem:[%s7566_s5 + $0x148] sm:$0xff]   ;;  %v6021_v8 = vld [vmem:[%s7566_s5 + $0x150] sm:$0xff]  }
 0x15f   : > { %v1139_v12 = vadd.f32 %v1130_v2, %v1118_v7  ;;  %v6015_v63 = vld [vmem:[%s7566_s5 + $0x100] sm:$0xff]   ;;  %v6016_v2 = vld [vmem:[%s7566_s5 + $0xe8] sm:$0xff]   ;;  %v6020_v7 = vld [vmem:[%s7566_s5 + $0xf0] sm:$0xff]  }
 0x160   : > { %v1163_v13 = vrot.slane %v1138_v9, 6  ;;  %v6023_v9 = vld [vmem:[%s7566_s5 + $0x110] sm:$0xff]   ;;  %v6024_v10 = vld [vmem:[%s7566_s5 + $0xf8] sm:$0xff]  }
 0x161   : > { %v1164_v16 = vrot.slane %v1139_v12, 6  ;;  %5279 = vmatpush3.bf16.msra.mxu1 %v5978_v52  ;;  %v6022_v52 = vld [vmem:[%s7566_s5 + $0xb0] sm:$0xff]   ;;  %v6026_v12 = vld [vmem:[%s7566_s5 + $0xb8] sm:$0xff]  }
 0x162   : > { %1175 = vst [vmem:[#allocation2 + $0x20] sm:$0x3c] %v1163_v13  ;;  %5308 = vmatprep.subr.bf16.mxu1 %v5981_v11  ;;  %v6025_v11 = vld [vmem:[%s7566_s5 + $0x158] sm:$0xff]  }
 0x163   : > { %1176 = vst [vmem:[#allocation2 + $0x28] sm:$0x3c] %v1164_v16  ;;  %v6027_v13 = vld [vmem:[%s7566_s5 + $0x118] sm:$0xff]   ;;  %v6029_v16 = vld [vmem:[%s7566_s5 + $0x340] sm:$0xff]  }
 0x164   : > { %1815 = vmatmul.mubr.bf16.vlgmr.msra.gmra.mrb[8].mxu1 %v1426_v14  ;;  %v1202_v14 = vld [vmem:[#allocation2 + $0x8] sm:$0x7c] }
 0x165   : > { %5309 = vmatpush3.bf16.msra.mxu1 %v5983_v17  ;;  %2182 = vmatprep.mubr.bf16.mxu1 %v1184_v19  ;;  %v1179_v17 = vld [vmem:[#allocation2 + $0x10] sm:$0x1f]  ;;  %v6030_v19 = vld [vmem:[%s7566_s5 + $0x120] sm:$0xff]  }
 0x166   : > { %5310 = vmatprep.subr.bf16.mxu1 %v5985_v18  ;;  %v1208_v18 = vpack.c.bf16 %v1202_v14, %v1202_v14  ;;  %v6072_v14 = vld [vmem:[%s7566_s5 + $0x3f8] sm:$0xff]  }
 0x169   : > { %5311 = vmatpush3.bf16.msra.mxu1 %v5987_v20  ;;  %v1193_v24 = vld [vmem:[#allocation2 + $0x20] sm:$0x3e] }
 0x16a   : > { %5312 = vmatprep.subr.bf16.mxu1 %v5989_v21  ;;  %v1194_v26 = vld [vmem:[#allocation2 + $0x28] sm:$0x3e]  ;;  %v1199_v27 = vpack.c.bf16 %v1193_v24, %v1193_v24  ;;  %v6031_v20 = vld [vmem:[%s7566_s5 + $0x300] sm:$0xff]   ;;  %v1185_v21 = vpack.c.bf16 %v1179_v17, %v1179_v17  ;;  %v6074_v17 = vld [vmem:[%s7566_s5 + $0x3b8] sm:$0xff]  }
 0x16b   : > { %v1200_v28 = vpack.c.bf16 %v1194_v26, %v1194_v26  ;;  %v1182_v0 = vld [vmem:[#allocation2 + $0x28] sm:$0x1f] }
 0x16c   : > { %v1437_v29 = vshll.u32 %v1199_v27, 16  ;;  %v1435_v36 = vshrl.u32 %v1199_v27, 16  ;;  %v1188_v4 = vpack.c.bf16 %v1182_v0, %v1182_v0  ;;  %v6033_v24 = vld [vmem:[%s7566_s5 + $0x348] sm:$0xff]   ;;  %v6060_v0 = vld [vmem:[%s7566_s5 + $0x3e0] sm:$0xff]  }
 0x16d   : > { %5313 = vmatpush3.bf16.msra.mxu1 %v5991_v22  ;;  %v1444_v31 = vshll.u32 %v1200_v28, 16  ;;  %v1442_v34 = vshrl.u32 %v1200_v28, 16  ;;  %v6032_v22 = vld [vmem:[%s7566_s5 + $0x168] sm:$0xff]   ;;  %v6036_v28 = vld [vmem:[%s7566_s5 + $0x170] sm:$0xff]  }
 0x16e   : > { %5314 = vmatprep.subr.bf16.mxu1 %v5993_v25  ;;  %v1439_v33 = vrot.slane %v1437_v29, 1  ;;  %v2374_v25 = vrot.slane %v1208_v18, 1  ;;  %v6034_v26 = vld [vmem:[%s7566_s5 + $0x128] sm:$0xff]   ;;  %v6037_v29 = vld [vmem:[%s7566_s5 + $0x350] sm:$0xff]   ;;  %v6075_v18 = vld [vmem:[%s7566_s5 + $0x418] sm:$0xff]  }
 0x16f   : > { %v1446_v35 = vrot.slane %v1444_v31, 1  ;;  %v6035_v27 = vld [vmem:[%s7566_s5 + $0x308] sm:$0xff]   ;;  %v6039_v31 = vld [vmem:[%s7566_s5 + $0x310] sm:$0xff]  }
 0x170   : > { %v1440_v41 = vor.u32 %v1439_v33, %v1435_v36  ;;  %v6041_v33 = vld [vmem:[%s7566_s5 + $0x358] sm:$0xff]  }
 0x171   : > { %5315 = vmatpush3.bf16.msra.mxu1 %v5995_v30  ;;  %v1447_v37 = vor.u32 %v1446_v35, %v1442_v34  ;;  %v6038_v30 = vld [vmem:[%s7566_s5 + $0x130] sm:$0xff]   ;;  %v6042_v34 = vld [vmem:[%s7566_s5 + $0x138] sm:$0xff]  }
 0x172   : > { %5316 = vmatprep.subr.bf16.mxu1 %v5996_v32  ;;  %v6040_v32 = vld [vmem:[%s7566_s5 + $0x178] sm:$0xff]  }
 0x173   : > { %1854 = vmatprep.mubr.bf16.mxu0 %v1447_v37  ;;  %v6043_v35 = vld [vmem:[%s7566_s5 + $0x318] sm:$0xff]   ;;  %v6044_v37 = vld [vmem:[%s7566_s5 + $0x360] sm:$0xff]  }
 0x174   : > { %1855 = vmatmul.mubr.bf16.vlgmr.msra.gmra.mrb[8].mxu0 %v1440_v41  ;;  %v1204_v36 = vld [vmem:[#allocation2 + $0x18] sm:$0x7c]  ;;  %v6046_v41 = vld [vmem:[%s7566_s5 + $0x320] sm:$0xff]  }
 0x175   : > { %5317 = vmatpush3.bf16.msra.mxu1 %v5998_v38  ;;  %5331 = vmatpush3.bf16.msra.mxu0 %v5999_v39  ;;  %v6045_v38 = vld [vmem:[%s7566_s5 + $0x3c0] sm:$0xff]   ;;  %v1210_v40 = vpack.c.bf16 %v1204_v36, %v1204_v36 }
 0x176   : > { %2222 = vmatprep.mubr.bf16.mxu0 %v1186_v44  ;;  %5318 = vmatprep.subr.bf16.mxu1 %v6000_v42  ;;  %v1181_v39 = vld [vmem:[#allocation2 + $0x20] sm:$0x1f]  ;;  %v6048_v44 = vld [vmem:[%s7566_s5 + $0x368] sm:$0xff]  }
 0x177   : > { %5332 = vmatprep.subr.bf16.mxu0 %v6001_v43  ;;  %v6047_v42 = vld [vmem:[%s7566_s5 + $0x380] sm:$0xff]   ;;  %v1187_v43 = vpack.c.bf16 %v1181_v39, %v1181_v39 }
 0x178   : > { %v6085_v39 = vld [vmem:[%s7568_s7] sm:$0xff]  }
 0x179   : > { %5319 = vmatpush3.bf16.msra.mxu1 %v6002_v45  ;;  %5333 = vmatpush3.bf16.msra.mxu0 %v6003_v46  ;;  %v6049_v45 = vld [vmem:[%s7566_s5 + $0x3c8] sm:$0xff]   ;;  %v2376_v46 = vrot.slane %v1210_v40, 1 }
 0x17a   : > { %5320 = vmatprep.subr.bf16.mxu1 %v6004_v47  ;;  %5334 = vmatprep.subr.bf16.mxu0 %v6005_v48  ;;  %v6050_v47 = vld [vmem:[%s7566_s5 + $0x328] sm:$0xff]  }
 0x17b   : > { %v6051_v48 = vld [vmem:[%s7566_s5 + $0x388] sm:$0xff]  }
 0x17c   : > { %v6086_v40 = vld [vmem:[%s7568_s7 + $0x48] sm:$0xff]  }
 0x17d   : > { %5321 = vmatpush3.bf16.msra.mxu1 %v6006_v49  ;;  %5335 = vmatpush3.bf16.msra.mxu0 %v6007_v54  ;;  %v6052_v49 = vld [vmem:[%s7566_s5 + $0x370] sm:$0xff]  }
 0x17e   : > { %5322 = vmatprep.subr.bf16.mxu1 %v6008_v55  ;;  %5336 = vmatprep.subr.bf16.mxu0 %v6009_v56  ;;  %v6053_v54 = vld [vmem:[%s7566_s5 + $0x3d0] sm:$0xff]  }
 0x17f   : > { %v6054_v55 = vld [vmem:[%s7566_s5 + $0x330] sm:$0xff]  }
 0x180   : > { %v6055_v56 = vld [vmem:[%s7566_s5 + $0x390] sm:$0xff]  }
 0x181   : > { %5323 = vmatpush3.bf16.msra.mxu1 %v6010_v57  ;;  %5337 = vmatpush3.bf16.msra.mxu0 %v6011_v58  ;;  %v6056_v57 = vld [vmem:[%s7566_s5 + $0x378] sm:$0xff]  }
 0x182   : > { %5338 = vmatprep.subr.bf16.mxu0 %v6012_v59  ;;  %5352 = vmatprep.subr.bf16.mxu1 %v6013_v60  ;;  %v6057_v58 = vld [vmem:[%s7566_s5 + $0x3d8] sm:$0xff]   ;;  %v1201_v59 = vld [vmem:[#allocation2] sm:$0x7c] }
 0x183   : > { %v6058_v60 = vld [vmem:[%s7566_s5 + $0x338] sm:$0xff]  }
 0x184   : > { %2183 = vmatmul.mubr.bf16.vlgmr.msra.gmra.mrb[12].mxu1 %v1183_v1  ;;  %v6061_v1 = vld [vmem:[%s7566_s5 + $0x440] sm:$0xff]  }
 0x185   : > { %5339 = vmatpush3.bf16.msra.mxu0 %v6014_v62  ;;  %5353 = vmatpush3.bf16.msra.mxu1 %v6015_v63  ;;  %v1206_v62 = vld [vmem:[#allocation2 + $0x28] sm:$0x7c]  ;;  %v1207_v63 = vpack.c.bf16 %v1201_v59, %v1201_v59 }
 0x186   : > { %2262 = vmatprep.mubr.bf16.mxu1 %v1188_v4  ;;  %5340 = vmatprep.subr.bf16.mxu0 %v6016_v2  ;;  %v1212_v2 = vpack.c.bf16 %v1206_v62, %v1206_v62  ;;  %v6063_v4 = vld [vmem:[%s7566_s5 + $0x400] sm:$0xff]  }
 0x187   : > { %5354 = vmatprep.subr.bf16.mxu1 %v6017_v3  ;;  %v6062_v3 = vld [vmem:[%s7566_s5 + $0x3a0] sm:$0xff]  }
 0x189   : > { %5341 = vmatpush3.bf16.msra.mxu0 %v6018_v5  ;;  %5355 = vmatpush3.bf16.msra.mxu1 %v6019_v6  ;;  %v2373_v5 = vrot.slane %v1207_v63, 1  ;;  %v6064_v6 = vld [vmem:[%s7566_s5 + $0x3e8] sm:$0xff]  }
 0x18a   : > { %5342 = vmatprep.subr.bf16.mxu0 %v6020_v7  ;;  %5356 = vmatprep.subr.bf16.mxu1 %v6021_v8  ;;  %v6065_v7 = vld [vmem:[%s7566_s5 + $0x448] sm:$0xff]   ;;  %v2378_v8 = vrot.slane %v1212_v2, 1 }
 0x18d   : > { %5343 = vmatpush3.bf16.msra.mxu0 %v6022_v52  ;;  %5357 = vmatpush3.bf16.msra.mxu1 %v6023_v9  ;;  %v6066_v52 = vld [vmem:[%s7566_s5 + $0x3a8] sm:$0xff]  }
 0x18e   : > { %5344 = vmatprep.subr.bf16.mxu0 %v6024_v10  ;;  %5358 = vmatprep.subr.bf16.mxu1 %v6025_v11  ;;  %v6067_v9 = vld [vmem:[%s7566_s5 + $0x408] sm:$0xff]   ;;  %v6068_v10 = vld [vmem:[%s7566_s5 + $0x3f0] sm:$0xff]  }
 0x18f   : > { %v6069_v11 = vld [vmem:[%s7566_s5 + $0x450] sm:$0xff]  }
 0x191   : > { %5345 = vmatpush3.bf16.msra.mxu0 %v6026_v12  ;;  %5359 = vmatpush3.bf16.msra.mxu1 %v6027_v13  ;;  %v6070_v12 = vld [vmem:[%s7566_s5 + $0x3b0] sm:$0xff]  }
 0x192   : > { %5360 = vmatprep.subr.bf16.mxu1 %v6028_v15  ;;  %5374 = vmatprep.subr.bf16.mxu0 %v6029_v16  ;;  %v6071_v13 = vld [vmem:[%s7566_s5 + $0x410] sm:$0xff]   ;;  %v6073_v15 = vld [vmem:[%s7566_s5 + $0x458] sm:$0xff]  }
 0x193   : > { %v1203_v16 = vld [vmem:[#allocation2 + $0x10] sm:$0x7c] }
 0x194   : > { %2223 = vmatmul.mubr.bf16.vlgmr.msra.gmra.mrb[12].mxu0 %v1185_v21  ;;  %v6077_v21 = vld [vmem:[%s7566_s5 + $0x420] sm:$0xff]  }
 0x195   : > { %5361 = vmatpush3.bf16.msra.mxu1 %v6030_v19  ;;  %5375 = vmatpush3.bf16.msra.mxu0 %v6031_v20  ;;  %v1209_v19 = vpack.c.bf16 %v1203_v16, %v1203_v16  ;;  %v6076_v20 = vld [vmem:[%s7566_s5 + $0x460] sm:$0xff]  }
 0x196   : > { %2705 = vmatprep.mubr.bf16.mxu0 %v2374_v25  ;;  %5362 = vmatprep.subr.bf16.mxu1 %v6032_v22  ;;  %v6079_v25 = vld [vmem:[%s7566_s5 + $0x428] sm:$0xff]  }
 0x197   : > { %5376 = vmatprep.subr.bf16.mxu0 %v6033_v24  ;;  %v2375_v22 = vrot.slane %v1209_v19, 1  ;;  %v6078_v24 = vld [vmem:[%s7566_s5 + $0x468] sm:$0xff]  }
 0x199   : > { %5363 = vmatpush3.bf16.msra.mxu1 %v6034_v26  ;;  %5377 = vmatpush3.bf16.msra.mxu0 %v6035_v27  ;;  %v6080_v26 = vld [vmem:[%s7566_s5 + $0x470] sm:$0xff]  }
 0x19a   : > { %5364 = vmatprep.subr.bf16.mxu1 %v6036_v28  ;;  %5378 = vmatprep.subr.bf16.mxu0 %v6037_v29  ;;  %v6081_v27 = vld [vmem:[%s7566_s5 + $0x430] sm:$0xff]   ;;  %v6082_v28 = vld [vmem:[%s7566_s5 + $0x478] sm:$0xff]   ;;  %v1205_v29 = vld [vmem:[#allocation2 + $0x20] sm:$0x7c] }
 0x19d   : > { %5365 = vmatpush3.bf16.msra.mxu1 %v6038_v30  ;;  %5379 = vmatpush3.bf16.msra.mxu0 %v6039_v31  ;;  %v6083_v30 = vld [vmem:[%s7566_s5 + $0x438] sm:$0xff]   ;;  %v1211_v31 = vpack.c.bf16 %v1205_v29, %v1205_v29 }
 0x19e   : > { %5366 = vmatprep.subr.bf16.mxu1 %v6040_v32  ;;  %5380 = vmatprep.subr.bf16.mxu0 %v6041_v33 }
 0x19f   : > { %v2377_v32 = vrot.slane %v1211_v31, 1 }
 0x1a1   : > { %5367 = vmatpush3.bf16.msra.mxu1 %v6042_v34  ;;  %5381 = vmatpush3.bf16.msra.mxu0 %v6043_v35 }
 0x1a2   : > { %5382 = vmatprep.subr.bf16.mxu0 %v6044_v37  ;;  %5396 = vmatprep.subr.bf16.mxu1 %v6045_v38  ;;  %v6084_v38 = vld [vmem:[%s7568_s7 + $0x40] sm:$0xff]  }
 0x1a4   : > { %2263 = vmatmul.mubr.bf16.vlgmr.msra.gmra.mrb[16].mxu1 %v1187_v43  ;;  %v6089_v43 = vld [vmem:[%s7568_s7 + $0x10] sm:$0xff]  }
 0x1a5   : > { %5383 = vmatpush3.bf16.msra.mxu0 %v6046_v41  ;;  %5397 = vmatpush3.bf16.msra.mxu1 %v6047_v42  ;;  %v6087_v41 = vld [vmem:[%s7568_s7 + $0x8] sm:$0xff]   ;;  %v6088_v42 = vld [vmem:[%s7568_s7 + $0x50] sm:$0xff]  }
 0x1a6   : > { %2745 = vmatprep.mubr.bf16.mxu1 %v2376_v46  ;;  %5384 = vmatprep.subr.bf16.mxu0 %v6048_v44  ;;  %v6090_v44 = vld [vmem:[%s7568_s7 + $0x58] sm:$0xff]   ;;  %v6092_v46 = vld [vmem:[%s7568_s7 + $0x60] sm:$0xff]  }
 0x1a7   : > { %5398 = vmatprep.subr.bf16.mxu1 %v6049_v45  ;;  %v6091_v45 = vld [vmem:[%s7568_s7 + $0x18] sm:$0xff]  }
 0x1a9   : > { %5385 = vmatpush3.bf16.msra.mxu0 %v6050_v47  ;;  %5399 = vmatpush3.bf16.msra.mxu1 %v6051_v48  ;;  %v6093_v47 = vld [vmem:[%s7568_s7 + $0x20] sm:$0xff]   ;;  %v6094_v48 = vld [vmem:[%s7568_s7 + $0x68] sm:$0xff]  }
 0x1aa   : > { %5386 = vmatprep.subr.bf16.mxu0 %v6052_v49  ;;  %5400 = vmatprep.subr.bf16.mxu1 %v6053_v54  ;;  %v6095_v49 = vld [vmem:[%s7568_s7 + $0x28] sm:$0xff]   ;;  %v6096_v54 = vld [vmem:[%s7568_s7 + $0x70] sm:$0xff]  }
 0x1ad   : > { %5387 = vmatpush3.bf16.msra.mxu0 %v6054_v55  ;;  %5401 = vmatpush3.bf16.msra.mxu1 %v6055_v56  ;;  %v6097_v55 = vld [vmem:[%s7568_s7 + $0x30] sm:$0xff]   ;;  %v6098_v56 = vld [vmem:[%s7568_s7 + $0x78] sm:$0xff]  }
 0x1ae   : > { %5388 = vmatprep.subr.bf16.mxu0 %v6056_v57  ;;  %5402 = vmatprep.subr.bf16.mxu1 %v6057_v58  ;;  %v6099_v58 = vld [vmem:[%s7568_s7 + $0x38] sm:$0xff]  }
 0x1b1   : > { %5389 = vmatpush3.bf16.msra.mxu0 %v6058_v60  ;;  %5403 = vmatpush3.bf16.msra.mxu1 %v6059_v61 }
 0x1b2   : > { %5404 = vmatprep.subr.bf16.mxu1 %v6060_v0  ;;  %5418 = vmatprep.subr.bf16.mxu0 %v6061_v1 }
 0x1b4   : > { %2706 = vmatmul.mubr.bf16.vlgmr.msra.gmra.mrb[16].mxu0 %v2373_v5 }
 0x1b5   : > { %5405 = vmatpush3.bf16.msra.mxu1 %v6062_v3  ;;  %5419 = vmatpush3.bf16.msra.mxu0 %v6063_v4 }
 0x1b6   : > { %2785 = vmatprep.mubr.bf16.mxu0 %v2378_v8  ;;  %5406 = vmatprep.subr.bf16.mxu1 %v6064_v6 }
 0x1b7   : > { %5420 = vmatprep.subr.bf16.mxu0 %v6065_v7 }
 0x1b9   : > { %5407 = vmatpush3.bf16.msra.mxu1 %v6066_v52  ;;  %5421 = vmatpush3.bf16.msra.mxu0 %v6067_v9 }
 0x1ba   : > { %5408 = vmatprep.subr.bf16.mxu1 %v6068_v10  ;;  %5422 = vmatprep.subr.bf16.mxu0 %v6069_v11 }
 0x1bd   : > { %5409 = vmatpush3.bf16.msra.mxu1 %v6070_v12  ;;  %5423 = vmatpush3.bf16.msra.mxu0 %v6071_v13 }
 0x1be   : > { %5410 = vmatprep.subr.bf16.mxu1 %v6072_v14  ;;  %5424 = vmatprep.subr.bf16.mxu0 %v6073_v15 }
 0x1c1   : > { %5411 = vmatpush3.bf16.msra.mxu1 %v6074_v17  ;;  %5425 = vmatpush3.bf16.msra.mxu0 %v6075_v18 }
 0x1c2   : > { %5426 = vmatprep.subr.bf16.mxu0 %v6076_v20  ;;  %5520 = vmatprep.subr.bf16.mxu1 %v6253_v23 }
 0x1c4   : > { %2746 = vmatmul.mubr.bf16.vlgmr.msra.gmra.mrb[20].mxu1 %v2375_v22 }
 0x1c5   : > { %5427 = vmatpush3.bf16.msra.mxu0 %v6077_v21  ;;  %5521 = vmatpush3.bf16.msra.mxu1 %v6084_v38 }
 0x1c6   : > { %5428 = vmatprep.subr.bf16.mxu0 %v6078_v24  ;;  %5522 = vmatprep.subr.bf16.mxu1 %v6253_v23 }
 0x1c7   : > { %5536 = vmatprep.mubr.msk.bf16.mxu1 %vm6254_vm3, %v6253_v23 }
 0x1c9   : > { %5429 = vmatpush3.bf16.msra.mxu0 %v6079_v25  ;;  %5523 = vmatpush3.bf16.msra.mxu1 %v6086_v40 }
 0x1ca   : > { %5430 = vmatprep.subr.bf16.mxu0 %v6080_v26  ;;  %5524 = vmatprep.subr.bf16.mxu1 %v6253_v23 }
 0x1cd   : > { %5431 = vmatpush3.bf16.msra.mxu0 %v6081_v27  ;;  %5525 = vmatpush3.bf16.msra.mxu1 %v6088_v42 }
 0x1ce   : > { %5432 = vmatprep.subr.bf16.mxu0 %v6082_v28  ;;  %5526 = vmatprep.subr.bf16.mxu1 %v6253_v23 }
 0x1d1   : > { %5433 = vmatpush3.bf16.msra.mxu0 %v6083_v30  ;;  %5527 = vmatpush3.bf16.msra.mxu1 %v6090_v44 }
 0x1d2   : > { %5540 = vmatprep.subr.bf16.mxu0 %v6253_v23  ;;  %5528 = vmatprep.subr.bf16.mxu1 %v6253_v23 }
 0x1d4   : > { %2786 = vmatmul.mubr.bf16.vlgmr.msra.gmra.mrb[20].mxu0 %v2377_v32 }
 0x1d5   : > { %5541 = vmatpush3.bf16.msra.mxu0 %v6085_v39  ;;  %5529 = vmatpush3.bf16.msra.mxu1 %v6092_v46 }
 0x1d6   : > { %5542 = vmatprep.subr.bf16.mxu0 %v6253_v23  ;;  %5530 = vmatprep.subr.bf16.mxu1 %v6253_v23 }
 0x1d7   : > { %5556 = vmatprep.mubr.msk.bf16.mxu0 %vm6254_vm3, %v6253_v23 }
 0x1d9   : > { %5543 = vmatpush3.bf16.msra.mxu0 %v6087_v41  ;;  %5531 = vmatpush3.bf16.msra.mxu1 %v6094_v48  ;;  %v5141_v41 = vld [vmem:[%s7567_s6] ss:$0 sm:$0xff] }
 0x1da   : > { %5544 = vmatprep.subr.bf16.mxu0 %v6253_v23  ;;  %5532 = vmatprep.subr.bf16.mxu1 %v6253_v23 }
 0x1dd   : > { %5545 = vmatpush3.bf16.msra.mxu0 %v6089_v43  ;;  %5533 = vmatpush3.bf16.msra.mxu1 %v6096_v54  ;;  %v6101_v54 = vld [vmem:[%s7568_s7 + $0x88] sm:$0xff]  }
 0x1de   : > { %5546 = vmatprep.subr.bf16.mxu0 %v6253_v23  ;;  %5534 = vmatprep.subr.bf16.mxu1 %v6253_v23 }
 0x1e1   : > { %5547 = vmatpush3.bf16.msra.mxu0 %v6091_v45  ;;  %5535 = vmatpush3.bf16.msra.mxu1 %v6098_v56  ;;  %v6103_v56 = vld [vmem:[%s7568_s7 + $0x98] sm:$0xff]  }
 0x1e2   : > { %5548 = vmatprep.subr.bf16.mxu0 %v6253_v23  ;;  %5560 = vmatprep.subr.bf16.mxu1 %v6253_v23 }
 0x1e5   : > { %5549 = vmatpush3.bf16.msra.mxu0 %v6093_v47  ;;  %v6100_v47 = vld [vmem:[%s7568_s7 + $0x80] sm:$0xff]  }
 0x1e6   : > { %5550 = vmatprep.subr.bf16.mxu0 %v6253_v23 }
 0x1e9   : > { %5551 = vmatpush3.bf16.msra.mxu0 %v6095_v49 }
 0x1ea   : > { %5552 = vmatprep.subr.bf16.mxu0 %v6253_v23 }
 0x1ed   : > { %5553 = vmatpush3.bf16.msra.mxu0 %v6097_v55  ;;  %v6102_v55 = vld [vmem:[%s7568_s7 + $0x90] sm:$0xff]  }
 0x1ee   : > { %5554 = vmatprep.subr.bf16.mxu0 %v6253_v23 }
 0x1f1   : > { %5555 = vmatpush3.bf16.msra.mxu0 %v6099_v58  ;;  %v6105_v58 = vld [vmem:[%s7568_s7 + $0xa8] sm:$0xff]  }
 0x217   : > { %v5258_v33 = vpop.f32.mrb[4].mxu1 }
 0x218   : > { %v5259_v34 = vpop.f32.mrb[5].mxu1 }
 0x219   : > { %v5260_v35 = vadd.f32 %v5259_v34, %v5258_v33  ;;  %v5261_v36 = vpop.f32.mrb[6].mxu1 }
 0x21a   : > { %v5262_v37 = vpop.f32.mrb[7].mxu1 }
 0x237   : > { %v5280_v57 = vpop.f32.mrb[8].mxu1 }
 0x238   : > { %v5281_v59 = vpop.f32.mrb[9].mxu1 }
 0x239   : > { %v5282_v60 = vadd.f32 %v5281_v59, %v5280_v57  ;;  %v5283_v61 = vpop.f32.mrb[10].mxu1  ;;  %v6104_v57 = vld [vmem:[%s7568_s7 + $0xa0] sm:$0xff]   ;;  %v6106_v59 = vld [vmem:[%s7568_s7 + $0xb0] sm:$0xff]  }
 0x23a   : > { %v5284_v62 = vpop.f32.mrb[11].mxu1 }
 0x23b   : > { %v1817_v63 = vadd.f32 %v5282_v60, %v5260_v35  ;;  %v6107_v60 = vld [vmem:[%s7568_s7 + $0xb8] sm:$0xff]  }
 0x247   : > { %v5302_v0 = vpop.f32.mrb[8].mxu0 }
 0x248   : > { %v5303_v1 = vpop.f32.mrb[9].mxu0 }
 0x249   : > { %v5304_v2 = vadd.f32 %v5303_v1, %v5302_v0  ;;  %v5305_v3 = vpop.f32.mrb[10].mxu0  ;;  %v6110_v0 = vld [vmem:[%s7570_s9 + $0x4] ss:$8 sps:$4 sm:$0xff]   ;;  %v6113_v1 = vld [vmem:[%s7570_s9 + $0x14] ss:$8 sps:$4 sm:$0xff]  }
 0x24a   : > { %v5306_v4 = vpop.f32.mrb[11].mxu0  ;;  %3200 = vmatprep.subr.bf16.mxu0 %v6110_v0  ;;  %v6116_v3 = vld [vmem:[%s7570_s9 + $0x24] ss:$8 sps:$4 sm:$0xff]  }
 0x24b   : > { %v1857_v5 = vadd.f32 %v5304_v2, %v1817_v63  ;;  %v6108_v63 = vld [vmem:[%s7570_s9] ss:$8 sps:$4 sm:$0xff]   ;;  %v6111_v2 = vld [vmem:[%s7570_s9 + $0x10] ss:$8 sps:$4 sm:$0xff]  }
 0x24c   : > { %v6114_v4 = vld [vmem:[%s7570_s9 + $0x20] ss:$8 sps:$4 sm:$0xff]  }
 0x257   : > { %v5324_v6 = vpop.f32.mrb[12].mxu1 }
 0x258   : > { %v5325_v7 = vpop.f32.mrb[13].mxu1 }
 0x259   : > { %v5326_v8 = vadd.f32 %v5325_v7, %v5324_v6  ;;  %v5327_v52 = vpop.f32.mrb[14].mxu1  ;;  %v6117_v6 = vld [vmem:[%s7570_s9 + $0x30] ss:$8 sps:$4 sm:$0xff]   ;;  %v6255_v7 = vmov 0  }
 0x25a   : > { %v5328_v9 = vpop.f32.mrb[15].mxu1 }
 0x25b   : > { %v2185_v10 = vadd.f32 %v5326_v8, %v1857_v5  ;;  %v6119_v5 = vld [vmem:[%s7570_s9 + $0x34] ss:$8 sps:$4 sm:$0xff]  }
 0x267   : > { %v5346_v11 = vpop.f32.mrb[12].mxu0 }
 0x268   : > { %v5347_v12 = vpop.f32.mrb[13].mxu0 }
 0x269   : > { %v5348_v13 = vadd.f32 %v5347_v12, %v5346_v11  ;;  %v5349_v14 = vpop.f32.mrb[14].mxu0 }
 0x26a   : > { %v5350_v15 = vpop.f32.mrb[15].mxu0 }
 0x26b   : > { %v2225_v16 = vadd.f32 %v5348_v13, %v2185_v10 }
 0x277   : > { %v5368_v17 = vpop.f32.mrb[16].mxu1 }
 0x278   : > { %v5369_v18 = vpop.f32.mrb[17].mxu1 }
 0x279   : > { %v5370_v19 = vadd.f32 %v5369_v18, %v5368_v17  ;;  %v5371_v20 = vpop.f32.mrb[18].mxu1  ;;  %v5198_v17 = vld [vmem:[%s7569_s8] ss:$0 sm:$0xff] }
 0x27a   : > { %v5372_v21 = vpop.f32.mrb[19].mxu1 }
 0x27b   : > { %v2265_v22 = vadd.f32 %v5370_v19, %v2225_v16 }
 0x287   : > { %v5390_v24 = vpop.f32.mrb[16].mxu0 }
 0x288   : > { %v5391_v25 = vpop.f32.mrb[17].mxu0 }
 0x289   : > { %v5392_v26 = vadd.f32 %v5391_v25, %v5390_v24  ;;  %v5393_v27 = vpop.f32.mrb[18].mxu0 }
 0x28a   : > { %v5394_v28 = vpop.f32.mrb[19].mxu0 }
 0x297   : > { %v5412_v29 = vpop.f32.mrb[20].mxu1 }
 0x298   : > { %v5413_v30 = vpop.f32.mrb[21].mxu1 }
 0x299   : > { %v5414_v31 = vadd.f32 %v5413_v30, %v5412_v29  ;;  %v5415_v32 = vpop.f32.mrb[22].mxu1  ;;  %v6256_v30 = vmov 65535  }
 0x29a   : > { %v5416_v33 = vpop.f32.mrb[23].mxu1 }
 0x29b   : > { %v2748_v34 = vadd.f32 %v5414_v31, %v5392_v26  ;;  %v3145_v26 = vld [vmem:[%s7571_s10] sm:$0x3]  ;;  %v3313_v31 = vsel %vm3311_vm4, 4294967295, %v6256_v30 }
 0x29c   : > { %v3150_v27 = vrot.slane %v3145_v26, %v607_v51  ;;  %v3154_v28 = vrot.slane %v3145_v26, %v611_v53 }
 0x2a7   : > { %v5434_v35 = vpop.f32.mrb[20].mxu0 }
 0x2a8   : > { %v5435_v36 = vpop.f32.mrb[21].mxu0 }
 0x2a9   : > { %v5436_v37 = vadd.f32 %v5435_v36, %v5434_v35  ;;  %v5437_v38 = vpop.f32.mrb[22].mxu0 }
 0x2aa   : > { %v5438_v39 = vpop.f32.mrb[23].mxu0  ;;  %v7287_v38 = vsel %vm3312_vm5, %v3313_v31, 0 }
 0x2ab   : > { %v2788_v40 = vadd.f32 %v5436_v37, %v2748_v34 }
 0x2ad   : > { %v2793_v42 = vadd.f32 %v2788_v40, %v2265_v22 }
 0x2af   : > { %v2801_v43 = vadd.f32 %v5141_v41, %v2793_v42 }
 0x2b1   : > { %v2802_v44 = vmax.f32 %v2801_v43, 0.0 }
 0x2b3   : > { %2805 = vst [vmem:[#allocation3 + $0x1] sm:$0x1f] %v2802_v44 }
 0x2ba   : > { %v2808_v45 = vld [vmem:[#allocation3 + $0x1] sm:$0x1f] }
 0x2bb   : > { %v2806_v46 = vld [vmem:[#allocation3] sm:$0x1f]  ;;  %v2809_v48 = vpack.c.bf16 %v2808_v45, %v2808_v45 }
 0x2bc   : > { %v2807_v49 = vpack.c.bf16 %v2806_v46, %v2806_v46  ;;  %v2810_v61 = vld [vmem:[#allocation3 + $0x2] sm:$0x1f] }
 0x2bd   : > { %5537 = vmatmul.mubr.bf16.vlgmr.msra.gmra.mrb[24].mxu1 %v2809_v48  ;;  %v2811_v62 = vpack.c.bf16 %v2810_v61, %v2810_v61 }
 0x2be   : > { %5557 = vmatmul.mubr.bf16.vlgmr.msra.gmra.mrb[24].mxu0 %v2807_v49  ;;  %5561 = vmatpush3.bf16.msra.mxu1 %v6100_v47 }
 0x2bf   : > { %5576 = vmatprep.mubr.msk.bf16.mxu1 %vm6254_vm3, %v6253_v23  ;;  %5562 = vmatprep.subr.bf16.mxu1 %v6253_v23 }
 0x2c0   : > { %3201 = vmatpush1.bf16.msra.mxu0 %v6108_v63  ;;  %3232 = vmatprep.mubr.bf16.mxu0 %v6255_v7 }
 0x2c1   : > { %3202 = vmatprep.subr.bf16.mxu0 %v6113_v1 }
 0x2c2   : > { %5563 = vmatpush3.bf16.msra.mxu1 %v6101_v54 }
 0x2c3   : > { %5564 = vmatprep.subr.bf16.mxu1 %v6253_v23 }
 0x2c4   : > { %3203 = vmatpush1.bf16.msra.mxu0 %v6111_v2 }
 0x2c5   : > { %3204 = vmatprep.subr.bf16.mxu0 %v6116_v3 }
 0x2c6   : > { %5565 = vmatpush3.bf16.msra.mxu1 %v6102_v55 }
 0x2c7   : > { %5566 = vmatprep.subr.bf16.mxu1 %v6253_v23 }
 0x2c8   : > { %3205 = vmatpush1.bf16.msra.mxu0 %v6114_v4 }
 0x2c9   : > { %3206 = vmatprep.subr.bf16.mxu0 %v6119_v5 }
 0x2ca   : > { %5567 = vmatpush3.bf16.msra.mxu1 %v6103_v56 }
 0x2cb   : > { %5568 = vmatprep.subr.bf16.mxu1 %v6253_v23 }
 0x2cc   : > { %3207 = vmatpush1.bf16.msra.mxu0 %v6117_v6 }
 0x2cd   : > { %5580 = vmatprep.subr.bf16.mxu0 %v6253_v23 }
 0x2ce   : > { %5569 = vmatpush3.bf16.msra.mxu1 %v6104_v57 }
 0x2cf   : > { %5570 = vmatprep.subr.bf16.mxu1 %v6253_v23 }
 0x2d2   : > { %5571 = vmatpush3.bf16.msra.mxu1 %v6105_v58 }
 0x2d3   : > { %5572 = vmatprep.subr.bf16.mxu1 %v6253_v23 }
 0x2d6   : > { %5573 = vmatpush3.bf16.msra.mxu1 %v6106_v59 }
 0x2d7   : > { %5574 = vmatprep.subr.bf16.mxu1 %v6253_v23 }
 0x2da   : > { %5575 = vmatpush3.bf16.msra.mxu1 %v6107_v60 }
 0x2db   : > { %5586 = vmatprep.subr.bf16.mxu1 %v6253_v23 }
 0x2dd   : > { %5577 = vmatmul.mubr.bf16.vlgmr.msra.gmra.mrb[28].mxu1 %v2811_v62 }
 0x2de   : > { %5588 = vmatprep.mubr.msk.bf16.mxu1 %vm6254_vm3, %v6253_v23 }
 0x390   : > { %v2927_v8 = vpop.f32.mrb[24].mxu1 }
 0x391   : > { %v3015_v52 = vpop.f32.mrb[24].mxu0  ;;  %v5538_v10 = vpop.f32.mrb[25].mxu1 }
 0x392   : > { %v3016_v9 = vadd.f32 %v3015_v52, %v2927_v8  ;;  %v5558_v11 = vpop.f32.mrb[25].mxu0  ;;  %v2930_v12 = vpop.f32.mrb[26].mxu1 }
 0x393   : > { %v3018_v13 = vpop.f32.mrb[26].mxu0  ;;  %v5539_v14 = vpop.f32.mrb[27].mxu1 }
 0x394   : > { %v5559_v15 = vpop.f32.mrb[27].mxu0  ;;  %v3359_v14 = vld [vmem:[%s7572_s11] sm:$0xf] }
 0x395   : > { %v3525_v15 = vsel %vm3477_vm9, %v3359_v14, 0 }
 0x3b0   : > { %v3120_v16 = vpop.f32.mrb[28].mxu1 }
 0x3b1   : > { %v3126_v18 = vadd.f32 %v3120_v16, %v3016_v9  ;;  %v5578_v19 = vpop.f32.mrb[29].mxu1  ;;  %v3473_v16 = vld [vmem:[%s7572_s11 + $0x4] sm:$0xf] }
 0x3b2   : > { %v3123_v20 = vpop.f32.mrb[30].mxu1 }
 0x3b3   : > { %v3134_v21 = vadd.f32 %v5198_v17, %v3126_v18  ;;  %v5579_v22 = vpop.f32.mrb[31].mxu1  ;;  %v3479_v17 = vsel %vm3477_vm9, %v3473_v16, 0 }
 0x3b5   : > { %v3135_v24 = vmax.f32 %v3134_v21, 0.0 }
 0x3b7   : > { %v3136_v25 = vpack.c.bf16 %v3135_v24, %v3135_v24 }
 0x3b9   : > { %5207 = vmatmul.mubr.msk.bf16.vlgmr.msra.gmra.mrb[28].mxu0 %vm995_vm1, %v3136_v25 }
 0x3ba   : > { %5582 = vmatprep.mubr.msk.bf16.mxu0 %vm6254_vm3, %v6253_v23 }
 0x48c   : > { %v3234_v29 = vpop.f32.mrb[28].mxu0 }
 0x48d   : > { %v3235_v32 = vadd.f32 %v3234_v29, %v3150_v27  ;;  %v3236_v33 = vpop.f32.mrb[29].mxu0 }
 0x48e   : > { %v3237_v34 = vadd.f32 %v3236_v33, %v3154_v28  ;;  %v3238_v35 = vpop.f32.mrb[30].mxu0 }
 0x48f   : > { %v7285_v36 = vpack.c.bf16 %v3235_v32, %v3235_v32  ;;  %v3239_v37 = vpop.f32.mrb[31].mxu0 }
 0x490   : > { %v7289_v39 = vpack.c.bf16 %v3237_v34, %v3237_v34 }
 0x491   : > { %3360 = vrot.lane.b32.xlu1 %v7285_v36, %s6257_s17  ;;  %3244 = vrot.lane.b32.xlu0 %v7285_v36, %s6258_s20 }
 0x492   : > { %v3316_v50 = vand.u32 %v7287_v38, %v7289_v39 }
 0x494   : > { %5587 = vmatpush3.bf16.msra.mxu1 %v3316_v50 }
 0x495   : > { %3362 = vrot.lane.b32.xlu0 %v7285_v36, %s6259_s23  ;;  %5598 = vmatprep.subr.bf16.mxu1 %v6253_v23  ;;  %s6264_s23 = smov 32  }
 0x503   : > { %v3245_v51 = vpop.permute.xlu0 %3244  ;;  %v3361_v42 = vpop.permute.xlu1 %3360 }
 0x504   : > { %v3251_v53 = vsel %vm3246_vm6, %v3245_v51, 0 }
 0x505   : > { %5581 = vmatpush3.bf16.xpose.msra.mxu0 %v3251_v53 }
 0x506   : > { %5592 = vmatprep.subr.bf16.mxu0 %v6253_v23 }
 0x507   : > { %v3363_v40 = vpop.permute.xlu0 %3362 }
 0x508   : > { %v3368_v41 = vsel %vm3246_vm6, %v3363_v40, 0 }
 0x50c   : > { %5583 = vmatmul.mubr.msk.bf16.vlgmr.msra.gmra.mrb[32].mxu0 %vm3246_vm6, %v7285_v36 }
 0x50d   : > { %5593 = vmatpush3.bf16.xpose.msra.mxu0 %v3368_v41  ;;  %5594 = vmatprep.mubr.msk.bf16.mxu0 %vm6254_vm3, %v6253_v23 }
 0x50e   : > { %5604 = vmatprep.subr.bf16.mxu0 %v6253_v23 }
 0x514   : > { %5595 = vmatmul.mubr.msk.bf16.vlgmr.msra.gmra.mrb[36].mxu0 %vm3246_vm6, %v3361_v42 }
 0x515   : > { %5606 = vmatprep.mubr.msk.bf16.mxu0 %vm6254_vm3, %v6253_v23  ;;  %5605 = vmatpush3.bf16.msra.mxu0 %v3479_v17 }
 0x516   : > { %5616 = vmatprep.subr.bf16.mxu0 %v6253_v23 }
 0x5df   : > { %v3287_v43 = vpop.f32.mrb[32].mxu0 }
 0x5e0   : > { %v3293_v44 = vmul.f32 0.35355338, %v3287_v43  ;;  %v5584_v45 = vpop.f32.mrb[33].mxu0 }
 0x5e1   : > { %v3290_v46 = vpop.f32.mrb[34].mxu0 }
 0x5e2   : > { %v5585_v47 = vpop.f32.mrb[35].mxu0  ;;  %v3295_v48 = vsel %vm3294_vm7, %v3293_v44, -inf }
 0x5e3   : > { %3296 = vmax.xlane.f32.xlu1 %v3295_v48 }
 0x5e7   : > { %v3404_v49 = vpop.f32.mrb[36].mxu0 }
 0x5e8   : > { %v3410_v54 = vmul.f32 0.35355338, %v3404_v49  ;;  %v5596_v55 = vpop.f32.mrb[37].mxu0 }
 0x5e9   : > { %v3407_v56 = vpop.f32.mrb[38].mxu0 }
 0x5ea   : > { %v5597_v57 = vpop.f32.mrb[39].mxu0  ;;  %v3411_v58 = vsel %vm3294_vm7, %v3410_v54, -inf }
 0x5eb   : > { %3412 = vmax.xlane.f32.xlu0 %v3411_v58 }
 0x670   : > { %v3297_v59 = vpop.xlane.xlu1 %3296 }
 0x671   : > { %v3298_v60 = vsub.f32 %v3293_v44, %v3297_v59 }
 0x673   : > { %v3299_v61 = vmul.f32 1.442695, %v3298_v60 }
 0x675   : > { %6120 = vpow2.f32 %v3299_v61 }
 0x678   : > { %v3413_v62 = vpop.xlane.xlu0 %3412 }
 0x679   : > { %v3414_v63 = vsub.f32 %v3410_v54, %v3413_v62 }
 0x67b   : > { %v3415_v0 = vmul.f32 1.442695, %v3414_v63 }
 0x67d   : > { %6122 = vpow2.f32 %v3415_v0 }
 0x67f   : > { %v6121_v1 = vpop.eup %6120 }
 0x680   : > { %v3301_v2 = vsel %vm3294_vm7, %v6121_v1, 0.0 }
 0x681   : > { %3302 = vadd.xlane.f32.xlu0 %v3301_v2 }
 0x687   : > { %v6123_v3 = vpop.eup %6122 }
 0x688   : > { %v3417_v4 = vsel %vm3294_vm7, %v6123_v3, 0.0 }
 0x689   : > { %3418 = vadd.xlane.f32.xlu1 %v3417_v4 }
 0x697   : > { %3424 = vrot.lane.b32.xlu0 %v7289_v39, %s6257_s17  ;;  %s6269_s17 = smov 80  }
 0x69a   : > { %3569 = vrot.lane.b32.xlu1 %v7285_v36, %s6260_s15  ;;  %s6265_s15 = smov 96  }
 0x69e   : > { %3567 = vrot.lane.b32.xlu1 %v7285_v36, %s6261_s18 }
 0x70e   : > { %v3303_v5 = vpop.xlane.xlu0 %3302 }
 0x70f   : > { %6124 = vrcp.f32 %v3303_v5 }
 0x712   : > { %v3425_v52 = vpop.permute.xlu0 %3424 }
 0x713   : > { %v3430_v10 = vand.u32 %v3425_v52, %v7287_v38 }
 0x716   : > { %v3419_v6 = vpop.xlane.xlu1 %3418 }
 0x717   : > { %6126 = vrcp.f32 %v3419_v6 }
 0x719   : > { %v6125_v7 = vpop.eup %6124 }
 0x71a   : > { %v3305_v8 = vmul.f32 %v6125_v7, %v6121_v1  ;;  %v3570_v24 = vpop.permute.xlu1 %3569  ;;  %v3679_v1 = vld [vmem:[%s7572_s11 + $0x8] sm:$0xf] }
 0x71b   : > { %v3575_v29 = vsel %vm3246_vm6, %v3570_v24, 0  ;;  %v3684_v2 = vsel %vm3477_vm9, %v3679_v1, 0 }
 0x71c   : > { %v3306_v9 = vpack.c.bf16 %v3305_v8, %v3305_v8 }
 0x71e   : > { %5589 = vmatmul.mubr.msk.bf16.vlgmr.msra.gmra.mrb[32].mxu1 %vm3307_vm8, %v3306_v9  ;;  %v3568_v31 = vpop.permute.xlu1 %3567 }
 0x71f   : > { %5599 = vmatpush3.bf16.msra.mxu1 %v3430_v10  ;;  %5600 = vmatprep.mubr.msk.bf16.mxu1 %vm6254_vm3, %v6253_v23 }
 0x720   : > { %5610 = vmatprep.subr.bf16.mxu1 %v6253_v23 }
 0x721   : > { %v6127_v11 = vpop.eup %6126 }
 0x722   : > { %v3421_v12 = vmul.f32 %v6127_v11, %v6123_v3 }
 0x724   : > { %v3422_v13 = vpack.c.bf16 %v3421_v12, %v3421_v12 }
 0x726   : > { %5601 = vmatmul.mubr.msk.bf16.vlgmr.msra.gmra.mrb[36].mxu1 %vm3307_vm8, %v3422_v13 }
 0x727   : > { %5612 = vmatprep.mubr.msk.bf16.mxu1 %vm6254_vm3, %v6253_v23  ;;  %5611 = vmatpush3.bf16.msra.mxu1 %v3525_v15 }
 0x728   : > { %5622 = vmatprep.subr.bf16.mxu1 %v6253_v23 }
 0x7f1   : > { %v3352_v18 = vpop.f32.mrb[32].mxu1 }
 0x7f2   : > { %v3358_v19 = vpack.c.bf16 %v3352_v18, %v3352_v18  ;;  %v5590_v20 = vpop.f32.mrb[33].mxu1 }
 0x7f3   : > { %v3355_v21 = vpop.f32.mrb[34].mxu1 }
 0x7f4   : > { %v5591_v22 = vpop.f32.mrb[35].mxu1  ;;  %5613 = vmatmul.mubr.msk.bf16.vlgmr.msra.gmra.mrb[40].mxu1 %vm3246_vm6, %v3358_v19 }
 0x7f5   : > { %5624 = vmatprep.mubr.msk.bf16.mxu1 %vm6254_vm3, %v6253_v23 }
 0x7f9   : > { %v3466_v25 = vpop.f32.mrb[36].mxu1 }
 0x7fa   : > { %v3472_v26 = vpack.c.bf16 %v3466_v25, %v3466_v25  ;;  %v5602_v27 = vpop.f32.mrb[37].mxu1 }
 0x7fb   : > { %v3469_v28 = vpop.f32.mrb[38].mxu1 }
 0x7fc   : > { %v5603_v30 = vpop.f32.mrb[39].mxu1  ;;  %5607 = vmatmul.mubr.msk.bf16.vlgmr.msra.gmra.mrb[40].mxu0 %vm3246_vm6, %v3472_v26 }
 0x7fd   : > { %5617 = vmatpush3.bf16.xpose.msra.mxu0 %v3575_v29  ;;  %5618 = vmatprep.mubr.msk.bf16.mxu0 %vm6254_vm3, %v6253_v23 }
 0x7fe   : > { %5628 = vmatprep.subr.bf16.mxu0 %v6253_v23 }
 0x804   : > { %5619 = vmatmul.mubr.msk.bf16.vlgmr.msra.gmra.mrb[44].mxu0 %vm3246_vm6, %v3568_v31 }
 0x805   : > { %5630 = vmatprep.mubr.msk.bf16.mxu0 %vm6254_vm3, %v6253_v23  ;;  %5629 = vmatpush3.bf16.msra.mxu0 %v3684_v2 }
 0x806   : > { %5640 = vmatprep.subr.bf16.mxu0 %v6253_v23 }
 0x8c7   : > { %v3561_v32 = vpop.f32.mrb[40].mxu1 }
 0x8c8   : > { %v5614_v33 = vpop.f32.mrb[41].mxu1 }
 0x8c9   : > { %v3564_v34 = vpop.f32.mrb[42].mxu1  ;;  %v3839_v33 = vld [vmem:[%s7572_s11 + $0xc] sm:$0xf] }
 0x8ca   : > { %v5615_v35 = vpop.f32.mrb[43].mxu1  ;;  %v3844_v34 = vsel %vm3477_vm9, %v3839_v33, 0 }
 0x8cf   : > { %v3515_v37 = vpop.f32.mrb[40].mxu0 }
 0x8d0   : > { %v7347_v50 = vadd.f32 %v3561_v32, %v3515_v37  ;;  %v5608_v51 = vpop.f32.mrb[41].mxu0 }
 0x8d1   : > { %v3518_v53 = vpop.f32.mrb[42].mxu0 }
 0x8d2   : > { %v5609_v40 = vpop.f32.mrb[43].mxu0 }
 0x8d7   : > { %v3611_v41 = vpop.f32.mrb[44].mxu0 }
 0x8d8   : > { %v3617_v42 = vmul.f32 0.35355338, %v3611_v41  ;;  %v5620_v43 = vpop.f32.mrb[45].mxu0 }
 0x8d9   : > { %v3614_v44 = vpop.f32.mrb[46].mxu0 }
 0x8da   : > { %v5621_v45 = vpop.f32.mrb[47].mxu0  ;;  %v3618_v46 = vsel %vm3294_vm7, %v3617_v42, -inf }
 0x8db   : > { %3619 = vmax.xlane.f32.xlu0 %v3618_v46 }
 0x8f1   : > { %3630 = vrot.lane.b32.xlu0 %v7289_v39, %s6261_s18  ;;  %s6271_s18 = smov 8  }
 0x8f5   : > { %3727 = vrot.lane.b32.xlu0 %v7285_v36, %s6262_s16 }
 0x968   : > { %v3620_v47 = vpop.xlane.xlu0 %3619 }
 0x969   : > { %v3621_v48 = vsub.f32 %v3617_v42, %v3620_v47 }
 0x96b   : > { %v3622_v49 = vmul.f32 1.442695, %v3621_v48 }
 0x96c   : > { %v3631_v54 = vpop.permute.xlu0 %3630 }
 0x96d   : > { %6128 = vpow2.f32 %v3622_v49  ;;  %v3636_v55 = vand.u32 %v3631_v54, %v7287_v38 }
 0x96f   : > { %5623 = vmatpush3.bf16.msra.mxu1 %v3636_v55 }
 0x970   : > { %5634 = vmatprep.subr.bf16.mxu1 %v6253_v23  ;;  %v3728_v0 = vpop.permute.xlu0 %3727 }
 0x977   : > { %v6129_v56 = vpop.eup %6128 }
 0x978   : > { %v3624_v57 = vsel %vm3294_vm7, %v6129_v56, 0.0 }
 0x979   : > { %3625 = vadd.xlane.f32.xlu1 %v3624_v57 }
 0x98a   : > { %3729 = vrot.lane.b32.xlu1 %v7285_v36, %s6263_s27  ;;  %s6268_s27 = smov 16  }
 0xa06   : > { %v3626_v58 = vpop.xlane.xlu1 %3625 }
 0xa07   : > { %6130 = vrcp.f32 %v3626_v58 }
 0xa0a   : > { %v3730_v61 = vpop.permute.xlu1 %3729 }
 0xa0b   : > { %v3735_v63 = vsel %vm3246_vm6, %v3730_v61, 0 }
 0xa11   : > { %v6131_v59 = vpop.eup %6130 }
 0xa12   : > { %v3628_v60 = vmul.f32 %v6131_v59, %v6129_v56 }
 0xa14   : > { %v3629_v62 = vpack.c.bf16 %v3628_v60, %v3628_v60 }
 0xa16   : > { %5625 = vmatmul.mubr.msk.bf16.vlgmr.msra.gmra.mrb[44].mxu1 %vm3307_vm8, %v3629_v62 }
 0xa17   : > { %5635 = vmatpush3.bf16.xpose.msra.mxu1 %v3735_v63  ;;  %5636 = vmatprep.mubr.msk.bf16.mxu1 %vm6254_vm3, %v6253_v23 }
 0xa18   : > { %5646 = vmatprep.subr.bf16.mxu1 %v6253_v23 }
 0xa1e   : > { %5637 = vmatmul.mubr.msk.bf16.vlgmr.msra.gmra.mrb[48].mxu1 %vm3246_vm6, %v3728_v0 }
 0xa1f   : > { %5648 = vmatprep.mubr.msk.bf16.mxu1 %vm6254_vm3, %v6253_v23  ;;  %5647 = vmatpush3.bf16.msra.mxu1 %v3844_v34 }
 0xa20   : > { %5658 = vmatprep.subr.bf16.mxu1 %v6253_v23 }
 0xae9   : > { %v3672_v3 = vpop.f32.mrb[44].mxu1 }
 0xaea   : > { %v3678_v4 = vpack.c.bf16 %v3672_v3, %v3672_v3  ;;  %v5626_v5 = vpop.f32.mrb[45].mxu1 }
 0xaeb   : > { %v3675_v6 = vpop.f32.mrb[46].mxu1  ;;  %v3999_v5 = vld [vmem:[%s7572_s11 + $0x10] sm:$0xf] }
 0xaec   : > { %v5627_v7 = vpop.f32.mrb[47].mxu1  ;;  %5631 = vmatmul.mubr.msk.bf16.vlgmr.msra.gmra.mrb[48].mxu0 %vm3246_vm6, %v3678_v4  ;;  %v4004_v6 = vsel %vm3477_vm9, %v3999_v5, 0 }
 0xaed   : > { %5642 = vmatprep.mubr.msk.bf16.mxu0 %vm6254_vm3, %v6253_v23 }
 0xaf1   : > { %v3771_v8 = vpop.f32.mrb[48].mxu1 }
 0xaf2   : > { %v3777_v52 = vmul.f32 0.35355338, %v3771_v8  ;;  %v5638_v9 = vpop.f32.mrb[49].mxu1 }
 0xaf3   : > { %v3774_v10 = vpop.f32.mrb[50].mxu1 }
 0xaf4   : > { %v5639_v11 = vpop.f32.mrb[51].mxu1  ;;  %v3778_v12 = vsel %vm3294_vm7, %v3777_v52, -inf }
 0xaf5   : > { %3779 = vmax.xlane.f32.xlu1 %v3778_v12 }
 0xb06   : > { %3889 = vrot.lane.b32.xlu1 %v7285_v36, %s6264_s23 }
 0xb0a   : > { %3887 = vrot.lane.b32.xlu1 %v7285_v36, %s6265_s15 }
 0xb82   : > { %v3780_v13 = vpop.xlane.xlu1 %3779 }
 0xb83   : > { %v3781_v14 = vsub.f32 %v3777_v52, %v3780_v13 }
 0xb85   : > { %v3782_v15 = vmul.f32 1.442695, %v3781_v14 }
 0xb86   : > { %v3890_v29 = vpop.permute.xlu1 %3889 }
 0xb87   : > { %6132 = vpow2.f32 %v3782_v15  ;;  %v3895_v31 = vsel %vm3246_vm6, %v3890_v29, 0 }
 0xb8a   : > { %v3888_v32 = vpop.permute.xlu1 %3887 }
 0xb91   : > { %v6133_v16 = vpop.eup %6132 }
 0xb92   : > { %v3784_v17 = vsel %vm3294_vm7, %v6133_v16, 0.0 }
 0xb93   : > { %3785 = vadd.xlane.f32.xlu0 %v3784_v17 }
 0xba9   : > { %3790 = vrot.lane.b32.xlu0 %v7289_v39, %s6262_s16 }
 0xbbf   : > { %v3720_v18 = vpop.f32.mrb[48].mxu0 }
 0xbc0   : > { %v3726_v19 = vadd.f32 %v3720_v18, %v7347_v50  ;;  %v5632_v20 = vpop.f32.mrb[49].mxu0 }
 0xbc1   : > { %v3723_v21 = vpop.f32.mrb[50].mxu0 }
 0xbc2   : > { %v5633_v22 = vpop.f32.mrb[51].mxu0 }
 0xc20   : > { %v3786_v24 = vpop.xlane.xlu0 %3785 }
 0xc21   : > { %6134 = vrcp.f32 %v3786_v24 }
 0xc24   : > { %v3791_v25 = vpop.permute.xlu0 %3790 }
 0xc25   : > { %v3796_v26 = vand.u32 %v3791_v25, %v7287_v38 }
 0xc27   : > { %5641 = vmatpush3.bf16.msra.mxu0 %v3796_v26 }
 0xc28   : > { %5652 = vmatprep.subr.bf16.mxu0 %v6253_v23 }
 0xc2b   : > { %v6135_v27 = vpop.eup %6134 }
 0xc2c   : > { %v3788_v28 = vmul.f32 %v6135_v27, %v6133_v16 }
 0xc2e   : > { %v3789_v30 = vpack.c.bf16 %v3788_v28, %v3788_v28 }
 0xc30   : > { %5643 = vmatmul.mubr.msk.bf16.vlgmr.msra.gmra.mrb[52].mxu0 %vm3307_vm8, %v3789_v30 }
 0xc31   : > { %5653 = vmatpush3.bf16.xpose.msra.mxu0 %v3895_v31  ;;  %5654 = vmatprep.mubr.msk.bf16.mxu0 %vm6254_vm3, %v6253_v23 }
 0xc32   : > { %5664 = vmatprep.subr.bf16.mxu0 %v6253_v23 }
 0xc38   : > { %5655 = vmatmul.mubr.msk.bf16.vlgmr.msra.gmra.mrb[56].mxu0 %vm3246_vm6, %v3888_v32 }
 0xc39   : > { %5666 = vmatprep.mubr.msk.bf16.mxu0 %vm6254_vm3, %v6253_v23  ;;  %5665 = vmatpush3.bf16.msra.mxu0 %v4004_v6 }
 0xc3a   : > { %5676 = vmatprep.subr.bf16.mxu0 %v6253_v23 }
 0xd03   : > { %v3832_v35 = vpop.f32.mrb[52].mxu0 }
 0xd04   : > { %v3838_v37 = vpack.c.bf16 %v3832_v35, %v3832_v35  ;;  %v5644_v50 = vpop.f32.mrb[53].mxu0 }
 0xd05   : > { %v3835_v51 = vpop.f32.mrb[54].mxu0  ;;  %v4159_v50 = vld [vmem:[%s7572_s11 + $0x14] sm:$0xf] }
 0xd06   : > { %v5645_v53 = vpop.f32.mrb[55].mxu0  ;;  %5649 = vmatmul.mubr.msk.bf16.vlgmr.msra.gmra.mrb[52].mxu1 %vm3246_vm6, %v3838_v37  ;;  %v4164_v51 = vsel %vm3477_vm9, %v4159_v50, 0 }
 0xd07   : > { %5660 = vmatprep.mubr.msk.bf16.mxu1 %vm6254_vm3, %v6253_v23 }
 0xd0b   : > { %v3931_v40 = vpop.f32.mrb[56].mxu0 }
 0xd0c   : > { %v3937_v41 = vmul.f32 0.35355338, %v3931_v40  ;;  %v5656_v42 = vpop.f32.mrb[57].mxu0 }
 0xd0d   : > { %v3934_v43 = vpop.f32.mrb[58].mxu0 }
 0xd0e   : > { %v5657_v44 = vpop.f32.mrb[59].mxu0  ;;  %v3938_v45 = vsel %vm3294_vm7, %v3937_v41, -inf }
 0xd0f   : > { %3939 = vmax.xlane.f32.xlu0 %v3938_v45 }
 0xd25   : > { %3950 = vrot.lane.b32.xlu0 %v7289_v39, %s6265_s15  ;;  %s6270_s15 = smov 72  }
 0xd29   : > { %4047 = vrot.lane.b32.xlu0 %v7285_v36, %s6266_s25 }
 0xd9c   : > { %v3940_v46 = vpop.xlane.xlu0 %3939 }
 0xd9d   : > { %v3941_v47 = vsub.f32 %v3937_v41, %v3940_v46 }
 0xd9f   : > { %v3942_v48 = vmul.f32 1.442695, %v3941_v47 }
 0xda0   : > { %v3951_v49 = vpop.permute.xlu0 %3950 }
 0xda1   : > { %6136 = vpow2.f32 %v3942_v48  ;;  %v3956_v54 = vand.u32 %v3951_v49, %v7287_v38 }
 0xda3   : > { %5659 = vmatpush3.bf16.msra.mxu1 %v3956_v54 }
 0xda4   : > { %5670 = vmatprep.subr.bf16.mxu1 %v6253_v23  ;;  %v4048_v4 = vpop.permute.xlu0 %4047 }
 0xdab   : > { %v6137_v55 = vpop.eup %6136 }
 0xdac   : > { %v3944_v56 = vsel %vm3294_vm7, %v6137_v55, 0.0 }
 0xdad   : > { %3945 = vadd.xlane.f32.xlu1 %v3944_v56 }
 0xdbe   : > { %4049 = vrot.lane.b32.xlu1 %v7285_v36, %s6267_s29 }
 0xdd9   : > { %v3880_v57 = vpop.f32.mrb[52].mxu1 }
 0xdda   : > { %v3886_v58 = vadd.f32 %v3880_v57, %v3726_v19  ;;  %v5650_v59 = vpop.f32.mrb[53].mxu1 }
 0xddb   : > { %v3883_v60 = vpop.f32.mrb[54].mxu1 }
 0xddc   : > { %v5651_v61 = vpop.f32.mrb[55].mxu1 }
 0xe3a   : > { %v3946_v62 = vpop.xlane.xlu1 %3945 }
 0xe3b   : > { %6138 = vrcp.f32 %v3946_v62 }
 0xe3e   : > { %v4050_v1 = vpop.permute.xlu1 %4049 }
 0xe3f   : > { %v4055_v3 = vsel %vm3246_vm6, %v4050_v1, 0 }
 0xe45   : > { %v6139_v63 = vpop.eup %6138 }
 0xe46   : > { %v3948_v0 = vmul.f32 %v6139_v63, %v6137_v55 }
 0xe48   : > { %v3949_v2 = vpack.c.bf16 %v3948_v0, %v3948_v0 }
 0xe4a   : > { %5661 = vmatmul.mubr.msk.bf16.vlgmr.msra.gmra.mrb[56].mxu1 %vm3307_vm8, %v3949_v2 }
 0xe4b   : > { %5671 = vmatpush3.bf16.xpose.msra.mxu1 %v4055_v3  ;;  %5672 = vmatprep.mubr.msk.bf16.mxu1 %vm6254_vm3, %v6253_v23 }
 0xe4c   : > { %5682 = vmatprep.subr.bf16.mxu1 %v6253_v23 }
 0xe52   : > { %5673 = vmatmul.mubr.msk.bf16.vlgmr.msra.gmra.mrb[60].mxu1 %vm3246_vm6, %v4048_v4 }
 0xe53   : > { %5684 = vmatprep.mubr.msk.bf16.mxu1 %vm6254_vm3, %v6253_v23  ;;  %5683 = vmatpush3.bf16.msra.mxu1 %v4164_v51 }
 0xe54   : > { %5694 = vmatprep.subr.bf16.mxu1 %v6253_v23 }
 0xf1d   : > { %v3992_v7 = vpop.f32.mrb[56].mxu1 }
 0xf1e   : > { %v3998_v8 = vpack.c.bf16 %v3992_v7, %v3992_v7  ;;  %v5662_v52 = vpop.f32.mrb[57].mxu1 }
 0xf1f   : > { %v3995_v9 = vpop.f32.mrb[58].mxu1 }
 0xf20   : > { %v5663_v10 = vpop.f32.mrb[59].mxu1  ;;  %5667 = vmatmul.mubr.msk.bf16.vlgmr.msra.gmra.mrb[60].mxu0 %vm3246_vm6, %v3998_v8  ;;  %v4319_v8 = vld [vmem:[%s7572_s11 + $0x18] sm:$0xf] }
 0xf21   : > { %5678 = vmatprep.mubr.msk.bf16.mxu0 %vm6254_vm3, %v6253_v23  ;;  %v4324_v52 = vsel %vm3477_vm9, %v4319_v8, 0 }
 0xf25   : > { %v4091_v11 = vpop.f32.mrb[60].mxu1 }
 0xf26   : > { %v4097_v12 = vmul.f32 0.35355338, %v4091_v11  ;;  %v5674_v13 = vpop.f32.mrb[61].mxu1 }
 0xf27   : > { %v4094_v14 = vpop.f32.mrb[62].mxu1 }
 0xf28   : > { %v5675_v15 = vpop.f32.mrb[63].mxu1  ;;  %v4098_v16 = vsel %vm3294_vm7, %v4097_v12, -inf }
 0xf29   : > { %4099 = vmax.xlane.f32.xlu1 %v4098_v16 }
 0xf3a   : > { %4209 = vrot.lane.b32.xlu1 %v7285_v36, %s6268_s27 }
 0xf3e   : > { %4207 = vrot.lane.b32.xlu1 %v7285_v36, %s6269_s17 }
 0xfb6   : > { %v4100_v17 = vpop.xlane.xlu1 %4099 }
 0xfb7   : > { %v4101_v18 = vsub.f32 %v4097_v12, %v4100_v17 }
 0xfb9   : > { %v4102_v19 = vmul.f32 1.442695, %v4101_v18 }
 0xfba   : > { %v4210_v33 = vpop.permute.xlu1 %4209 }
 0xfbb   : > { %6140 = vpow2.f32 %v4102_v19  ;;  %v4215_v35 = vsel %vm3246_vm6, %v4210_v33, 0 }
 0xfbe   : > { %v4208_v37 = vpop.permute.xlu1 %4207 }
 0xfc5   : > { %v6141_v20 = vpop.eup %6140 }
 0xfc6   : > { %v4104_v21 = vsel %vm3294_vm7, %v6141_v20, 0.0 }
 0xfc7   : > { %4105 = vadd.xlane.f32.xlu0 %v4104_v21 }
 0xfdd   : > { %4110 = vrot.lane.b32.xlu0 %v7289_v39, %s6266_s25 }
 0xff3   : > { %v4040_v22 = vpop.f32.mrb[60].mxu0 }
 0xff4   : > { %v4046_v24 = vadd.f32 %v4040_v22, %v3886_v58  ;;  %v5668_v25 = vpop.f32.mrb[61].mxu0 }
 0xff5   : > { %v4043_v26 = vpop.f32.mrb[62].mxu0 }
 0xff6   : > { %v5669_v27 = vpop.f32.mrb[63].mxu0 }
0x1054   : > { %v4106_v28 = vpop.xlane.xlu0 %4105 }
0x1055   : > { %6142 = vrcp.f32 %v4106_v28 }
0x1058   : > { %v4111_v29 = vpop.permute.xlu0 %4110 }
0x1059   : > { %v4116_v30 = vand.u32 %v4111_v29, %v7287_v38 }
0x105b   : > { %5677 = vmatpush3.bf16.msra.mxu0 %v4116_v30 }
0x105c   : > { %5688 = vmatprep.subr.bf16.mxu0 %v6253_v23 }
0x105f   : > { %v6143_v31 = vpop.eup %6142 }
0x1060   : > { %v4108_v32 = vmul.f32 %v6143_v31, %v6141_v20 }
0x1062   : > { %v4109_v34 = vpack.c.bf16 %v4108_v32, %v4108_v32 }
0x1064   : > { %5679 = vmatmul.mubr.msk.bf16.vlgmr.msra.gmra.mrb[64].mxu0 %vm3307_vm8, %v4109_v34 }
0x1065   : > { %5689 = vmatpush3.bf16.xpose.msra.mxu0 %v4215_v35  ;;  %5690 = vmatprep.mubr.msk.bf16.mxu0 %vm6254_vm3, %v6253_v23 }
0x1066   : > { %5700 = vmatprep.subr.bf16.mxu0 %v6253_v23 }
0x106c   : > { %5691 = vmatmul.mubr.msk.bf16.vlgmr.msra.gmra.mrb[68].mxu0 %vm3246_vm6, %v4208_v37 }
0x106d   : > { %5702 = vmatprep.mubr.msk.bf16.mxu0 %vm6254_vm3, %v6253_v23  ;;  %5701 = vmatpush3.bf16.msra.mxu0 %v4324_v52 }
0x106e   : > { %5712 = vmatprep.subr.bf16.mxu0 %v6253_v23 }
0x1137   : > { %v4152_v53 = vpop.f32.mrb[64].mxu0 }
0x1138   : > { %v4158_v40 = vpack.c.bf16 %v4152_v53, %v4152_v53  ;;  %v5680_v41 = vpop.f32.mrb[65].mxu0 }
0x1139   : > { %v4155_v42 = vpop.f32.mrb[66].mxu0 }
0x113a   : > { %v5681_v43 = vpop.f32.mrb[67].mxu0  ;;  %5685 = vmatmul.mubr.msk.bf16.vlgmr.msra.gmra.mrb[64].mxu1 %vm3246_vm6, %v4158_v40 }
0x113b   : > { %5696 = vmatprep.mubr.msk.bf16.mxu1 %vm6254_vm3, %v6253_v23  ;;  %v5232_v43 = vld [vmem:[%s7573_s12] ss:$0 sm:$0xff] }
0x113f   : > { %v4251_v44 = vpop.f32.mrb[68].mxu0 }
0x1140   : > { %v4257_v45 = vmul.f32 0.35355338, %v4251_v44  ;;  %v5692_v46 = vpop.f32.mrb[69].mxu0 }
0x1141   : > { %v4254_v47 = vpop.f32.mrb[70].mxu0 }
0x1142   : > { %v5693_v48 = vpop.f32.mrb[71].mxu0  ;;  %v4258_v49 = vsel %vm3294_vm7, %v4257_v45, -inf }
0x1143   : > { %4259 = vmax.xlane.f32.xlu0 %v4258_v49 }
0x1159   : > { %4270 = vrot.lane.b32.xlu0 %v7289_v39, %s6269_s17 }
0x115d   : > { %4367 = vrot.lane.b32.xlu0 %v7285_v36, %s6270_s15 }
0x11d0   : > { %v4260_v54 = vpop.xlane.xlu0 %4259 }
0x11d1   : > { %v4261_v55 = vsub.f32 %v4257_v45, %v4260_v54 }
0x11d3   : > { %v4262_v56 = vmul.f32 1.442695, %v4261_v55 }
0x11d4   : > { %v4271_v57 = vpop.permute.xlu0 %4270 }
0x11d5   : > { %6144 = vpow2.f32 %v4262_v56  ;;  %v4276_v58 = vand.u32 %v4271_v57, %v7287_v38 }
0x11d7   : > { %5695 = vmatpush3.bf16.msra.mxu1 %v4276_v58 }
0x11d8   : > { %5706 = vmatprep.subr.bf16.mxu1 %v6253_v23 }
0x11df   : > { %v6145_v59 = vpop.eup %6144 }
0x11e0   : > { %v4264_v60 = vsel %vm3294_vm7, %v6145_v59, 0.0 }
0x11e1   : > { %4265 = vadd.xlane.f32.xlu1 %v4264_v60 }
0x11f2   : > { %4369 = vrot.lane.b32.xlu1 %v7285_v36, %s6271_s18  ;;  %v4368_v36 = vpop.permute.xlu0 %4367 }
0x120d   : > { %v4200_v61 = vpop.f32.mrb[64].mxu1 }
0x120e   : > { %v4206_v62 = vadd.f32 %v4200_v61, %v4046_v24  ;;  %v5686_v63 = vpop.f32.mrb[65].mxu1 }
0x120f   : > { %v4203_v0 = vpop.f32.mrb[66].mxu1  ;;  %v6272_v63 = vmov (!%p5233_p1), 0.0  }
0x1210   : > { %v5687_v1 = vpop.f32.mrb[67].mxu1  ;;  %v6153_v0 = vld [vmem:[%s7574_s13 + $0x8] sm:$0xff] (!%p5233_p1)  }
0x1211   : > { %v6154_v1 = vld [vmem:[%s7574_s13 + $0x10] sm:$0xff] (!%p5233_p1)  }
0x126e   : > { %v4266_v2 = vpop.xlane.xlu1 %4265 }
0x126f   : > { %6146 = vrcp.f32 %v4266_v2 }
0x1272   : > { %v4370_v5 = vpop.permute.xlu1 %4369 }
0x1273   : > { %v4375_v7 = vsel %vm3246_vm6, %v4370_v5, 0 }
0x1279   : > { %v6147_v3 = vpop.eup %6146 }
0x127a   : > { %v4268_v4 = vmul.f32 %v6147_v3, %v6145_v59  ;;  %v4535_v59 = vld [vmem:[#allocation4] sm:$0x1] }
0x127c   : > { %v4269_v6 = vpack.c.bf16 %v4268_v4, %v4268_v4  ;;  %v6155_v4 = vld [vmem:[%s7574_s13 + $0x18] sm:$0xff] (!%p5233_p1)  }
0x127e   : > { %5697 = vmatmul.mubr.msk.bf16.vlgmr.msra.gmra.mrb[68].mxu1 %vm3307_vm8, %v4269_v6  ;;  %v4564_v6 = vld [vmem:[%s7575_s14] sm:$0x1] (!%p5233_p1) }
0x127f   : > { %5707 = vmatpush3.bf16.xpose.msra.mxu1 %v4375_v7  ;;  %5708 = vmatprep.mubr.msk.bf16.mxu1 %vm6254_vm3, %v6253_v23 }
0x1280   : > { %5718 = vmatprep.subr.bf16.mxu1 %v6253_v23 }
0x1286   : > { %5709 = vmatmul.mubr.msk.bf16.vlgmr.msra.gmra.mrb[72].mxu1 %vm3246_vm6, %v4368_v36 }
0x1287   : > { %5720 = vmatprep.mubr.msk.bf16.mxu1 %vm6254_vm3, %v6253_v23 }
0x1351   : > { %v4312_v9 = vpop.f32.mrb[68].mxu1 }
0x1352   : > { %v4318_v10 = vpack.c.bf16 %v4312_v9, %v4312_v9  ;;  %v5698_v11 = vpop.f32.mrb[69].mxu1 }
0x1353   : > { %v4315_v12 = vpop.f32.mrb[70].mxu1 }
0x1354   : > { %v5699_v13 = vpop.f32.mrb[71].mxu1  ;;  %5703 = vmatmul.mubr.msk.bf16.vlgmr.msra.gmra.mrb[72].mxu0 %vm3246_vm6, %v4318_v10 }
0x1355   : > { %5714 = vmatprep.mubr.msk.bf16.mxu0 %vm6254_vm3, %v6253_v23  ;;  %v4479_v23 = vld [vmem:[%s7572_s11 + $0x1c] sm:$0xf] }
0x1356   : > { %v4484_v26 = vsel %vm3477_vm9, %v4479_v23, 0 }
0x1357   : > { %5719 = vmatpush3.bf16.msra.mxu1 %v4484_v26 }
0x1359   : > { %v4411_v14 = vpop.f32.mrb[72].mxu1 }
0x135a   : > { %v4417_v15 = vmul.f32 0.35355338, %v4411_v14  ;;  %v5710_v16 = vpop.f32.mrb[73].mxu1 }
0x135b   : > { %v4414_v17 = vpop.f32.mrb[74].mxu1 }
0x135c   : > { %v5711_v18 = vpop.f32.mrb[75].mxu1  ;;  %v4418_v19 = vsel %vm3294_vm7, %v4417_v15, -inf }
0x135d   : > { %4419 = vmax.xlane.f32.xlu1 %v4418_v19 }
0x13ea   : > { %v4420_v20 = vpop.xlane.xlu1 %4419 }
0x13eb   : > { %v4421_v21 = vsub.f32 %v4417_v15, %v4420_v20 }
0x13ed   : > { %v4422_v22 = vmul.f32 1.442695, %v4421_v21 }
0x13ef   : > { %6148 = vpow2.f32 %v4422_v22 }
0x13f9   : > { %v6149_v24 = vpop.eup %6148 }
0x13fa   : > { %v4424_v25 = vsel %vm3294_vm7, %v6149_v24, 0.0 }
0x13fb   : > { %4425 = vadd.xlane.f32.xlu0 %v4424_v25 }
0x1411   : > { %4430 = vrot.lane.b32.xlu0 %v7289_v39, %s6270_s15 }
0x1427   : > { %v4360_v27 = vpop.f32.mrb[72].mxu0 }
0x1428   : > { %v4366_v28 = vadd.f32 %v4360_v27, %v4206_v62  ;;  %v5704_v29 = vpop.f32.mrb[73].mxu0  ;;  %v6152_v62 = vld [vmem:[%s7574_s13] sm:$0xff] (!%p5233_p1)  }
0x1429   : > { %v4363_v30 = vpop.f32.mrb[74].mxu0 }
0x142a   : > { %v5705_v31 = vpop.f32.mrb[75].mxu0 }
0x1488   : > { %v4426_v32 = vpop.xlane.xlu0 %4425 }
0x1489   : > { %6150 = vrcp.f32 %v4426_v32 }
0x148c   : > { %v4431_v33 = vpop.permute.xlu0 %4430 }
0x148d   : > { %v4436_v34 = vand.u32 %v4431_v33, %v7287_v38 }
0x148f   : > { %5713 = vmatpush3.bf16.msra.mxu0 %v4436_v34 }
0x1490   : > { %5724 = vmatprep.subr.bf16.mxu0 (!%p5233_p1), %v6272_v63 }
0x1493   : > { %v6151_v35 = vpop.eup %6150 }
0x1494   : > { %v4428_v39 = vmul.f32 %v6151_v35, %v6149_v24 }
0x1496   : > { %v4429_v37 = vpack.c.bf16 %v4428_v39, %v4428_v39 }
0x1498   : > { %5715 = vmatmul.mubr.msk.bf16.vlgmr.msra.gmra.mrb[76].mxu0 %vm3307_vm8, %v4429_v37 }
0x1499   : > { %5725 = vmatpush3.bf16.msra.mxu0 (!%p5233_p1), %v6152_v62  ;;  %5732 = vmatprep.mubr.msk.bf16.mxu0 (!%p5233_p1), %vm6273_vm12, %v6272_v63 }
0x149a   : > { %5726 = vmatprep.subr.bf16.mxu0 (!%p5233_p1), %v6272_v63 }
0x149d   : > { %5727 = vmatpush3.bf16.msra.mxu0 (!%p5233_p1), %v6153_v0 }
0x149e   : > { %5728 = vmatprep.subr.bf16.mxu0 (!%p5233_p1), %v6272_v63 }
0x14a1   : > { %5729 = vmatpush3.bf16.msra.mxu0 (!%p5233_p1), %v6154_v1 }
0x14a2   : > { %5730 = vmatprep.subr.bf16.mxu0 (!%p5233_p1), %v6272_v63 }
0x14a5   : > { %5731 = vmatpush3.bf16.msra.mxu0 (!%p5233_p1), %v6155_v4 }
0x156b   : > { %v4472_v50 = vpop.f32.mrb[76].mxu0 }
0x156c   : > { %v4478_v51 = vpack.c.bf16 %v4472_v50, %v4472_v50  ;;  %v5716_v53 = vpop.f32.mrb[77].mxu0 }
0x156d   : > { %v4475_v40 = vpop.f32.mrb[78].mxu0 }
0x156e   : > { %v5717_v41 = vpop.f32.mrb[79].mxu0  ;;  %5721 = vmatmul.mubr.msk.bf16.vlgmr.msra.gmra.mrb[76].mxu1 %vm3246_vm6, %v4478_v51 }
0x1641   : > { %v4520_v42 = vpop.f32.mrb[76].mxu1 }
0x1642   : > { %v4526_v44 = vadd.f32 %v4520_v42, %v4366_v28  ;;  %v5722_v38 = vpop.f32.mrb[77].mxu1 }
0x1643   : > { %v4523_v45 = vpop.f32.mrb[78].mxu1 }
0x1644   : > { %v4534_v46 = vadd.f32 %v5232_v43, %v4526_v44  ;;  %v5723_v47 = vpop.f32.mrb[79].mxu1 }
0x1646   : > { %v4537_v48 = vsel %vm4536_vm10, %v4534_v46, 0.0 }
0x1647   : > { %v4538_v49 = vrot.slane %v4537_v48, 4 }
0x1649   : > { %v4539_v54 = vadd.f32 %v4538_v49, %v4537_v48 }
0x164b   : > { %v4540_v55 = vrot.slane %v4539_v54, 2 }
0x164d   : > { %v4541_v56 = vadd.f32 %v4540_v55, %v4539_v54 }
0x164f   : > { %v4542_v57 = vrot.slane %v4541_v56, 1 }
0x1651   : > { %v4543_v58 = vadd.f32 %v4542_v57, %v4541_v56  ;;  %4552 = sbr.rel (%p5233_p1) target bundleno = 5946 (0x173a), region = 88 }
0x1653   : > { %v4545_v60 = vmul.f32 0.2, %v4543_v58 }
0x1655   : > { %v4546_v61 = vadd.f32 %v4545_v60, %v4535_v59 }
0x1657   : > { %4548 = vst.msk [vmem:[#allocation4] sm:$0x1] %vm4547_vm11, %v4546_v61 }
0x165e   : > { %v4553_v2 = vld [vmem:[#allocation4] sm:$0x1] }
0x165f   : > { %v4554_v3 = vmul.f32 0.5, %v4553_v2 }
0x1661   : > { %v4555_v5 = vpack.c.bf16 %v4554_v3, %v4554_v3 }
0x1663   : > { %5733 = vmatmul.mubr.msk.bf16.vlgmr.msra.gmra.mrb[0].mxu0 %vm995_vm1, %v4555_v5 }
0x1736   : > { %v4626_v7 = vpop.f32.mrb[0].mxu0 }
0x1737   : > { %v4627_v36 = vadd.f32 %v4626_v7, %v4564_v6  ;;  %v5734_v8 = vpop.f32.mrb[1].mxu0 }
0x1738   : > { %v4629_v52 = vpop.f32.mrb[2].mxu0 }
0x1739   : > { %4632 = vst [vmem:[%s6436_s28] sm:$0x1] %v4627_v36  ;;  %v5735_v9 = vpop.f32.mrb[3].mxu0 }
0x173a PF: > { %s5239_s16 = sshll.u32 %s6238_s22, 4  ;;  %s7601_s20 = sld [smem:[#allocation18_spill]] }
0x173b   : > { %s4646_s18 = sshll.u32 %s6436_s28, 4  ;;  %s7603_s24 = sand.u32 1, %s6226_s19   ;;  %s4647_s18 = int_to_ptr.vmem [resolvable:$true] %s4646_s18 }
0x173c   : > { %s4634_s21 = scalar_lea.sflag [#allocation6], %s7603_s24  ;;  %s6156_s25 = scalar_lea.vmem %s4647_s18, 16 }
0x173d   : > { %p6157_p2 = scmp.ne.s32.totalorder %s4647_s18, %s6156_s25  ;;  %s6274_s29 = smov [#allocation5]  }
0x173e   : > { %s6160_s26 = sshll.u32 %s6274_s29, 4  ;;  %s6161_s26 = int_to_ptr.vmem [resolvable:$false] %s6160_s26 }
0x173f   : > { %p6158_p4 = pnand %p6157_p2, %p6404_p3  ;;  %s6162_s0 = scalar_lea.vmem %s6161_s26, 32 }
0x1740   : > { %s7602_s15 = smov %s7601_s20  ;;  %s7511_s23 = scalar_lea.hbm %s7601_s20, %s5239_s16 }
0x1741   : > { %p6159_p5 = pneg %p6158_p4  ;;  %p6163_p6 = scmp.lt.s32.totalorder %s4647_s18, %s6161_s26 }
0x1742   : > { %p6164_p7 = scmp.lt.s32.totalorder %s6162_s0, %s6156_s25 }
0x1744   : > { %p6165_p8 = por %p6164_p7, %p6163_p6 }
0x1746   : > { %p6166_p10 = pnand %p6165_p8, %p6159_p5 }
0x1748   : > { %6169 = shalt.err (!%p6166_p10)
}
0x1749   : > { %s6170_s22 = scalar_lea.hbm %s7511_s23, 16  ;;  %s6174_s27 = scalar_lea.hbm %s7602_s15, 32 }
0x174a   : > { %p6171_p11 = scmp.ne.s32.totalorder %s7511_s23, %s6170_s22  ;;  %p6175_p0 = scmp.lt.u32.totalorder %s7511_s23, %s7602_s15 }
0x174b   : > { %p6176_p1 = scmp.lt.u32.totalorder %s6174_s27, %s6170_s22  ;;  %p6178_p4 = scmp.lt.u32.totalorder %s6170_s22, %s7511_s23 }
0x174c   : > { %p6172_p12 = pnand %p6171_p11, %p6404_p3 }
0x174d   : > { %p6177_p2 = por %p6176_p1, %p6175_p0 }
0x174e   : > { %p6173_p13 = pneg %p6172_p12 }
0x174f   : > { %p6179_p5 = por %p6178_p4, %p6177_p2 }
0x1751   : > { %p6180_p6 = pnand %p6179_p5, %p6173_p13 }
0x1753   : > { %6183 = shalt.err (!%p6180_p6)
}
0x1754   : > { %5736 = dma.vmem_to_hbm [thread:$0]  (%p6404_p3), %s4647_s18, 16, %s7511_s23, %s4634_s21  }
0x1755 PF: > { %s7604_s0 = sld [smem:[#allocation12_spill]]  ;;  %s7605_s24 = sld [smem:[#allocation8_spill]] }
0x175b   : > { %p5742_p7 = scmp.ge.s32.totalorder %s7604_s0, 2  ;;  %s4658_s29 = sand.u32 1, %s7605_s24  }
0x175c   : > { %s4659_s26 = scalar_lea.sflag [#allocation6], %s4658_s29 }
0x175d   : > { %p5739_p8 = pnand %p5742_p7, %p6414_p9 }
0x175f   : > { %6217 = dma.done.wait (!%p5739_p8), %s4659_s26, 16  }
0x1760   : > { %6219 = vsyncadd (!%p5739_p8), %s4659_s26, 4294967280  ;;  %s28_s25 = sadd.s32 1, %s7604_s0   ;;  %s7607_s22 = sld [smem:[#allocation9_spill]] }
0x1761   : > { %p25_p10 = scmp.ge.s32.totalorder %s28_s25, 6   ;;  %s7608_s20 = sld [smem:[#allocation16_spill]] }
0x1762   : > { %s7609_s21 = sld [smem:[#allocation10_spill]]  ;;  %s7610_s30 = sld [smem:[#allocation11_spill]] }
0x1763   : > { %s7611_s23 = sld [smem:[#allocation13_spill]]  ;;  %s7612_s24 = sld [smem:[#allocation14_spill]] }
0x1764   : > { %s7613_s18 = smov %s6226_s19  ;;  %27 = sbr.rel (!%p25_p10) target bundleno = 8 (0x8), region = 129 }
0x1766   : > { %s7614_s19 = smov %s7607_s22 }
0x1768   : > { %s7615_s22 = smov %s7610_s30 }
0x176b   :  { %4663 = vsyncpa [#allocation6], 1 }
0x176c   :  { %4665 = vsyncpa [#allocation6 + $0x1], 1 }

</bundles_post_ra>
